<compile_context>
chip_gen: v7x
topology: tpu7x:2x2x1
jax: 0.10.0
libtpu: 0.0.40
codegen_flags: <defaults>
</compile_context>

<pallas_src>
import functools

import jax
import jax.numpy as jnp
from jax.experimental import pallas as pl
from jax.experimental.pallas import tpu as pltpu

EPS = 1e-5  # nn.LayerNorm default eps


def _round_up(n, m):
    return ((n + m - 1) // m) * m


def _layernorm_padded(x, gamma, beta, c_real):
    """LayerNorm over the last axis when its tail is zero padding.

    Requires padded entries of `x` to be exactly zero and gamma/beta zero in
    the padded columns (so padded outputs stay exactly zero).  One-pass
    statistics normalized by the real channel count are then exact.
    """
    inv_c = 1.0 / c_real
    mean = jnp.sum(x, axis=-1, keepdims=True) * inv_c
    ex2 = jnp.sum(x * x, axis=-1, keepdims=True) * inv_c
    var = ex2 - mean * mean
    return (x - mean) * jax.lax.rsqrt(var + EPS) * gamma + beta


# ----------------------------------------------------------------------------
# Fused kernel: all transformer blocks + final LN + head, grid over layers.
# ----------------------------------------------------------------------------
def fused_transformer_kernel(x_ref, wqkv_ref, wproj_ref, bproj_ref,
                             w1_ref, b1_ref, w2_ref, b2_ref,
                             g1_ref, be1_ref, g2_ref, be2_ref,
                             gf_ref, bf_ref, hw_ref, hb_ref,
                             o_ref, act_ref,
                             *, batch, seq, num_heads, head_size, c_real):
    l = pl.program_id(0)
    n_layers = pl.num_programs(0)
    B, T, H = batch, seq, num_heads
    M, Cp = act_ref.shape                     # M = B*T, Cp = padded embed dim
    HDq = wqkv_ref.shape[-1] // 3             # H * Dp (padded per-head group)
    Dp = HDq // H
    scale = 1.0 / (float(head_size) ** 0.5)   # SDPA scale uses the REAL dim

    # Load the input once; the activation stays resident in VMEM scratch
    # across the whole layer stream.
    @pl.when(l == 0)
    def _():
        act_ref[...] = x_ref[...]

    x = act_ref[...]                                              # (M, Cp) f32

    # ------------------- self-attention branch (pre-LN) --------------------
    h = _layernorm_padded(x, g1_ref[...], be1_ref[...], c_real)   # (M, Cp)
    qkv = jnp.dot(h.astype(jnp.bfloat16), wqkv_ref[...],
                  preferred_element_type=jnp.float32)             # (M, 3*H*Dp)
    qkv = qkv.astype(jnp.bfloat16)                                # single cast

    def heads(y2d):                       # (M, H*Dp) -> (B*H, T, Dp)
        y = y2d.reshape(B, T, H, Dp)
        return jnp.transpose(y, (0, 2, 1, 3)).reshape(B * H, T, Dp)

    # Slices are at multiples of 128 lanes (Dp % 128 == 0) -> no relayout.
    q = heads(qkv[:, 0:HDq])
    k = heads(qkv[:, HDq:2 * HDq])
    v = heads(qkv[:, 2 * HDq:3 * HDq])

    s = jnp.einsum('zqd,zkd->zqk', q, k,
                   preferred_element_type=jnp.float32) * scale    # (B*H, T, T)
    s = s - jnp.max(s, axis=-1, keepdims=True)
    p = jnp.exp(s)
    p = p * pl.reciprocal(jnp.sum(p, axis=-1, keepdims=True), approx=True)
    o = jnp.einsum('zqk,zkd->zqd', p.astype(jnp.bfloat16), v,
                   preferred_element_type=jnp.float32)            # (B*H, T, Dp)

    o = o.astype(jnp.bfloat16).reshape(B, H, T, Dp)
    o = jnp.transpose(o, (0, 2, 1, 3)).reshape(M, HDq)            # (M, H*Dp)

    sa = jnp.dot(o, wproj_ref[...], preferred_element_type=jnp.float32)
    x1 = x + sa + bproj_ref[...]

    # ----------------------- feed-forward branch (pre-LN) ------------------
    h2 = _layernorm_padded(x1, g2_ref[...], be2_ref[...], c_real)
    ff = jnp.dot(h2.astype(jnp.bfloat16), w1_ref[...],
                 preferred_element_type=jnp.float32) + b1_ref[...]
    ff = jnp.maximum(ff, 0.0)
    ff = jnp.dot(ff.astype(jnp.bfloat16), w2_ref[...],
                 preferred_element_type=jnp.float32) + b2_ref[...]
    xo = x1 + ff
    act_ref[...] = xo                                    # carry to next layer

    # ------------- final LayerNorm + classifier head (last step) -----------
    @pl.when(l == n_layers - 1)
    def _():
        last = xo.reshape(B, T, Cp)[:, T - 1, :]         # (B, Cp) last token
        hf = _layernorm_padded(last, gf_ref[...], bf_ref[...], c_real)
        o_ref[...] = jnp.dot(hf.astype(jnp.bfloat16), hw_ref[...],
                             preferred_element_type=jnp.float32) + hb_ref[...]


# ----------------------------------------------------------------------------
# Wrapper
# ----------------------------------------------------------------------------
def transformer_forward(x, fp, *, num_classes, num_heads, head_size):
    B, T, C = x.shape
    L, Cp, _ = fp["wqkv"].shape
    NCp = fp["head_w"].shape[-1]
    M = B * T

    # Pad the input channels to the lane-dense width and fold batch into M.
    x_pad = jnp.zeros((B, T, Cp), jnp.float32).at[:, :, :C].set(x)
    x_pad = x_pad.reshape(M, Cp)

    kernel = functools.partial(fused_transformer_kernel,
                               batch=B, seq=T, num_heads=num_heads,
                               head_size=head_size, c_real=float(C))

    def per_layer(a):                       # stacked (L, ...) -> squeezed block
        nrest = a.ndim - 1
        return pl.BlockSpec((pl.Squeezed(),) + tuple(a.shape[1:]),
                            lambda l, _n=nrest: (l,) + (0,) * _n)

    def shared(a):                          # layer-invariant arrays
        n = a.ndim
        return pl.BlockSpec(tuple(a.shape), lambda l, _n=n: (0,) * _n)

    layer_args = (fp["wqkv"], fp["wproj"], fp["bproj"], fp["w1"], fp["b1"],
                  fp["w2"], fp["b2"], fp["g1"], fp["be1"], fp["g2"], fp["be2"])
    shared_args = (fp["lnf_g"], fp["lnf_b"], fp["head_w"], fp["head_b"])

    in_specs = [shared(x_pad)]
    in_specs += [per_layer(a) for a in layer_args]
    in_specs += [shared(a) for a in shared_args]

    logits_pad = pl.pallas_call(
        kernel,
        out_shape=jax.ShapeDtypeStruct((B, NCp), jnp.float32),
        grid=(L,),
        in_specs=in_specs,
        out_specs=pl.BlockSpec((B, NCp), lambda l: (0, 0)),
        scratch_shapes=[pltpu.VMEM((M, Cp), jnp.float32)],
        # Layer axis carries the resident activation -> must be sequential.
        compiler_params=pltpu.CompilerParams(
            dimension_semantics=("arbitrary",),
            vmem_limit_bytes=64 * 1024 * 1024),
    )(x_pad, *layer_args, *shared_args)
    return logits_pad[:, :num_classes]


# ----------------------------------------------------------------------------
# Parameter construction (PyTorch-equivalent shapes) and fusion/padding prep
# ----------------------------------------------------------------------------
def make_params(key, *, n_embd, n_head, hidden_size, n_layers, num_classes):
    head_size = n_embd // n_head
    layer_params = []
    for _ in range(n_layers):
        key, *ks = jax.random.split(key, 10)
        layer_params.append(dict(
            wq=0.05 * jax.random.normal(ks[0], (n_head, n_embd, head_size), jnp.float32),
            wk=0.05 * jax.random.normal(ks[1], (n_head, n_embd, head_size), jnp.float32),
            wv=0.05 * jax.random.normal(ks[2], (n_head, n_embd, head_size), jnp.float32),
            wproj=0.05 * jax.random.normal(ks[3], (n_head, head_size, n_embd), jnp.float32),
            bproj=0.05 * jax.random.normal(ks[4], (1, n_embd), jnp.float32),
            w1=0.05 * jax.random.normal(ks[5], (n_embd, hidden_size), jnp.float32),
            b1=0.05 * jax.random.normal(ks[6], (1, hidden_size), jnp.float32),
            w2=0.05 * jax.random.normal(ks[7], (hidden_size, n_embd), jnp.float32),
            b2=0.05 * jax.random.normal(ks[8], (1, n_embd), jnp.float32),
            g1=jnp.ones((1, n_embd), jnp.float32),
            be1=jnp.zeros((1, n_embd), jnp.float32),
            g2=jnp.ones((1, n_embd), jnp.float32),
            be2=jnp.zeros((1, n_embd), jnp.float32),
        ))
    key, k1, k2 = jax.random.split(key, 3)
    lnf_g = jnp.ones((1, n_embd), jnp.float32)
    lnf_b = jnp.zeros((1, n_embd), jnp.float32)
    head_w = 0.05 * jax.random.normal(k1, (n_embd, num_classes), jnp.float32)
    head_b = 0.05 * jax.random.normal(k2, (1, num_classes), jnp.float32)
    return layer_params, lnf_g, lnf_b, head_w, head_b


def prepare_fused_params(layer_params, lnf_g, lnf_b, head_w, head_b,
                         *, num_heads, head_size):
    """Stack per-layer weights on a leading L axis, fuse QKV across heads,
    zero-pad every lane dimension (C, hidden, per-head dim, classes) to a
    multiple of 128, and cast matmul weights to bf16."""
    H, hs = num_heads, head_size
    C = H * hs
    hidden = layer_params[0]["w1"].shape[1]
    Cp = _round_up(C, 128)
    Dp = _round_up(hs, 128)          # per-head lane group, lane-tile aligned
    HDp = _round_up(hidden, 128)
    nc = head_w.shape[1]
    NCp = _round_up(nc, 128)

    def qkv_group(w):                 # (H, C, hs) -> (Cp, H*Dp), zero padded
        wt = jnp.transpose(w, (1, 0, 2))                          # (C, H, hs)
        out = jnp.zeros((Cp, H, Dp), jnp.float32).at[:C, :, :hs].set(wt)
        return out.reshape(Cp, H * Dp)

    def prep_layer(p):
        wqkv = jnp.concatenate([qkv_group(p["wq"]), qkv_group(p["wk"]),
                                qkv_group(p["wv"])], axis=-1)     # (Cp, 3*H*Dp)
        wproj = (jnp.zeros((H, Dp, Cp), jnp.float32)
                 .at[:, :hs, :C].set(p["wproj"]).reshape(H * Dp, Cp))
        return dict(
            wqkv=wqkv, wproj=wproj,
            bproj=jnp.zeros((1, Cp), jnp.float32).at[:, :C].set(p["bproj"]),
            w1=jnp.zeros((Cp, HDp), jnp.float32).at[:C, :hidden].set(p["w1"]),
            b1=jnp.zeros((1, HDp), jnp.float32).at[:, :hidden].set(p["b1"]),
            w2=jnp.zeros((HDp, Cp), jnp.float32).at[:hidden, :C].set(p["w2"]),
            b2=jnp.zeros((1, Cp), jnp.float32).at[:, :C].set(p["b2"]),
            g1=jnp.zeros((1, Cp), jnp.float32).at[:, :C].set(p["g1"]),
            be1=jnp.zeros((1, Cp), jnp.float32).at[:, :C].set(p["be1"]),
            g2=jnp.zeros((1, Cp), jnp.float32).at[:, :C].set(p["g2"]),
            be2=jnp.zeros((1, Cp), jnp.float32).at[:, :C].set(p["be2"]),
        )

    per = [prep_layer(p) for p in layer_params]

    def stack(name):
        return jnp.stack([q[name] for q in per], axis=0)

    return dict(
        wqkv=stack("wqkv").astype(jnp.bfloat16),     # (L, Cp, 3*H*Dp)
        wproj=stack("wproj").astype(jnp.bfloat16),   # (L, H*Dp, Cp)
        w1=stack("w1").astype(jnp.bfloat16),         # (L, Cp, HDp)
        w2=stack("w2").astype(jnp.bfloat16),         # (L, HDp, Cp)
        bproj=stack("bproj"), b1=stack("b1"), b2=stack("b2"),
        g1=stack("g1"), be1=stack("be1"), g2=stack("g2"), be2=stack("be2"),
        lnf_g=jnp.zeros((1, Cp), jnp.float32).at[:, :C].set(lnf_g),
        lnf_b=jnp.zeros((1, Cp), jnp.float32).at[:, :C].set(lnf_b),
        head_w=(jnp.zeros((Cp, NCp), jnp.float32)
                .at[:C, :nc].set(head_w).astype(jnp.bfloat16)),
        head_b=jnp.zeros((1, NCp), jnp.float32).at[:, :nc].set(head_b),
    )


# ----------------------------------------------------------------------------
# Pure-JAX f32 reference (matches the PyTorch module semantics)
# ----------------------------------------------------------------------------
def ref_forward(x, layer_params, lnf_g, lnf_b, head_w, head_b,
                *, num_heads, head_size):
    def ln(y, g, b):
        m = y.mean(-1, keepdims=True)
        v = ((y - m) ** 2).mean(-1, keepdims=True)
        return (y - m) / jnp.sqrt(v + EPS) * g + b

    for p in layer_params:
        h = ln(x, p["g1"][0], p["be1"][0])
        outs = []
        for hd in range(num_heads):
            q = h @ p["wq"][hd]
            k = h @ p["wk"][hd]
            v = h @ p["wv"][hd]
            att = jax.nn.softmax(
                (q @ jnp.swapaxes(k, -1, -2)) / jnp.sqrt(float(head_size)), axis=-1)
            outs.append(att @ v)
        cat = jnp.concatenate(outs, axis=-1)
        wp_full = p["wproj"].reshape(num_heads * head_size, -1)
        x = x + (cat @ wp_full + p["bproj"][0])
        h2 = ln(x, p["g2"][0], p["be2"][0])
        ff = jnp.maximum(h2 @ p["w1"] + p["b1"][0], 0.0) @ p["w2"] + p["b2"][0]
        x = x + ff
    xl = ln(x[:, -1, :], lnf_g[0], lnf_b[0])
    return xl @ head_w + head_b[0]


# ----------------------------------------------------------------------------
if __name__ == "__main__":
    # Small shapes consistent with the module's forward.
    B, T = 2, 8                    # batch, sequence (block_size)
    n_embd, n_head = 32, 4         # embedding, heads (head_size = 8)
    hidden_size = 64
    n_layers = 2
    num_classes = 10
    head_size = n_embd // n_head

    key = jax.random.PRNGKey(0)
    key, kx = jax.random.split(key)
    x = jax.random.normal(kx, (B, T, n_embd), jnp.float32)

    layer_params, lnf_g, lnf_b, head_w, head_b = make_params(
        key, n_embd=n_embd, n_head=n_head, hidden_size=hidden_size,
        n_layers=n_layers, num_classes=num_classes)

    fused = prepare_fused_params(layer_params, lnf_g, lnf_b, head_w, head_b,
                                 num_heads=n_head, head_size=head_size)

    logits = transformer_forward(x, fused, num_classes=num_classes,
                                 num_heads=n_head, head_size=head_size)
    logits = jax.block_until_ready(logits)

    ref = ref_forward(x, layer_params, lnf_g, lnf_b, head_w, head_b,
                      num_heads=n_head, head_size=head_size)
    assert logits.shape == (B, num_classes)
    max_err = float(jnp.max(jnp.abs(logits - ref)))
    # bf16 matmuls + approx reciprocal in softmax -> looser tolerance than f32.
    assert jnp.allclose(logits, ref, atol=3e-2, rtol=3e-2), max_err

    print("KERNEL_OK")
</pallas_src>

<mosaic_0001>
module attributes {stable_mosaic.version = 11 : i64} {
  func.func @fused_transformer_kernel(%arg0: i32, %arg1: memref<16x128xf32, #tpu.memory_space<vmem>>, %arg2: memref<1x128x1536xbf16, #tpu.memory_space<vmem>>, %arg3: memref<1x512x128xbf16, #tpu.memory_space<vmem>>, %arg4: memref<1x1x128xf32, #tpu.memory_space<vmem>>, %arg5: memref<1x128x128xbf16, #tpu.memory_space<vmem>>, %arg6: memref<1x1x128xf32, #tpu.memory_space<vmem>>, %arg7: memref<1x128x128xbf16, #tpu.memory_space<vmem>>, %arg8: memref<1x1x128xf32, #tpu.memory_space<vmem>>, %arg9: memref<1x1x128xf32, #tpu.memory_space<vmem>>, %arg10: memref<1x1x128xf32, #tpu.memory_space<vmem>>, %arg11: memref<1x1x128xf32, #tpu.memory_space<vmem>>, %arg12: memref<1x1x128xf32, #tpu.memory_space<vmem>>, %arg13: memref<1x128xf32, #tpu.memory_space<vmem>>, %arg14: memref<1x128xf32, #tpu.memory_space<vmem>>, %arg15: memref<128x128xbf16, #tpu.memory_space<vmem>>, %arg16: memref<1x128xf32, #tpu.memory_space<vmem>>, %arg17: memref<2x128xf32, #tpu.memory_space<vmem>>, %arg18: memref<16x128xf32, #tpu.memory_space<vmem>>) attributes {dimension_semantics = [#tpu.dimension_semantics<arbitrary>], iteration_bounds = array<i64: 2>, scalar_prefetch = 0 : i64, scratch_operands = 1 : i64, tpu.core_type = #tpu.core_type<tc>, window_params = [{pipeline_mode = #tpu.pipeline_mode<synchronous>, transform_indices = @transform_0, window_bounds = array<i64: 16, 128>}, {transform_indices = @transform_1, window_bounds = array<i64: 1, 128, 1536>}, {transform_indices = @transform_2, window_bounds = array<i64: 1, 512, 128>}, {transform_indices = @transform_3, window_bounds = array<i64: 1, 1, 128>}, {transform_indices = @transform_4, window_bounds = array<i64: 1, 128, 128>}, {transform_indices = @transform_5, window_bounds = array<i64: 1, 1, 128>}, {transform_indices = @transform_6, window_bounds = array<i64: 1, 128, 128>}, {transform_indices = @transform_7, window_bounds = array<i64: 1, 1, 128>}, {transform_indices = @transform_8, window_bounds = array<i64: 1, 1, 128>}, {transform_indices = @transform_9, window_bounds = array<i64: 1, 1, 128>}, {transform_indices = @transform_10, window_bounds = array<i64: 1, 1, 128>}, {transform_indices = @transform_11, window_bounds = array<i64: 1, 1, 128>}, {pipeline_mode = #tpu.pipeline_mode<synchronous>, transform_indices = @transform_12, window_bounds = array<i64: 1, 128>}, {pipeline_mode = #tpu.pipeline_mode<synchronous>, transform_indices = @transform_13, window_bounds = array<i64: 1, 128>}, {pipeline_mode = #tpu.pipeline_mode<synchronous>, transform_indices = @transform_14, window_bounds = array<i64: 128, 128>}, {pipeline_mode = #tpu.pipeline_mode<synchronous>, transform_indices = @transform_15, window_bounds = array<i64: 1, 128>}, {pipeline_mode = #tpu.pipeline_mode<synchronous>, transform_indices = @transform_16, window_bounds = array<i64: 2, 128>}]} {
    %c0_i32 = arith.constant 0 : i32
    %0 = arith.cmpi eq, %arg0, %c0_i32 : i32
    %1 = arith.extui %0 : i1 to i32
    %c0_i32_0 = arith.constant 0 : i32
    %2 = arith.cmpi ne, %1, %c0_i32_0 : i32
    scf.if %2 {
      %c0_57 = arith.constant 0 : index
      %c0_58 = arith.constant 0 : index
      %123 = vector.load %arg1[%c0_57, %c0_58] : memref<16x128xf32, #tpu.memory_space<vmem>>, vector<16x128xf32>
      %c0_59 = arith.constant 0 : index
      %c0_60 = arith.constant 0 : index
      %124 = vector.load %arg18[%c0_59, %c0_60] : memref<16x128xf32, #tpu.memory_space<vmem>>, vector<16x128xf32>
      tpu.vector_store %arg18[%c0_59, %c0_60], %123 {strides = array<i32>} : memref<16x128xf32, #tpu.memory_space<vmem>>, vector<16x128xf32>,
    } else {
    }
    %c0 = arith.constant 0 : index
    %c0_1 = arith.constant 0 : index
    %3 = vector.load %arg18[%c0, %c0_1] : memref<16x128xf32, #tpu.memory_space<vmem>>, vector<16x128xf32>
    %c0_2 = arith.constant 0 : index
    %c0_3 = arith.constant 0 : index
    %c0_4 = arith.constant 0 : index
    %4 = vector.load %arg9[%c0_2, %c0_3, %c0_4] : memref<1x1x128xf32, #tpu.memory_space<vmem>>, vector<1x1x128xf32>
    %5 = vector.shape_cast %4 : vector<1x1x128xf32> to vector<1x128xf32>
    %c0_5 = arith.constant 0 : index
    %c0_6 = arith.constant 0 : index
    %c0_7 = arith.constant 0 : index
    %6 = vector.load %arg10[%c0_5, %c0_6, %c0_7] : memref<1x1x128xf32, #tpu.memory_space<vmem>>, vector<1x1x128xf32>
    %7 = vector.shape_cast %6 : vector<1x1x128xf32> to vector<1x128xf32>
    %cst = arith.constant dense<0.000000e+00> : vector<16xf32>
    %8 = vector.multi_reduction <add>, %3, %cst [1] : vector<16x128xf32> to vector<16xf32>
    %9 = vector.shape_cast %8 : vector<16xf32> to vector<16x1xf32>
    %cst_8 = arith.constant 3.125000e-02 : f32
    %10 = vector.broadcast %cst_8 : f32 to vector<16x1xf32>
    %11 = arith.mulf %9, %10 : vector<16x1xf32>
    %12 = arith.mulf %3, %3 : vector<16x128xf32>
    %cst_9 = arith.constant dense<0.000000e+00> : vector<16xf32>
    %13 = vector.multi_reduction <add>, %12, %cst_9 [1] : vector<16x128xf32> to vector<16xf32>
    %14 = vector.shape_cast %13 : vector<16xf32> to vector<16x1xf32>
    %cst_10 = arith.constant 3.125000e-02 : f32
    %15 = vector.broadcast %cst_10 : f32 to vector<16x1xf32>
    %16 = arith.mulf %14, %15 : vector<16x1xf32>
    %17 = arith.mulf %11, %11 : vector<16x1xf32>
    %18 = arith.subf %16, %17 : vector<16x1xf32>
    %19 = vector.broadcast %11 : vector<16x1xf32> to vector<16x128xf32>
    %20 = arith.subf %3, %19 : vector<16x128xf32>
    %cst_11 = arith.constant 9.99999974E-6 : f32
    %21 = vector.broadcast %cst_11 : f32 to vector<16x1xf32>
    %22 = arith.addf %18, %21 : vector<16x1xf32>
    %23 = math.rsqrt %22 : vector<16x1xf32>
    %24 = vector.broadcast %23 : vector<16x1xf32> to vector<16x128xf32>
    %25 = arith.mulf %20, %24 : vector<16x128xf32>
    %26 = vector.broadcast %5 : vector<1x128xf32> to vector<16x128xf32>
    %27 = arith.mulf %25, %26 : vector<16x128xf32>
    %28 = vector.broadcast %7 : vector<1x128xf32> to vector<16x128xf32>
    %29 = arith.addf %27, %28 : vector<16x128xf32>
    %30 = arith.truncf %29 : vector<16x128xf32> to vector<16x128xbf16>
    %c0_12 = arith.constant 0 : index
    %c0_13 = arith.constant 0 : index
    %c0_14 = arith.constant 0 : index
    %31 = vector.load %arg2[%c0_12, %c0_13, %c0_14] : memref<1x128x1536xbf16, #tpu.memory_space<vmem>>, vector<1x128x1536xbf16>
    %32 = vector.shape_cast %31 : vector<1x128x1536xbf16> to vector<128x1536xbf16>
    %cst_15 = arith.constant dense<0.000000e+00> : vector<16x1536xf32>
    %33 = tpu.matmul %30, %32, %cst_15 {dimension_numbers = #tpu.dot_dimension_numbers<[1], [0], [0], [1], [0, 0, 1, 1], [], []>} : vector<16x128xbf16>, vector<128x1536xbf16>, vector<16x1536xf32> -> vector<16x1536xf32>
    %34 = arith.truncf %33 : vector<16x1536xf32> to vector<16x1536xbf16>
    %35 = vector.extract_strided_slice %34 {offsets = [0, 0], sizes = [16, 512], strides = [1, 1]} : vector<16x1536xbf16> to vector<16x512xbf16>
    %36 = vector.shape_cast %35 : vector<16x512xbf16> to vector<2x8x4x128xbf16>
    %37 = tpu.transpose %36, [0, 2, 1, 3] : vector<2x8x4x128xbf16> -> vector<2x4x8x128xbf16>
    %38 = vector.shape_cast %37 : vector<2x4x8x128xbf16> to vector<8x8x128xbf16>
    %39 = vector.extract_strided_slice %34 {offsets = [0, 512], sizes = [16, 512], strides = [1, 1]} : vector<16x1536xbf16> to vector<16x512xbf16>
    %40 = vector.shape_cast %39 : vector<16x512xbf16> to vector<2x8x4x128xbf16>
    %41 = tpu.transpose %40, [0, 2, 1, 3] : vector<2x8x4x128xbf16> -> vector<2x4x8x128xbf16>
    %42 = vector.shape_cast %41 : vector<2x4x8x128xbf16> to vector<8x8x128xbf16>
    %43 = vector.extract_strided_slice %34 {offsets = [0, 1024], sizes = [16, 512], strides = [1, 1]} : vector<16x1536xbf16> to vector<16x512xbf16>
    %44 = vector.shape_cast %43 : vector<16x512xbf16> to vector<2x8x4x128xbf16>
    %45 = tpu.transpose %44, [0, 2, 1, 3] : vector<2x8x4x128xbf16> -> vector<2x4x8x128xbf16>
    %46 = vector.shape_cast %45 : vector<2x4x8x128xbf16> to vector<8x8x128xbf16>
    "tpu.trace_start"() <{level = 10 : i32, message = "zqd,zkd->zqk"}> : () -> ()
    %cst_16 = arith.constant dense<0.000000e+00> : vector<8x8x8xf32>
    %47 = tpu.matmul %38, %42, %cst_16 {dimension_numbers = #tpu.dot_dimension_numbers<[2], [2], [1], [1], [0, 0, 0, 1, 1, 1], [0], [0]>} : vector<8x8x128xbf16>, vector<8x8x128xbf16>, vector<8x8x8xf32> -> vector<8x8x8xf32>
    "tpu.trace_stop"() : () -> ()
    %cst_17 = arith.constant 0.353553385 : f32
    %48 = vector.broadcast %cst_17 : f32 to vector<8x8x8xf32>
    %49 = arith.mulf %47, %48 : vector<8x8x8xf32>
    %cst_18 = arith.constant dense<0xFF800000> : vector<8x8xf32>
    %50 = vector.multi_reduction <maximumf>, %49, %cst_18 [2] : vector<8x8x8xf32> to vector<8x8xf32>
    %51 = vector.shape_cast %50 : vector<8x8xf32> to vector<8x8x1xf32>
    %52 = vector.broadcast %51 : vector<8x8x1xf32> to vector<8x8x8xf32>
    %53 = arith.subf %49, %52 : vector<8x8x8xf32>
    %54 = math.exp %53 : vector<8x8x8xf32>
    %cst_19 = arith.constant dense<0.000000e+00> : vector<8x8xf32>
    %55 = vector.multi_reduction <add>, %54, %cst_19 [2] : vector<8x8x8xf32> to vector<8x8xf32>
    %56 = vector.shape_cast %55 : vector<8x8xf32> to vector<8x8x1xf32>
    %57 = tpu.reciprocal %56 {approx = true} : vector<8x8x1xf32> -> vector<8x8x1xf32>
    %58 = vector.broadcast %57 : vector<8x8x1xf32> to vector<8x8x8xf32>
    %59 = arith.mulf %54, %58 : vector<8x8x8xf32>
    %60 = arith.truncf %59 : vector<8x8x8xf32> to vector<8x8x8xbf16>
    "tpu.trace_start"() <{level = 10 : i32, message = "zqk,zkd->zqd"}> : () -> ()
    %cst_20 = arith.constant dense<0.000000e+00> : vector<8x8x128xf32>
    %61 = tpu.matmul %60, %46, %cst_20 {dimension_numbers = #tpu.dot_dimension_numbers<[2], [1], [1], [2], [0, 0, 0, 1, 1, 2], [0], [0]>} : vector<8x8x8xbf16>, vector<8x8x128xbf16>, vector<8x8x128xf32> -> vector<8x8x128xf32>
    "tpu.trace_stop"() : () -> ()
    %62 = arith.truncf %61 : vector<8x8x128xf32> to vector<8x8x128xbf16>
    %63 = vector.shape_cast %62 : vector<8x8x128xbf16> to vector<2x4x8x128xbf16>
    %64 = tpu.transpose %63, [0, 2, 1, 3] : vector<2x4x8x128xbf16> -> vector<2x8x4x128xbf16>
    %65 = vector.shape_cast %64 : vector<2x8x4x128xbf16> to vector<16x512xbf16>
    %c0_21 = arith.constant 0 : index
    %c0_22 = arith.constant 0 : index
    %c0_23 = arith.constant 0 : index
    %66 = vector.load %arg3[%c0_21, %c0_22, %c0_23] : memref<1x512x128xbf16, #tpu.memory_space<vmem>>, vector<1x512x128xbf16>
    %67 = vector.shape_cast %66 : vector<1x512x128xbf16> to vector<512x128xbf16>
    %cst_24 = arith.constant dense<0.000000e+00> : vector<16x128xf32>
    %68 = tpu.matmul %65, %67, %cst_24 {dimension_numbers = #tpu.dot_dimension_numbers<[1], [0], [0], [1], [0, 0, 1, 1], [], []>} : vector<16x512xbf16>, vector<512x128xbf16>, vector<16x128xf32> -> vector<16x128xf32>
    %69 = arith.addf %3, %68 : vector<16x128xf32>
    %c0_25 = arith.constant 0 : index
    %c0_26 = arith.constant 0 : index
    %c0_27 = arith.constant 0 : index
    %70 = vector.load %arg4[%c0_25, %c0_26, %c0_27] : memref<1x1x128xf32, #tpu.memory_space<vmem>>, vector<1x1x128xf32>
    %71 = vector.shape_cast %70 : vector<1x1x128xf32> to vector<1x128xf32>
    %72 = vector.broadcast %71 : vector<1x128xf32> to vector<16x128xf32>
    %73 = arith.addf %69, %72 : vector<16x128xf32>
    %c0_28 = arith.constant 0 : index
    %c0_29 = arith.constant 0 : index
    %c0_30 = arith.constant 0 : index
    %74 = vector.load %arg11[%c0_28, %c0_29, %c0_30] : memref<1x1x128xf32, #tpu.memory_space<vmem>>, vector<1x1x128xf32>
    %75 = vector.shape_cast %74 : vector<1x1x128xf32> to vector<1x128xf32>
    %c0_31 = arith.constant 0 : index
    %c0_32 = arith.constant 0 : index
    %c0_33 = arith.constant 0 : index
    %76 = vector.load %arg12[%c0_31, %c0_32, %c0_33] : memref<1x1x128xf32, #tpu.memory_space<vmem>>, vector<1x1x128xf32>
    %77 = vector.shape_cast %76 : vector<1x1x128xf32> to vector<1x128xf32>
    %cst_34 = arith.constant dense<0.000000e+00> : vector<16xf32>
    %78 = vector.multi_reduction <add>, %73, %cst_34 [1] : vector<16x128xf32> to vector<16xf32>
    %79 = vector.shape_cast %78 : vector<16xf32> to vector<16x1xf32>
    %cst_35 = arith.constant 3.125000e-02 : f32
    %80 = vector.broadcast %cst_35 : f32 to vector<16x1xf32>
    %81 = arith.mulf %79, %80 : vector<16x1xf32>
    %82 = arith.mulf %73, %73 : vector<16x128xf32>
    %cst_36 = arith.constant dense<0.000000e+00> : vector<16xf32>
    %83 = vector.multi_reduction <add>, %82, %cst_36 [1] : vector<16x128xf32> to vector<16xf32>
    %84 = vector.shape_cast %83 : vector<16xf32> to vector<16x1xf32>
    %cst_37 = arith.constant 3.125000e-02 : f32
    %85 = vector.broadcast %cst_37 : f32 to vector<16x1xf32>
    %86 = arith.mulf %84, %85 : vector<16x1xf32>
    %87 = arith.mulf %81, %81 : vector<16x1xf32>
    %88 = arith.subf %86, %87 : vector<16x1xf32>
    %89 = vector.broadcast %81 : vector<16x1xf32> to vector<16x128xf32>
    %90 = arith.subf %73, %89 : vector<16x128xf32>
    %cst_38 = arith.constant 9.99999974E-6 : f32
    %91 = vector.broadcast %cst_38 : f32 to vector<16x1xf32>
    %92 = arith.addf %88, %91 : vector<16x1xf32>
    %93 = math.rsqrt %92 : vector<16x1xf32>
    %94 = vector.broadcast %93 : vector<16x1xf32> to vector<16x128xf32>
    %95 = arith.mulf %90, %94 : vector<16x128xf32>
    %96 = vector.broadcast %75 : vector<1x128xf32> to vector<16x128xf32>
    %97 = arith.mulf %95, %96 : vector<16x128xf32>
    %98 = vector.broadcast %77 : vector<1x128xf32> to vector<16x128xf32>
    %99 = arith.addf %97, %98 : vector<16x128xf32>
    %100 = arith.truncf %99 : vector<16x128xf32> to vector<16x128xbf16>
    %c0_39 = arith.constant 0 : index
    %c0_40 = arith.constant 0 : index
    %c0_41 = arith.constant 0 : index
    %101 = vector.load %arg5[%c0_39, %c0_40, %c0_41] : memref<1x128x128xbf16, #tpu.memory_space<vmem>>, vector<1x128x128xbf16>
    %102 = vector.shape_cast %101 : vector<1x128x128xbf16> to vector<128x128xbf16>
    %cst_42 = arith.constant dense<0.000000e+00> : vector<16x128xf32>
    %103 = tpu.matmul %100, %102, %cst_42 {dimension_numbers = #tpu.dot_dimension_numbers<[1], [0], [0], [1], [0, 0, 1, 1], [], []>} : vector<16x128xbf16>, vector<128x128xbf16>, vector<16x128xf32> -> vector<16x128xf32>
    %c0_43 = arith.constant 0 : index
    %c0_44 = arith.constant 0 : index
    %c0_45 = arith.constant 0 : index
    %104 = vector.load %arg6[%c0_43, %c0_44, %c0_45] : memref<1x1x128xf32, #tpu.memory_space<vmem>>, vector<1x1x128xf32>
    %105 = vector.shape_cast %104 : vector<1x1x128xf32> to vector<1x128xf32>
    %106 = vector.broadcast %105 : vector<1x128xf32> to vector<16x128xf32>
    %107 = arith.addf %103, %106 : vector<16x128xf32>
    %cst_46 = arith.constant 0.000000e+00 : f32
    %108 = vector.broadcast %cst_46 : f32 to vector<16x128xf32>
    %109 = arith.maximumf %107, %108 : vector<16x128xf32>
    %110 = arith.truncf %109 : vector<16x128xf32> to vector<16x128xbf16>
    %c0_47 = arith.constant 0 : index
    %c0_48 = arith.constant 0 : index
    %c0_49 = arith.constant 0 : index
    %111 = vector.load %arg7[%c0_47, %c0_48, %c0_49] : memref<1x128x128xbf16, #tpu.memory_space<vmem>>, vector<1x128x128xbf16>
    %112 = vector.shape_cast %111 : vector<1x128x128xbf16> to vector<128x128xbf16>
    %cst_50 = arith.constant dense<0.000000e+00> : vector<16x128xf32>
    %113 = tpu.matmul %110, %112, %cst_50 {dimension_numbers = #tpu.dot_dimension_numbers<[1], [0], [0], [1], [0, 0, 1, 1], [], []>} : vector<16x128xbf16>, vector<128x128xbf16>, vector<16x128xf32> -> vector<16x128xf32>
    %c0_51 = arith.constant 0 : index
    %c0_52 = arith.constant 0 : index
    %c0_53 = arith.constant 0 : index
    %114 = vector.load %arg8[%c0_51, %c0_52, %c0_53] : memref<1x1x128xf32, #tpu.memory_space<vmem>>, vector<1x1x128xf32>
    %115 = vector.shape_cast %114 : vector<1x1x128xf32> to vector<1x128xf32>
    %116 = vector.broadcast %115 : vector<1x128xf32> to vector<16x128xf32>
    %117 = arith.addf %113, %116 : vector<16x128xf32>
    %118 = arith.addf %73, %117 : vector<16x128xf32>
    %c0_54 = arith.constant 0 : index
    %c0_55 = arith.constant 0 : index
    %119 = vector.load %arg18[%c0_54, %c0_55] : memref<16x128xf32, #tpu.memory_space<vmem>>, vector<16x128xf32>
    tpu.vector_store %arg18[%c0_54, %c0_55], %118 {strides = array<i32>} : memref<16x128xf32, #tpu.memory_space<vmem>>, vector<16x128xf32>,
    %c1_i32 = arith.constant 1 : i32
    %120 = arith.cmpi eq, %arg0, %c1_i32 : i32
    %121 = arith.extui %120 : i1 to i32
    %c0_i32_56 = arith.constant 0 : i32
    %122 = arith.cmpi ne, %121, %c0_i32_56 : i32
    scf.if %122 {
      %123 = vector.shape_cast %118 : vector<16x128xf32> to vector<2x8x128xf32>
      %124 = vector.extract_strided_slice %123 {offsets = [0, 7, 0], sizes = [2, 1, 128], strides = [1, 1, 1]} : vector<2x8x128xf32> to vector<2x1x128xf32>
      %125 = vector.shape_cast %124 : vector<2x1x128xf32> to vector<2x128xf32>
      %c0_57 = arith.constant 0 : index
      %c0_58 = arith.constant 0 : index
      %126 = vector.load %arg13[%c0_57, %c0_58] : memref<1x128xf32, #tpu.memory_space<vmem>>, vector<1x128xf32>
      %c0_59 = arith.constant 0 : index
      %c0_60 = arith.constant 0 : index
      %127 = vector.load %arg14[%c0_59, %c0_60] : memref<1x128xf32, #tpu.memory_space<vmem>>, vector<1x128xf32>
      %cst_61 = arith.constant dense<0.000000e+00> : vector<2xf32>
      %128 = vector.multi_reduction <add>, %125, %cst_61 [1] : vector<2x128xf32> to vector<2xf32>
      %129 = vector.shape_cast %128 : vector<2xf32> to vector<2x1xf32>
      %cst_62 = arith.constant 3.125000e-02 : f32
      %130 = vector.broadcast %cst_62 : f32 to vector<2x1xf32>
      %131 = arith.mulf %129, %130 : vector<2x1xf32>
      %132 = arith.mulf %125, %125 : vector<2x128xf32>
      %cst_63 = arith.constant dense<0.000000e+00> : vector<2xf32>
      %133 = vector.multi_reduction <add>, %132, %cst_63 [1] : vector<2x128xf32> to vector<2xf32>
      %134 = vector.shape_cast %133 : vector<2xf32> to vector<2x1xf32>
      %cst_64 = arith.constant 3.125000e-02 : f32
      %135 = vector.broadcast %cst_64 : f32 to vector<2x1xf32>
      %136 = arith.mulf %134, %135 : vector<2x1xf32>
      %137 = arith.mulf %131, %131 : vector<2x1xf32>
      %138 = arith.subf %136, %137 : vector<2x1xf32>
      %139 = vector.broadcast %131 : vector<2x1xf32> to vector<2x128xf32>
      %140 = arith.subf %125, %139 : vector<2x128xf32>
      %cst_65 = arith.constant 9.99999974E-6 : f32
      %141 = vector.broadcast %cst_65 : f32 to vector<2x1xf32>
      %142 = arith.addf %138, %141 : vector<2x1xf32>
      %143 = math.rsqrt %142 : vector<2x1xf32>
      %144 = vector.broadcast %143 : vector<2x1xf32> to vector<2x128xf32>
      %145 = arith.mulf %140, %144 : vector<2x128xf32>
      %146 = vector.broadcast %126 : vector<1x128xf32> to vector<2x128xf32>
      %147 = arith.mulf %145, %146 : vector<2x128xf32>
      %148 = vector.broadcast %127 : vector<1x128xf32> to vector<2x128xf32>
      %149 = arith.addf %147, %148 : vector<2x128xf32>
      %150 = arith.truncf %149 : vector<2x128xf32> to vector<2x128xbf16>
      %c0_66 = arith.constant 0 : index
      %c0_67 = arith.constant 0 : index
      %151 = vector.load %arg15[%c0_66, %c0_67] : memref<128x128xbf16, #tpu.memory_space<vmem>>, vector<128x128xbf16>
      %cst_68 = arith.constant dense<0.000000e+00> : vector<2x128xf32>
      %152 = tpu.matmul %150, %151, %cst_68 {dimension_numbers = #tpu.dot_dimension_numbers<[1], [0], [0], [1], [0, 0, 1, 1], [], []>} : vector<2x128xbf16>, vector<128x128xbf16>, vector<2x128xf32> -> vector<2x128xf32>
      %c0_69 = arith.constant 0 : index
      %c0_70 = arith.constant 0 : index
      %153 = vector.load %arg16[%c0_69, %c0_70] : memref<1x128xf32, #tpu.memory_space<vmem>>, vector<1x128xf32>
      %154 = vector.broadcast %153 : vector<1x128xf32> to vector<2x128xf32>
      %155 = arith.addf %152, %154 : vector<2x128xf32>
      %c0_71 = arith.constant 0 : index
      %c0_72 = arith.constant 0 : index
      %156 = vector.load %arg17[%c0_71, %c0_72] : memref<2x128xf32, #tpu.memory_space<vmem>>, vector<2x128xf32>
      tpu.vector_store %arg17[%c0_71, %c0_72], %155 {strides = array<i32>} : memref<2x128xf32, #tpu.memory_space<vmem>>, vector<2x128xf32>,
    } else {
    }
    return
  }
  func.func @transform_0(%arg0: i32) -> (i32, i32) {
    %c0_i32 = arith.constant 0 : i32
    %c0_i32_0 = arith.constant 0 : i32
    %c0_i32_1 = arith.constant 0 : i32
    return %c0_i32, %c0_i32_0 : i32, i32
  }
  func.func @transform_1(%arg0: i32) -> (i32, i32, i32) {
    %c0_i32 = arith.constant 0 : i32
    %c0_i32_0 = arith.constant 0 : i32
    %c0_i32_1 = arith.constant 0 : i32
    return %arg0, %c0_i32, %c0_i32_0 : i32, i32, i32
  }
  func.func @transform_2(%arg0: i32) -> (i32, i32, i32) {
    %c0_i32 = arith.constant 0 : i32
    %c0_i32_0 = arith.constant 0 : i32
    %c0_i32_1 = arith.constant 0 : i32
    return %arg0, %c0_i32, %c0_i32_0 : i32, i32, i32
  }
  func.func @transform_3(%arg0: i32) -> (i32, i32, i32) {
    %c0_i32 = arith.constant 0 : i32
    %c0_i32_0 = arith.constant 0 : i32
    %c0_i32_1 = arith.constant 0 : i32
    return %arg0, %c0_i32, %c0_i32_0 : i32, i32, i32
  }
  func.func @transform_4(%arg0: i32) -> (i32, i32, i32) {
    %c0_i32 = arith.constant 0 : i32
    %c0_i32_0 = arith.constant 0 : i32
    %c0_i32_1 = arith.constant 0 : i32
    return %arg0, %c0_i32, %c0_i32_0 : i32, i32, i32
  }
  func.func @transform_5(%arg0: i32) -> (i32, i32, i32) {
    %c0_i32 = arith.constant 0 : i32
    %c0_i32_0 = arith.constant 0 : i32
    %c0_i32_1 = arith.constant 0 : i32
    return %arg0, %c0_i32, %c0_i32_0 : i32, i32, i32
  }
  func.func @transform_6(%arg0: i32) -> (i32, i32, i32) {
    %c0_i32 = arith.constant 0 : i32
    %c0_i32_0 = arith.constant 0 : i32
    %c0_i32_1 = arith.constant 0 : i32
    return %arg0, %c0_i32, %c0_i32_0 : i32, i32, i32
  }
  func.func @transform_7(%arg0: i32) -> (i32, i32, i32) {
    %c0_i32 = arith.constant 0 : i32
    %c0_i32_0 = arith.constant 0 : i32
    %c0_i32_1 = arith.constant 0 : i32
    return %arg0, %c0_i32, %c0_i32_0 : i32, i32, i32
  }
  func.func @transform_8(%arg0: i32) -> (i32, i32, i32) {
    %c0_i32 = arith.constant 0 : i32
    %c0_i32_0 = arith.constant 0 : i32
    %c0_i32_1 = arith.constant 0 : i32
    return %arg0, %c0_i32, %c0_i32_0 : i32, i32, i32
  }
  func.func @transform_9(%arg0: i32) -> (i32, i32, i32) {
    %c0_i32 = arith.constant 0 : i32
    %c0_i32_0 = arith.constant 0 : i32
    %c0_i32_1 = arith.constant 0 : i32
    return %arg0, %c0_i32, %c0_i32_0 : i32, i32, i32
  }
  func.func @transform_10(%arg0: i32) -> (i32, i32, i32) {
    %c0_i32 = arith.constant 0 : i32
    %c0_i32_0 = arith.constant 0 : i32
    %c0_i32_1 = arith.constant 0 : i32
    return %arg0, %c0_i32, %c0_i32_0 : i32, i32, i32
  }
  func.func @transform_11(%arg0: i32) -> (i32, i32, i32) {
    %c0_i32 = arith.constant 0 : i32
    %c0_i32_0 = arith.constant 0 : i32
    %c0_i32_1 = arith.constant 0 : i32
    return %arg0, %c0_i32, %c0_i32_0 : i32, i32, i32
  }
  func.func @transform_12(%arg0: i32) -> (i32, i32) {
    %c0_i32 = arith.constant 0 : i32
    %c0_i32_0 = arith.constant 0 : i32
    %c0_i32_1 = arith.constant 0 : i32
    return %c0_i32, %c0_i32_0 : i32, i32
  }
  func.func @transform_13(%arg0: i32) -> (i32, i32) {
    %c0_i32 = arith.constant 0 : i32
    %c0_i32_0 = arith.constant 0 : i32
    %c0_i32_1 = arith.constant 0 : i32
    return %c0_i32, %c0_i32_0 : i32, i32
  }
  func.func @transform_14(%arg0: i32) -> (i32, i32) {
    %c0_i32 = arith.constant 0 : i32
    %c0_i32_0 = arith.constant 0 : i32
    %c0_i32_1 = arith.constant 0 : i32
    return %c0_i32, %c0_i32_0 : i32, i32
  }
  func.func @transform_15(%arg0: i32) -> (i32, i32) {
    %c0_i32 = arith.constant 0 : i32
    %c0_i32_0 = arith.constant 0 : i32
    %c0_i32_1 = arith.constant 0 : i32
    return %c0_i32, %c0_i32_0 : i32, i32
  }
  func.func @transform_16(%arg0: i32) -> (i32, i32) {
    %c0_i32 = arith.constant 0 : i32
    %c0_i32_0 = arith.constant 0 : i32
    %c0_i32_1 = arith.constant 0 : i32
    return %c0_i32, %c0_i32_0 : i32, i32
  }
}

</mosaic_0001>

<bundles_post_ra>
// kernel: tpu_custom_call.1
= control target key start
LH: loop header
LB: loop body
LE: loop exit
PB: predicated region body
PF: predicated region fallthrough
CT: control target
= control target key end

     0   :  { %s7704_s0 = inlined_call_operand.hbm [shape: f32[16,128], index: 0, kind: input, shape index: {}]   ;;  %s7705_s1 = inlined_call_operand.hbm [shape: bf16[2,128,1536], index: 1, kind: input, shape index: {}]   ;;  %s7706_s2 = inlined_call_operand.hbm [shape: bf16[2,512,128], index: 2, kind: input, shape index: {}]   ;;  %s7707_s3 = inlined_call_operand.hbm [shape: f32[2,1,128], index: 3, kind: input, shape index: {}]   ;;  %s7708_s4 = inlined_call_operand.hbm [shape: bf16[2,128,128], index: 4, kind: input, shape index: {}]   ;;  %s7709_s5 = inlined_call_operand.hbm [shape: f32[2,1,128], index: 5, kind: input, shape index: {}]   ;;  %s7710_s6 = inlined_call_operand.hbm [shape: bf16[2,128,128], index: 6, kind: input, shape index: {}]   ;;  %s7711_s7 = inlined_call_operand.hbm [shape: f32[2,1,128], index: 7, kind: input, shape index: {}]   ;;  %s7712_s8 = inlined_call_operand.hbm [shape: f32[2,1,128], index: 8, kind: input, shape index: {}]   ;;  %s7713_s9 = inlined_call_operand.hbm [shape: f32[2,1,128], index: 9, kind: input, shape index: {}]   ;;  %s7714_s10 = inlined_call_operand.hbm [shape: f32[2,1,128], index: 10, kind: input, shape index: {}]   ;;  %s7715_s11 = inlined_call_operand.hbm [shape: f32[2,1,128], index: 11, kind: input, shape index: {}]   ;;  %s7716_s12 = inlined_call_operand.hbm [shape: f32[1,128], index: 12, kind: input, shape index: {}]   ;;  %s7717_s13 = inlined_call_operand.hbm [shape: f32[1,128], index: 13, kind: input, shape index: {}]   ;;  %s7718_s14 = inlined_call_operand.hbm [shape: bf16[128,128], index: 14, kind: input, shape index: {}]   ;;  %s7719_s15 = inlined_call_operand.hbm [shape: f32[1,128], index: 15, kind: input, shape index: {}]   ;;  %s7720_s16 = inlined_call_operand.hbm [shape: f32[2,128], index: 16, kind: output, shape index: {}]  }
   0x1   :  { %7753 = sst [smem:[#allocation48_spill]] %s7704_s0 }
   0x2   :  { %7754 = sst [smem:[#allocation49_spill]] %s7705_s1 }
   0x3   :  { %7755 = sst [smem:[#allocation50_spill]] %s7707_s3 }
   0x4   :  { %7756 = sst [smem:[#allocation51_spill]] %s7709_s5 }
   0x5   :  { %7757 = sst [smem:[#allocation52_spill]] %s7711_s7 }
   0x6   :  { %7758 = sst [smem:[#allocation53_spill]] %s7713_s9 }
   0x7   :  { %7759 = sst [smem:[#allocation54_spill]] %s7715_s11 }
   0x8   :  { %7760 = sst [smem:[#allocation55_spill]] %s7716_s12 }
   0x9   :  { %7761 = sst [smem:[#allocation56_spill]] %s7717_s13 }
   0xa   :  { %7762 = sst [smem:[#allocation57_spill]] %s7720_s16 }
   0xb   :  { %21 = vsyncpa [#allocation4], 0 }
   0xc   :  { %22 = vsyncpa [#allocation7], 0 }
   0xd   :  { %24 = vsyncpa [#allocation7 + $0x1], 0 }
   0xe   :  { %25 = vsyncpa [#allocation10], 0 }
   0xf   :  { %27 = vsyncpa [#allocation10 + $0x1], 0 }
  0x10   :  { %28 = vsyncpa [#allocation13], 0 }
  0x11   :  { %30 = vsyncpa [#allocation13 + $0x1], 0 }
  0x12   :  { %31 = vsyncpa [#allocation16], 0 }
  0x13   :  { %33 = vsyncpa [#allocation16 + $0x1], 0 }
  0x14   :  { %34 = vsyncpa [#allocation19], 0 }
  0x15   :  { %36 = vsyncpa [#allocation19 + $0x1], 0 }
  0x16   :  { %37 = vsyncpa [#allocation22], 0 }
  0x17   :  { %39 = vsyncpa [#allocation22 + $0x1], 0 }
  0x18   :  { %40 = vsyncpa [#allocation25], 0 }
  0x19   :  { %41 = vsyncpa [#allocation28], 0 }
  0x1a   :  { %42 = vsyncpa [#allocation5], 0  ;;  %s6492_s21 = smov 0   ;;  %s6494_s22 = smov 0  }
  0x1b   :  { %s6496_s23 = smov 0   ;;  %s6498_s24 = smov 0  }
  0x1c LB: > { %7763 = sst [smem:[#allocation41_spill]] %s6367_s22  ;;  %s6511_s25 = sadd.s32 4294967295, %s6375_s24   ;;  %s6375_s24 = sphi %s6498_s24, %s7821_s24   ;;  %s6371_s23 = sphi %s6496_s23, %s7824_s23   ;;  %s6367_s22 = sphi %s6494_s22, %s7823_s22   ;;  %s6363_s21 = sphi %s6492_s21, %s7822_s21  }
  0x1d   : > { %7764 = sst [smem:[#allocation42_spill]] %s6371_s23  ;;  %s6514_s26 = sadd.s32 1, %s6375_s24  }
  0x1e   : > { %7765 = sst [smem:[#allocation43_spill]] %s6511_s25  ;;  %s73_s27 = ssub.s32 %s6375_s24, %s6514_s26 }
  0x1f   : > { %7766 = sst [smem:[#allocation44_spill]] %s6514_s26  ;;  %s76_s28 = sadd.s32 1, %s6371_s23 }
  0x20   : > { %p74_p0 = scmp.eq.s32.totalorder %s73_s27, 0  ;;  %p83_p1 = scmp.ne.s32.totalorder %s6371_s23, %s6367_s22 }
  0x21   : > { %p84_p2 = scmp.eq.s32.totalorder %s6375_s24, 0  ;;  %p89_p3 = scmp.ne.s32.totalorder %s6367_s22, %s6363_s21 }
  0x22   : > { %s6524_s29 = scalar_select %p74_p0, %s6371_s23, %s76_s28  }
  0x23   : > { %p6526_p4 = por %p84_p2, %p83_p1  ;;  %p7729_p5 = scmp.eq.s32.totalorder %s6511_s25, 0 }
  0x24   : > { %7767 = sst [smem:[#allocation45_spill]] %s6524_s29  ;;  %p4913_p6 = scmp.ge.s32.totalorder %s6375_s24, 1 }
  0x25   : > { %p465_p7 = scmp.lt.s32.totalorder %s6375_s24, 3  ;;  %p6535_p8 = por %p7729_p5, %p89_p3 }
  0x26   : > { %s6377_s18 = smov [#allocation23]   ;;  %p5500_p12 = scmp.lt.s32.totalorder %s6375_s24, 2 }
  0x27   : > { %s7769_s0 = scalar_select %p6535_p8, 1, 0 }
  0x28   : > { %p6540_p10 = pnand %p4913_p6, %p465_p7  ;;  %s491_s19 = sshll.u32 %s6377_s18, 4  ;;  %s492_s19 = int_to_ptr.vmem [resolvable:$true] %s491_s19 }
  0x29   : > { %7770 = sst [smem:[#allocation46_spill]] %s7769_s0  ;;  %s6548_s20 = sand.u32 1, %s6371_s23  }
  0x2a   : > { %s7771_s17 = scalar_select %p6540_p10, 1, 0 }
  0x2b   : > { %p5445_p11 = pneg %p6540_p10  ;;  %p6558_p0 = pnand %p5500_p12, %p6526_p4 }
  0x2c   : > { %7772 = sst [smem:[#allocation47_spill]] %s7771_s17  ;;  %s6378_s28 = smov [#allocation24]  }
  0x2d   : > { %p6552_p13 = pnand %p5445_p11, %p7729_p5  ;;  %s502_s29 = sshll.u32 %s6378_s28, 4  ;;  %s6562_s29 = int_to_ptr.vmem [resolvable:$true] %s502_s29 }
  0x2e   : > { %s7774_s27 = scalar_select %p6558_p0, 1, 0 }
  0x2f   : > { %s7773_s21 = scalar_select %p6552_p13, 1, 0 }
  0x30   : > { %s7775_s12 = sld [smem:[#allocation55_spill]]  ;;  %p6572_p2 = pneg %p6552_p13 }
  0x32   : > { %s7776_s30 = scalar_select %p6572_p2, 1, 0 }
  0x36   : > { %s5805_s23 = scalar_lea.hbm %s7775_s12, 16 }
  0x37   : > { %p5806_p1 = scmp.ne.s32.totalorder %s7775_s12, %s5805_s23  ;;  %p5812_p6 = scmp.lt.u32.totalorder %s5805_s23, %s7775_s12 }
  0x39   : > { %p5808_p3 = pnand %p6572_p2, %p5806_p1 }
  0x3b   : > { %p5809_p4 = pneg %p5808_p3 }
  0x3d   : > { %p5814_p7 = pnand %p5812_p6, %p5809_p4 }
  0x3f   : > { %5817 = shalt.err (!%p5814_p7)
}
  0x40   : > { %s5818_s26 = scalar_lea.vmem %s492_s19, 16  ;;  %s5825_s16 = scalar_lea.vmem %s492_s19, 32 }
  0x41   : > { %p5819_p11 = scmp.ne.s32.totalorder %s492_s19, %s5818_s26  ;;  %p5826_p5 = scmp.lt.s32.totalorder %s492_s19, %s492_s19 }
  0x42   : > { %p5827_p8 = scmp.lt.s32.totalorder %s5825_s16, %s5818_s26 }
  0x43   : > { %p5821_p12 = pnand %p5819_p11, %p6572_p2 }
  0x44   : > { %p5828_p10 = por %p5827_p8, %p5826_p5 }
  0x45   : > { %p5822_p9 = pneg %p5821_p12 }
  0x47   : > { %p5829_p0 = pnand %p5828_p10, %p5822_p9 }
  0x49   : > { %5832 = shalt.err (!%p5829_p0)
}
  0x4a   : > { %5451 = dma.hbm_to_vmem [thread:$0]  (!%p6552_p13), %s7775_s12, 16, %s492_s19, [#allocation22]  }
  0x4b   : > { %s6589_s22 = sand.u32 1, %s6375_s24   ;;  %s7777_s13 = sld [smem:[#allocation56_spill]] }
  0x51   : > { %s5833_s25 = scalar_lea.hbm %s7777_s13, 16 }
  0x52   : > { %p5834_p5 = scmp.ne.s32.totalorder %s7777_s13, %s5833_s25  ;;  %p5840_p10 = scmp.lt.u32.totalorder %s5833_s25, %s7777_s13 }
  0x54   : > { %p5836_p8 = pnand %p5834_p5, %p6572_p2 }
  0x56   : > { %p5837_p9 = pneg %p5836_p8 }
  0x58   : > { %p5842_p0 = pnand %p5840_p10, %p5837_p9 }
  0x5a   : > { %5845 = shalt.err (!%p5842_p0)
}
  0x5b   : > { %s5846_s19 = scalar_lea.vmem %s6562_s29, 16  ;;  %s5853_s11 = scalar_lea.vmem %s6562_s29, 32 }
  0x5c   : > { %p5847_p1 = scmp.ne.s32.totalorder %s6562_s29, %s5846_s19  ;;  %p5854_p6 = scmp.lt.s32.totalorder %s6562_s29, %s6562_s29 }
  0x5d   : > { %p5855_p7 = scmp.lt.s32.totalorder %s5853_s11, %s5846_s19 }
  0x5e   : > { %p5849_p3 = pnand %p5847_p1, %p6572_p2 }
  0x5f   : > { %p5856_p11 = por %p5855_p7, %p5854_p6 }
  0x60   : > { %p5850_p4 = pneg %p5849_p3 }
  0x62   : > { %p5857_p12 = pnand %p5856_p11, %p5850_p4 }
  0x64   : > { %5860 = shalt.err (!%p5857_p12)
}
  0x65   : > { %5454 = dma.hbm_to_vmem [thread:$0]  (!%p6552_p13), %s7777_s13, 16, %s6562_s29, [#allocation25]  }
  0x66   : > { %s5396_s0 = smul.u32 768, %s6548_s20  ;;  %s7778_s1 = sld [smem:[#allocation49_spill]] }
  0x67   : > { %s5397_s18 = smul.u32 12288, %s6375_s24  ;;  %s7742_s11 = scalar_lea.sflag [#allocation7], %s6589_s22 }
  0x68   : > { %s541_s16 = scalar_lea.vmem [#allocation6], %s5396_s0  ;;  %p7779_p8 = scmp.ne.s32.totalorder %s7774_s27, 0 }
  0x69   : > { %s548_s19 = sshll.u32 %s541_s16, 4  ;;  %s6622_s19 = int_to_ptr.vmem [resolvable:$true] %s548_s19 }
  0x6a   : > { %p6629_p9 = pneg %p7779_p8 }
  0x6c   : > { %s6620_s26 = scalar_lea.hbm %s7778_s1, %s5397_s18  ;;  %s5866_s23 = scalar_lea.hbm %s7778_s1, 24576 }
  0x6d   : > { %s5861_s25 = scalar_lea.hbm %s6620_s26, 12288  ;;  %p5867_p1 = scmp.lt.u32.totalorder %s6620_s26, %s7778_s1 }
  0x6e   : > { %p5862_p5 = scmp.ne.s32.totalorder %s6620_s26, %s5861_s25  ;;  %p5868_p3 = scmp.lt.u32.totalorder %s5866_s23, %s5861_s25 }
  0x6f   : > { %s7780_s29 = scalar_select %p6629_p9, 1, 0 }
  0x70   : > { %p5864_p10 = pnand %p6629_p9, %p5862_p5  ;;  %p5869_p4 = por %p5868_p3, %p5867_p1 }
  0x71   : > { %p5870_p6 = scmp.lt.u32.totalorder %s5861_s25, %s6620_s26 }
  0x72   : > { %p5865_p0 = pneg %p5864_p10 }
  0x73   : > { %p5871_p7 = por %p5870_p6, %p5869_p4 }
  0x75   : > { %p5872_p11 = pnand %p5871_p7, %p5865_p0 }
  0x77   : > { %5875 = shalt.err (!%p5872_p11)
}
  0x78   : > { %s5876_s16 = scalar_lea.vmem %s6622_s19, 12288  ;;  %s6379_s17 = smov [#allocation6]  }
  0x79   : > { %p5877_p12 = scmp.ne.s32.totalorder %s6622_s19, %s5876_s16  ;;  %s5881_s18 = sshll.u32 %s6379_s17, 4  ;;  %s5882_s18 = int_to_ptr.vmem [resolvable:$false] %s5881_s18 }
  0x7a   : > { %s5883_s0 = scalar_lea.vmem %s5882_s18, 24576  ;;  %p5884_p13 = scmp.lt.s32.totalorder %s6622_s19, %s5882_s18 }
  0x7b   : > { %p5879_p5 = pnand %p5877_p12, %p6629_p9  ;;  %p5885_p2 = scmp.lt.s32.totalorder %s5883_s0, %s5876_s16 }
  0x7d   : > { %p5880_p10 = pneg %p5879_p5  ;;  %p5886_p1 = por %p5885_p2, %p5884_p13 }
  0x7f   : > { %p5887_p3 = pnand %p5886_p1, %p5880_p10 }
  0x81   : > { %5890 = shalt.err (!%p5887_p3)
}
  0x82   : > { %s6380_s25 = smov 768   ;;  %s6381_s23 = smov 48  }
  0x83   : > { %5464 = dma.hbm_to_vmem [thread:$0]  (!%p7779_p8), %s6620_s26, 12288, %s6622_s19, %s7742_s11, %s6380_s25, %s6380_s25, %s6381_s23  }
  0x84   : > { %s6655_s28 = sshll.u32 %s6375_s24, 4  ;;  %s7781_s3 = sld [smem:[#allocation50_spill]] }
  0x85   : > { %s582_s0 = scalar_lea.vmem [#allocation9], %s6548_s20  ;;  %s7744_s12 = scalar_lea.sflag [#allocation10], %s6589_s22 }
  0x86   : > { %s589_s1 = sshll.u32 %s582_s0, 4  ;;  %s590_s1 = int_to_ptr.vmem [resolvable:$true] %s589_s1 }
  0x8a   : > { %s6661_s18 = scalar_lea.hbm %s7781_s3, %s6655_s28  ;;  %s5896_s25 = scalar_lea.hbm %s7781_s3, 32 }
  0x8b   : > { %s5891_s13 = scalar_lea.hbm %s6661_s18, 16  ;;  %p5897_p4 = scmp.lt.u32.totalorder %s6661_s18, %s7781_s3 }
  0x8c   : > { %p5892_p13 = scmp.ne.s32.totalorder %s6661_s18, %s5891_s13  ;;  %p5898_p6 = scmp.lt.u32.totalorder %s5896_s25, %s5891_s13 }
  0x8d   : > { %p5900_p11 = scmp.lt.u32.totalorder %s5891_s13, %s6661_s18 }
  0x8e   : > { %p5894_p2 = pnand %p5892_p13, %p6629_p9  ;;  %p5899_p7 = por %p5898_p6, %p5897_p4 }
  0x90   : > { %p5895_p0 = pneg %p5894_p2  ;;  %p5901_p12 = por %p5900_p11, %p5899_p7 }
  0x92   : > { %p5902_p5 = pnand %p5901_p12, %p5895_p0 }
  0x94   : > { %5905 = shalt.err (!%p5902_p5)
}
  0x95   : > { %s5906_s17 = scalar_lea.vmem %s590_s1, 16  ;;  %s6382_s0 = smov [#allocation9]  }
  0x96   : > { %p5907_p10 = scmp.ne.s32.totalorder %s590_s1, %s5906_s17  ;;  %s5911_s11 = sshll.u32 %s6382_s0, 4  ;;  %s5912_s11 = int_to_ptr.vmem [resolvable:$false] %s5911_s11 }
  0x97   : > { %s5913_s26 = scalar_lea.vmem %s5912_s11, 32  ;;  %p5914_p13 = scmp.lt.s32.totalorder %s590_s1, %s5912_s11 }
  0x98   : > { %p5909_p1 = pnand %p5907_p10, %p6629_p9  ;;  %p5915_p2 = scmp.lt.s32.totalorder %s5913_s26, %s5906_s17 }
  0x9a   : > { %p5910_p3 = pneg %p5909_p1  ;;  %p5916_p8 = por %p5915_p2, %p5914_p13 }
  0x9c   : > { %p5917_p4 = pnand %p5916_p8, %p5910_p3 }
  0x9e   : > { %5920 = shalt.err (!%p5917_p4)
}
  0x9f   : > { %p7782_p6 = scmp.ne.s32.totalorder %s7774_s27, 0  ;;  %s7783_s5 = sld [smem:[#allocation51_spill]] }
  0xa0   : > { %s620_s11 = scalar_lea.vmem [#allocation12], %s6548_s20  ;;  %s7745_s16 = scalar_lea.sflag [#allocation13], %s6589_s22 }
  0xa1   : > { %5470 = dma.hbm_to_vmem [thread:$0]  (!%p7782_p6), %s6661_s18, 16, %s590_s1, %s7744_s12  }
  0xa2   : > { %s627_s23 = sshll.u32 %s620_s11, 4  ;;  %s628_s23 = int_to_ptr.vmem [resolvable:$true] %s627_s23 }
  0xa5   : > { %s6688_s25 = scalar_lea.hbm %s7783_s5, %s6655_s28  ;;  %s5926_s18 = scalar_lea.hbm %s7783_s5, 32 }
  0xa6   : > { %s5921_s17 = scalar_lea.hbm %s6688_s25, 16  ;;  %p5927_p11 = scmp.lt.u32.totalorder %s6688_s25, %s7783_s5 }
  0xa7   : > { %p5922_p8 = scmp.ne.s32.totalorder %s6688_s25, %s5921_s17  ;;  %p5928_p12 = scmp.lt.u32.totalorder %s5926_s18, %s5921_s17 }
  0xa8   : > { %p5930_p10 = scmp.lt.u32.totalorder %s5921_s17, %s6688_s25 }
  0xa9   : > { %p5924_p0 = pnand %p5922_p8, %p6629_p9  ;;  %p5929_p5 = por %p5928_p12, %p5927_p11 }
  0xab   : > { %p5925_p7 = pneg %p5924_p0  ;;  %p5931_p1 = por %p5930_p10, %p5929_p5 }
  0xad   : > { %p5932_p3 = pnand %p5931_p1, %p5925_p7 }
  0xaf   : > { %5935 = shalt.err (!%p5932_p3)
}
  0xb0   : > { %s5936_s19 = scalar_lea.vmem %s628_s23, 16  ;;  %s6383_s11 = smov [#allocation12]  }
  0xb1   : > { %p5937_p13 = scmp.ne.s32.totalorder %s628_s23, %s5936_s19  ;;  %s5941_s12 = sshll.u32 %s6383_s11, 4  ;;  %s5942_s12 = int_to_ptr.vmem [resolvable:$false] %s5941_s12 }
  0xb2   : > { %s5943_s0 = scalar_lea.vmem %s5942_s12, 32  ;;  %p5944_p8 = scmp.lt.s32.totalorder %s628_s23, %s5942_s12 }
  0xb3   : > { %p5939_p2 = pnand %p5937_p13, %p6629_p9  ;;  %p5945_p0 = scmp.lt.s32.totalorder %s5943_s0, %s5936_s19 }
  0xb5   : > { %p5940_p4 = pneg %p5939_p2  ;;  %p5946_p6 = por %p5945_p0, %p5944_p8 }
  0xb7   : > { %p5947_p11 = pnand %p5946_p6, %p5940_p4 }
  0xb9   : > { %5950 = shalt.err (!%p5947_p11)
}
  0xba   : > { %p7784_p12 = scmp.ne.s32.totalorder %s7774_s27, 0  ;;  %s7785_s7 = sld [smem:[#allocation52_spill]] }
  0xbb   : > { %s658_s12 = scalar_lea.vmem [#allocation15], %s6548_s20  ;;  %s7746_s13 = scalar_lea.sflag [#allocation16], %s6589_s22 }
  0xbc   : > { %5476 = dma.hbm_to_vmem [thread:$0]  (!%p7784_p12), %s6688_s25, 16, %s628_s23, %s7745_s16  }
  0xbd   : > { %s665_s26 = sshll.u32 %s658_s12, 4  ;;  %s666_s26 = int_to_ptr.vmem [resolvable:$true] %s665_s26 }
  0xc0   : > { %s6715_s18 = scalar_lea.hbm %s7785_s7, %s6655_s28  ;;  %s5956_s23 = scalar_lea.hbm %s7785_s7, 32 }
  0xc1   : > { %s5951_s19 = scalar_lea.hbm %s6715_s18, 16  ;;  %p5957_p10 = scmp.lt.u32.totalorder %s6715_s18, %s7785_s7 }
  0xc2   : > { %p5952_p6 = scmp.ne.s32.totalorder %s6715_s18, %s5951_s19  ;;  %p5958_p1 = scmp.lt.u32.totalorder %s5956_s23, %s5951_s19 }
  0xc3   : > { %p5960_p13 = scmp.lt.u32.totalorder %s5951_s19, %s6715_s18 }
  0xc4   : > { %p5954_p7 = pnand %p5952_p6, %p6629_p9  ;;  %p5959_p3 = por %p5958_p1, %p5957_p10 }
  0xc6   : > { %p5955_p5 = pneg %p5954_p7  ;;  %p5961_p2 = por %p5960_p13, %p5959_p3 }
  0xc8   : > { %p5962_p4 = pnand %p5961_p2, %p5955_p5 }
  0xca   : > { %5965 = shalt.err (!%p5962_p4)
}
  0xcb   : > { %s5966_s1 = scalar_lea.vmem %s666_s26, 16  ;;  %s6384_s12 = smov [#allocation15]  }
  0xcc   : > { %p5967_p8 = scmp.ne.s32.totalorder %s666_s26, %s5966_s1  ;;  %s5971_s16 = sshll.u32 %s6384_s12, 4  ;;  %s5972_s16 = int_to_ptr.vmem [resolvable:$false] %s5971_s16 }
  0xcd   : > { %s5973_s11 = scalar_lea.vmem %s5972_s16, 32  ;;  %p5974_p6 = scmp.lt.s32.totalorder %s666_s26, %s5972_s16 }
  0xce   : > { %p5969_p0 = pnand %p5967_p8, %p6629_p9  ;;  %p5975_p7 = scmp.lt.s32.totalorder %s5973_s11, %s5966_s1 }
  0xd0   : > { %p5970_p11 = pneg %p5969_p0  ;;  %p5976_p12 = por %p5975_p7, %p5974_p6 }
  0xd2   : > { %p5977_p1 = pnand %p5976_p12, %p5970_p11 }
  0xd4   : > { %5980 = shalt.err (!%p5977_p1)
}
  0xd5   : > { %p7786_p10 = scmp.ne.s32.totalorder %s7774_s27, 0  ;;  %s7787_s9 = sld [smem:[#allocation53_spill]] }
  0xd6   : > { %s692_s16 = scalar_lea.vmem [#allocation18], %s6548_s20  ;;  %s6385_s17 = smov [#allocation3]  }
  0xd7   : > { %5482 = dma.hbm_to_vmem [thread:$0]  (!%p7786_p10), %s6715_s18, 16, %s666_s26, %s7746_s13  }
  0xd8   : > { %s699_s0 = sshll.u32 %s692_s16, 4  ;;  %s6747_s1 = sshll.u32 %s6385_s17, 4  ;;  %s6745_s0 = int_to_ptr.vmem [resolvable:$true] %s699_s0  ;;  %s478_s1 = int_to_ptr.vmem [resolvable:$true] %s6747_s1 }
  0xd9   : > { %s7748_s12 = scalar_lea.sflag [#allocation19], %s6589_s22 }
  0xdb   : > { %s6742_s23 = scalar_lea.hbm %s7787_s9, %s6655_s28  ;;  %s5986_s19 = scalar_lea.hbm %s7787_s9, 32 }
  0xdc   : > { %s5981_s11 = scalar_lea.hbm %s6742_s23, 16  ;;  %p5987_p13 = scmp.lt.u32.totalorder %s6742_s23, %s7787_s9 }
  0xdd   : > { %p5982_p12 = scmp.ne.s32.totalorder %s6742_s23, %s5981_s11  ;;  %p5988_p2 = scmp.lt.u32.totalorder %s5986_s19, %s5981_s11 }
  0xde   : > { %p5990_p8 = scmp.lt.u32.totalorder %s5981_s11, %s6742_s23 }
  0xdf   : > { %p5984_p5 = pnand %p5982_p12, %p6629_p9  ;;  %p5989_p4 = por %p5988_p2, %p5987_p13 }
  0xe1   : > { %p5985_p3 = pneg %p5984_p5  ;;  %p5991_p0 = por %p5990_p8, %p5989_p4 }
  0xe3   : > { %p5992_p11 = pnand %p5991_p0, %p5985_p3 }
  0xe5   : > { %5995 = shalt.err (!%p5992_p11)
}
  0xe6   : > { %s5996_s16 = scalar_lea.vmem %s6745_s0, 16  ;;  %s6386_s17 = smov [#allocation18]  }
  0xe7   : > { %p5997_p6 = scmp.ne.s32.totalorder %s6745_s0, %s5996_s16  ;;  %s6001_s18 = sshll.u32 %s6386_s17, 4  ;;  %s6002_s18 = int_to_ptr.vmem [resolvable:$false] %s6001_s18 }
  0xe8   : > { %s6003_s13 = scalar_lea.vmem %s6002_s18, 32  ;;  %p6004_p12 = scmp.lt.s32.totalorder %s6745_s0, %s6002_s18 }
  0xe9   : > { %p5999_p7 = pnand %p5997_p6, %p6629_p9  ;;  %p6005_p5 = scmp.lt.s32.totalorder %s6003_s13, %s5996_s16 }
  0xeb   : > { %p6000_p1 = pneg %p5999_p7  ;;  %p6006_p13 = por %p6005_p5, %p6004_p12 }
  0xed   : > { %p6007_p2 = pnand %p6006_p13, %p6000_p1 }
  0xef   : > { %6010 = shalt.err (!%p6007_p2)
}
  0xf0   : > { %5488 = dma.hbm_to_vmem [thread:$0]  (!%p7786_p10), %s6742_s23, 16, %s6745_s0, %s7748_s12  }
  0xf1   : > { %s7788_s19 = sld [smem:[#allocation48_spill]]  ;;  %p7789_p4 = scmp.ne.s32.totalorder %s7776_s30, 0 }
  0xf7   : > { %s6011_s25 = scalar_lea.hbm %s7788_s19, 256 }
  0xf8   : > { %p6012_p3 = scmp.ne.s32.totalorder %s7788_s19, %s6011_s25  ;;  %p6018_p11 = scmp.lt.u32.totalorder %s6011_s25, %s7788_s19 }
  0xfa   : > { %p6014_p8 = pnand %p6012_p3, %p7789_p4 }
  0xfc   : > { %p6015_p0 = pneg %p6014_p8 }
  0xfe   : > { %p6020_p6 = pnand %p6018_p11, %p6015_p0 }
 0x100   : > { %6023 = shalt.err (!%p6020_p6)
}
 0x101   : > { %s6024_s3 = scalar_lea.vmem %s478_s1, 256  ;;  %p6032_p5 = scmp.lt.s32.totalorder %s478_s1, %s478_s1 }
 0x102   : > { %p6025_p7 = scmp.ne.s32.totalorder %s478_s1, %s6024_s3  ;;  %p6033_p13 = scmp.lt.s32.totalorder %s6024_s3, %s6024_s3 }
 0x104   : > { %p6027_p1 = pnand %p6025_p7, %p7789_p4  ;;  %p6034_p2 = por %p6033_p13, %p6032_p5 }
 0x106   : > { %p6028_p12 = pneg %p6027_p1 }
 0x108   : > { %p6035_p10 = pnand %p6034_p2, %p6028_p12 }
 0x10a   : > { %6038 = shalt.err (!%p6035_p10)
}
 0x10b   : > { %s6387_s23 = smov 128   ;;  %s6388_s0 = smov 8  }
 0x10c   : > { %p7790_p3 = scmp.ne.s32.totalorder %s7773_s21, 0  ;;  %s6389_s25 = smov [#allocation26]  }
 0x10d   : > { %s512_s17 = sshll.u32 %s6389_s25, 4  ;;  %s6039_s13 = scalar_lea.hbm %s7718_s14, 1024  ;;  %s513_s17 = int_to_ptr.vmem [resolvable:$true] %s512_s17 }
 0x10e   : > { %5448 = dma.hbm_to_vmem [thread:$0]  (!%p7790_p3), %s7788_s19, 256, %s478_s1, [#allocation4], %s6387_s23, %s6387_s23, %s6388_s0  }
 0x10f   : > { %p6040_p10 = scmp.ne.s32.totalorder %s7718_s14, %s6039_s13  ;;  %p6046_p11 = scmp.lt.u32.totalorder %s6039_s13, %s7718_s14 }
 0x111   : > { %p6042_p8 = pnand %p6040_p10, %p7789_p4 }
 0x113   : > { %p6043_p0 = pneg %p6042_p8 }
 0x115   : > { %p6048_p6 = pnand %p6046_p11, %p6043_p0 }
 0x117   : > { %6051 = shalt.err (!%p6048_p6)
}
 0x118   : > { %s6052_s1 = scalar_lea.vmem %s513_s17, 1024  ;;  %p6060_p5 = scmp.lt.s32.totalorder %s513_s17, %s513_s17 }
 0x119   : > { %p6053_p7 = scmp.ne.s32.totalorder %s513_s17, %s6052_s1  ;;  %p6061_p13 = scmp.lt.s32.totalorder %s6052_s1, %s6052_s1 }
 0x11b   : > { %p6055_p1 = pnand %p6053_p7, %p7789_p4  ;;  %p6062_p2 = por %p6061_p13, %p6060_p5 }
 0x11d   : > { %p6056_p12 = pneg %p6055_p1 }
 0x11f   : > { %p6063_p9 = pnand %p6062_p2, %p6056_p12 }
 0x121   : > { %6066 = shalt.err (!%p6063_p9)
}
 0x122   : > { %s6390_s12 = smov 64   ;;  %s6391_s5 = smov 4  }
 0x123   : > { %5457 = dma.hbm_to_vmem [thread:$0]  (!%p7790_p3), %s7718_s14, 1024, %s513_s17, [#allocation25], %s6390_s12, %s6390_s12, %s6391_s5  }
 0x124   : > { %s4921_s0 = sshll.u32 %s6548_s20, 8  ;;  %s6392_s11 = smov [#allocation27]  }
 0x125   : > { %s526_s26 = sshll.u32 %s6392_s11, 4  ;;  %s5134_s25 = sshll.u32 %s6375_s24, 12  ;;  %s527_s26 = int_to_ptr.vmem [resolvable:$true] %s526_s26 }
 0x126   : > { %s6067_s13 = scalar_lea.hbm %s7719_s15, 16 }
 0x127   : > { %p6068_p9 = scmp.ne.s32.totalorder %s7719_s15, %s6067_s13  ;;  %p6074_p0 = scmp.lt.u32.totalorder %s6067_s13, %s7719_s15 }
 0x129   : > { %p6070_p10 = pnand %p6068_p9, %p7789_p4 }
 0x12b   : > { %p6071_p8 = pneg %p6070_p10 }
 0x12d   : > { %p6076_p11 = pnand %p6074_p0, %p6071_p8 }
 0x12f   : > { %6079 = shalt.err (!%p6076_p11)
}
 0x130   : > { %s6080_s17 = scalar_lea.vmem %s527_s26, 16  ;;  %s6087_s7 = scalar_lea.vmem %s527_s26, 32 }
 0x131   : > { %p6081_p6 = scmp.ne.s32.totalorder %s527_s26, %s6080_s17  ;;  %p6088_p12 = scmp.lt.s32.totalorder %s527_s26, %s527_s26 }
 0x132   : > { %p6089_p5 = scmp.lt.s32.totalorder %s6087_s7, %s6080_s17 }
 0x133   : > { %p6083_p7 = pnand %p6081_p6, %p7789_p4 }
 0x134   : > { %p6090_p13 = por %p6089_p5, %p6088_p12 }
 0x135   : > { %p6084_p1 = pneg %p6083_p7 }
 0x137   : > { %p6091_p2 = pnand %p6090_p13, %p6084_p1 }
 0x139   : > { %6094 = shalt.err (!%p6091_p2)
}
 0x13a   : > { %5460 = dma.hbm_to_vmem [thread:$0]  (!%p7790_p3), %s7719_s15, 16, %s527_s26, [#allocation28]  }
 0x13b   : > { %s6836_s30 = scalar_lea.hbm %s7706_s2, %s5134_s25  ;;  %s562_s18 = scalar_lea.vmem [#allocation8], %s4921_s0 }
 0x13c   : > { %s569_s16 = sshll.u32 %s562_s18, 4  ;;  %s4925_s21 = sshll.u32 %s6548_s20, 6  ;;  %s6838_s16 = int_to_ptr.vmem [resolvable:$true] %s569_s16 }
 0x13d   : > { %s6095_s13 = scalar_lea.hbm %s6836_s30, 4096  ;;  %p7791_p9 = scmp.ne.s32.totalorder %s7780_s29, 0 }
 0x13e   : > { %p6096_p4 = scmp.ne.s32.totalorder %s6836_s30, %s6095_s13  ;;  %s6100_s1 = scalar_lea.hbm %s7706_s2, 8192 }
 0x13f   : > { %p6101_p3 = scmp.lt.u32.totalorder %s6836_s30, %s7706_s2  ;;  %p6102_p0 = scmp.lt.u32.totalorder %s6100_s1, %s6095_s13 }
 0x140   : > { %p6098_p10 = pnand %p6096_p4, %p7791_p9  ;;  %p6104_p6 = scmp.lt.u32.totalorder %s6095_s13, %s6836_s30 }
 0x141   : > { %p6103_p11 = por %p6102_p0, %p6101_p3 }
 0x142   : > { %p6099_p8 = pneg %p6098_p10 }
 0x143   : > { %p6105_p7 = por %p6104_p6, %p6103_p11 }
 0x145   : > { %p6106_p1 = pnand %p6105_p7, %p6099_p8 }
 0x147   : > { %6109 = shalt.err (!%p6106_p1)
}
 0x148   : > { %s6110_s0 = scalar_lea.vmem %s6838_s16, 4096  ;;  %s6393_s7 = smov [#allocation8]  }
 0x149   : > { %p6111_p12 = scmp.ne.s32.totalorder %s6838_s16, %s6110_s0  ;;  %s6115_s23 = sshll.u32 %s6393_s7, 4  ;;  %s6116_s23 = int_to_ptr.vmem [resolvable:$false] %s6115_s23 }
 0x14a   : > { %s6117_s11 = scalar_lea.vmem %s6116_s23, 8192  ;;  %p6118_p2 = scmp.lt.s32.totalorder %s6838_s16, %s6116_s23 }
 0x14b   : > { %p6113_p5 = pnand %p6111_p12, %p7791_p9  ;;  %p6119_p4 = scmp.lt.s32.totalorder %s6117_s11, %s6110_s0 }
 0x14d   : > { %p6114_p13 = pneg %p6113_p5  ;;  %p6120_p10 = por %p6119_p4, %p6118_p2 }
 0x14f   : > { %p6121_p3 = pnand %p6120_p10, %p6114_p13 }
 0x151   : > { %6124 = shalt.err (!%p6121_p3)
}
 0x152   : > { %p7792_p8 = scmp.ne.s32.totalorder %s7774_s27, 0  ;;  %s7793_s9 = scalar_lea.sflag [#allocation7], %s6589_s22 }
 0x153   : > { %s5135_s19 = sshll.u32 %s6375_s24, 10  ;;  %s600_s3 = scalar_lea.vmem [#allocation11], %s4925_s21 }
 0x154   : > { %5467 = dma.hbm_to_vmem [thread:$0]  (!%p7792_p8), %s6836_s30, 4096, %s6838_s16, %s7793_s9, %s6390_s12, %s6390_s12, %s6391_s5  }
 0x155   : > { %s6873_s26 = scalar_lea.hbm %s7708_s4, %s5135_s19  ;;  %s607_s1 = sshll.u32 %s600_s3, 4  ;;  %s6877_s1 = int_to_ptr.vmem [resolvable:$true] %s607_s1 }
 0x156   : > { %s6125_s25 = scalar_lea.hbm %s6873_s26, 1024  ;;  %s6130_s17 = scalar_lea.hbm %s7708_s4, 2048 }
 0x157   : > { %p6126_p0 = scmp.ne.s32.totalorder %s6873_s26, %s6125_s25  ;;  %p6131_p7 = scmp.lt.u32.totalorder %s6873_s26, %s7708_s4 }
 0x158   : > { %p6132_p1 = scmp.lt.u32.totalorder %s6130_s17, %s6125_s25  ;;  %p6134_p5 = scmp.lt.u32.totalorder %s6125_s25, %s6873_s26 }
 0x159   : > { %p6128_p11 = pnand %p6126_p0, %p7791_p9 }
 0x15a   : > { %p6133_p12 = por %p6132_p1, %p6131_p7 }
 0x15b   : > { %p6129_p6 = pneg %p6128_p11 }
 0x15c   : > { %p6135_p13 = por %p6134_p5, %p6133_p12 }
 0x15e   : > { %p6136_p2 = pnand %p6135_p13, %p6129_p6 }
 0x160   : > { %6139 = shalt.err (!%p6136_p2)
}
 0x161   : > { %s6140_s23 = scalar_lea.vmem %s6877_s1, 1024  ;;  %s6394_s11 = smov [#allocation11]  }
 0x162   : > { %p6141_p4 = scmp.ne.s32.totalorder %s6877_s1, %s6140_s23  ;;  %s6145_s9 = sshll.u32 %s6394_s11, 4  ;;  %s6146_s9 = int_to_ptr.vmem [resolvable:$false] %s6145_s9 }
 0x163   : > { %s6147_s18 = scalar_lea.vmem %s6146_s9, 2048  ;;  %p6148_p0 = scmp.lt.s32.totalorder %s6877_s1, %s6146_s9 }
 0x164   : > { %p6143_p10 = pnand %p6141_p4, %p7791_p9  ;;  %p6149_p11 = scmp.lt.s32.totalorder %s6147_s18, %s6140_s23 }
 0x166   : > { %p6144_p3 = pneg %p6143_p10  ;;  %p6150_p7 = por %p6149_p11, %p6148_p0 }
 0x168   : > { %p6151_p1 = pnand %p6150_p7, %p6144_p3 }
 0x16a   : > { %6154 = shalt.err (!%p6151_p1)
}
 0x16b   : > { %s7794_s13 = scalar_lea.sflag [#allocation10], %s6589_s22  ;;  %s6910_s30 = scalar_lea.hbm %s7710_s6, %s5135_s19 }
 0x16c   : > { %5473 = dma.hbm_to_vmem [thread:$0]  (!%p7792_p8), %s6873_s26, 1024, %s6877_s1, %s7794_s13, %s6390_s12, %s6390_s12, %s6391_s5  }
 0x16d   : > { %s638_s16 = scalar_lea.vmem [#allocation14], %s4925_s21  ;;  %s6155_s0 = scalar_lea.hbm %s6910_s30, 1024 }
 0x16e   : > { %s645_s17 = sshll.u32 %s638_s16, 4  ;;  %p6156_p6 = scmp.ne.s32.totalorder %s6910_s30, %s6155_s0  ;;  %s6914_s17 = int_to_ptr.vmem [resolvable:$true] %s645_s17 }
 0x16f   : > { %s6160_s1 = scalar_lea.hbm %s7710_s6, 2048  ;;  %p6161_p13 = scmp.lt.u32.totalorder %s6910_s30, %s7710_s6 }
 0x170   : > { %p6158_p12 = pnand %p6156_p6, %p7791_p9  ;;  %p6162_p2 = scmp.lt.u32.totalorder %s6160_s1, %s6155_s0 }
 0x171   : > { %p6164_p10 = scmp.lt.u32.totalorder %s6155_s0, %s6910_s30 }
 0x172   : > { %p6159_p5 = pneg %p6158_p12  ;;  %p6163_p4 = por %p6162_p2, %p6161_p13 }
 0x174   : > { %p6165_p3 = por %p6164_p10, %p6163_p4 }
 0x176   : > { %p6166_p0 = pnand %p6165_p3, %p6159_p5 }
 0x178   : > { %6169 = shalt.err (!%p6166_p0)
}
 0x179   : > { %s6170_s21 = scalar_lea.vmem %s6914_s17, 1024  ;;  %s6395_s23 = smov [#allocation14]  }
 0x17a   : > { %p6171_p11 = scmp.ne.s32.totalorder %s6914_s17, %s6170_s21  ;;  %s6175_s11 = sshll.u32 %s6395_s23, 4  ;;  %s6176_s11 = int_to_ptr.vmem [resolvable:$false] %s6175_s11 }
 0x17b   : > { %s6177_s9 = scalar_lea.vmem %s6176_s11, 2048  ;;  %p6178_p6 = scmp.lt.s32.totalorder %s6914_s17, %s6176_s11 }
 0x17c   : > { %p6173_p7 = pnand %p6171_p11, %p7791_p9  ;;  %p6179_p12 = scmp.lt.s32.totalorder %s6177_s9, %s6170_s21 }
 0x17e   : > { %p6174_p1 = pneg %p6173_p7  ;;  %p6180_p13 = por %p6179_p12, %p6178_p6 }
 0x180   : > { %p6181_p2 = pnand %p6180_p13, %p6174_p1 }
 0x182   : > { %6184 = shalt.err (!%p6181_p2)
}
 0x183   : > { %s7795_s18 = scalar_lea.sflag [#allocation13], %s6589_s22  ;;  %s6946_s25 = scalar_lea.hbm %s7712_s8, %s6655_s28 }
 0x184   : > { %5479 = dma.hbm_to_vmem [thread:$0]  (!%p7792_p8), %s6910_s30, 1024, %s6914_s17, %s7795_s18, %s6390_s12, %s6390_s12, %s6391_s5  }
 0x185   : > { %s675_s16 = scalar_lea.vmem [#allocation17], %s6548_s20  ;;  %s6185_s24 = scalar_lea.hbm %s6946_s25, 16 }
 0x186   : > { %s682_s0 = sshll.u32 %s675_s16, 4  ;;  %p6186_p5 = scmp.ne.s32.totalorder %s6946_s25, %s6185_s24  ;;  %s683_s0 = int_to_ptr.vmem [resolvable:$true] %s682_s0 }
 0x187   : > { %s6190_s12 = scalar_lea.hbm %s7712_s8, 32  ;;  %p6191_p3 = scmp.lt.u32.totalorder %s6946_s25, %s7712_s8 }
 0x188   : > { %p6188_p4 = pnand %p6186_p5, %p7791_p9  ;;  %p6192_p0 = scmp.lt.u32.totalorder %s6190_s12, %s6185_s24 }
 0x189   : > { %p6194_p7 = scmp.lt.u32.totalorder %s6185_s24, %s6946_s25 }
 0x18a   : > { %p6189_p10 = pneg %p6188_p4  ;;  %p6193_p11 = por %p6192_p0, %p6191_p3 }
 0x18c   : > { %p6195_p1 = por %p6194_p7, %p6193_p11 }
 0x18e   : > { %p6196_p6 = pnand %p6195_p1, %p6189_p10 }
 0x190   : > { %6199 = shalt.err (!%p6196_p6)
}
 0x191   : > { %s6200_s17 = scalar_lea.vmem %s683_s0, 16  ;;  %s6396_s19 = smov [#allocation17]  }
 0x192   : > { %p6201_p12 = scmp.ne.s32.totalorder %s683_s0, %s6200_s17  ;;  %s6205_s7 = sshll.u32 %s6396_s19, 4  ;;  %s6206_s7 = int_to_ptr.vmem [resolvable:$false] %s6205_s7 }
 0x193   : > { %s6207_s21 = scalar_lea.vmem %s6206_s7, 32  ;;  %p6208_p5 = scmp.lt.s32.totalorder %s683_s0, %s6206_s7 }
 0x194   : > { %p6203_p13 = pnand %p6201_p12, %p7791_p9  ;;  %p6209_p4 = scmp.lt.s32.totalorder %s6207_s21, %s6200_s17 }
 0x196   : > { %p6204_p2 = pneg %p6203_p13  ;;  %p6210_p8 = por %p6209_p4, %p6208_p5 }
 0x198   : > { %p6211_p0 = pnand %p6210_p8, %p6204_p2 }
 0x19a   : > { %6214 = shalt.err (!%p6211_p0)
}
 0x19b   : > { %p7796_p3 = scmp.ne.s32.totalorder %s7774_s27, 0  ;;  %s7797_s23 = scalar_lea.sflag [#allocation16], %s6589_s22 }
 0x19c   : > { %s6972_s18 = scalar_lea.hbm %s7714_s10, %s6655_s28  ;;  %s709_s13 = scalar_lea.vmem [#allocation20], %s6548_s20 }
 0x19d   : > { %5485 = dma.hbm_to_vmem [thread:$0]  (!%p7796_p3), %s6946_s25, 16, %s683_s0, %s7797_s23  }
 0x19e   : > { %s716_s3 = sshll.u32 %s709_s13, 4  ;;  %s6215_s16 = scalar_lea.hbm %s6972_s18, 16  ;;  %s717_s3 = int_to_ptr.vmem [resolvable:$true] %s716_s3 }
 0x19f   : > { %p6216_p8 = scmp.ne.s32.totalorder %s6972_s18, %s6215_s16  ;;  %s6220_s25 = scalar_lea.hbm %s7714_s10, 32 }
 0x1a0   : > { %p6221_p7 = scmp.lt.u32.totalorder %s6972_s18, %s7714_s10  ;;  %p6222_p1 = scmp.lt.u32.totalorder %s6220_s25, %s6215_s16 }
 0x1a1   : > { %p6218_p10 = pnand %p6216_p8, %p7791_p9  ;;  %p6224_p12 = scmp.lt.u32.totalorder %s6215_s16, %s6972_s18 }
 0x1a2   : > { %p6223_p6 = por %p6222_p1, %p6221_p7 }
 0x1a3   : > { %p6219_p11 = pneg %p6218_p10 }
 0x1a4   : > { %p6225_p13 = por %p6224_p12, %p6223_p6 }
 0x1a6   : > { %p6226_p2 = pnand %p6225_p13, %p6219_p11 }
 0x1a8   : > { %6229 = shalt.err (!%p6226_p2)
}
 0x1a9   : > { %s6230_s12 = scalar_lea.vmem %s717_s3, 16  ;;  %s6397_s5 = smov [#allocation20]  }
 0x1aa   : > { %p6231_p5 = scmp.ne.s32.totalorder %s717_s3, %s6230_s12  ;;  %s6235_s30 = sshll.u32 %s6397_s5, 4  ;;  %s6236_s30 = int_to_ptr.vmem [resolvable:$false] %s6235_s30 }
 0x1ab   : > { %s6237_s17 = scalar_lea.vmem %s6236_s30, 32  ;;  %p6238_p8 = scmp.lt.s32.totalorder %s717_s3, %s6236_s30 }
 0x1ac   : > { %p6233_p4 = pnand %p6231_p5, %p7791_p9  ;;  %p6239_p10 = scmp.lt.s32.totalorder %s6237_s17, %s6230_s12 }
 0x1ae   : > { %p6234_p0 = pneg %p6233_p4  ;;  %p6240_p3 = por %p6239_p10, %p6238_p8 }
 0x1b0   : > { %p6241_p1 = pnand %p6240_p3, %p6234_p0 }
 0x1b2   : > { %6244 = shalt.err (!%p6241_p1)
}
 0x1b3   : > { %p7798_p7 = scmp.ne.s32.totalorder %s7774_s27, 0  ;;  %s7799_s19 = scalar_lea.sflag [#allocation19], %s6589_s22 }
 0x1b4   : > { %s7800_s23 = sld [smem:[#allocation54_spill]]  ;;  %s726_s13 = scalar_lea.vmem [#allocation21], %s6548_s20 }
 0x1b5   : > { %5491 = dma.hbm_to_vmem [thread:$0]  (!%p7798_p7), %s6972_s18, 16, %s717_s3, %s7799_s19  }
 0x1b6   : > { %s733_s16 = sshll.u32 %s726_s13, 4  ;;  %s724_s24 = scalar_lea.sflag [#allocation22], %s6589_s22  ;;  %s734_s16 = int_to_ptr.vmem [resolvable:$true] %s733_s16 }
 0x1ba   : > { %s7801_s11 = smov %s7800_s23  ;;  %s6998_s9 = scalar_lea.hbm %s7800_s23, %s6655_s28 }
 0x1bb   : > { %s6245_s26 = scalar_lea.hbm %s6998_s9, 16  ;;  %s6250_s3 = scalar_lea.hbm %s7801_s11, 32 }
 0x1bc   : > { %p6246_p3 = scmp.ne.s32.totalorder %s6998_s9, %s6245_s26  ;;  %p6251_p12 = scmp.lt.u32.totalorder %s6998_s9, %s7801_s11 }
 0x1bd   : > { %p6252_p13 = scmp.lt.u32.totalorder %s6250_s3, %s6245_s26  ;;  %p6254_p5 = scmp.lt.u32.totalorder %s6245_s26, %s6998_s9 }
 0x1be   : > { %p6248_p11 = pnand %p6246_p3, %p7791_p9 }
 0x1bf   : > { %p6253_p2 = por %p6252_p13, %p6251_p12 }
 0x1c0   : > { %p6249_p6 = pneg %p6248_p11 }
 0x1c1   : > { %p6255_p4 = por %p6254_p5, %p6253_p2 }
 0x1c3   : > { %p6256_p0 = pnand %p6255_p4, %p6249_p6 }
 0x1c5   : > { %6259 = shalt.err (!%p6256_p0)
}
 0x1c6   : > { %s6260_s20 = scalar_lea.vmem %s734_s16, 16  ;;  %s6398_s22 = smov [#allocation21]  }
 0x1c7   : > { %p6261_p8 = scmp.ne.s32.totalorder %s734_s16, %s6260_s20  ;;  %s6265_s1 = sshll.u32 %s6398_s22, 4  ;;  %s6266_s1 = int_to_ptr.vmem [resolvable:$false] %s6265_s1 }
 0x1c8   : > { %s6267_s12 = scalar_lea.vmem %s6266_s1, 32  ;;  %p6268_p3 = scmp.lt.s32.totalorder %s734_s16, %s6266_s1 }
 0x1c9   : > { %p6263_p10 = pnand %p6261_p8, %p7791_p9  ;;  %p6269_p11 = scmp.lt.s32.totalorder %s6267_s12, %s6260_s20 }
 0x1cb   : > { %p6264_p1 = pneg %p6263_p10  ;;  %p6270_p7 = por %p6269_p11, %p6268_p3 }
 0x1cd   : > { %p6271_p12 = pnand %p6270_p7, %p6264_p1 }
 0x1cf   : > { %6274 = shalt.err (!%p6271_p12)
}
 0x1d0   : > { %p7802_p13 = scmp.ne.s32.totalorder %s7774_s27, 0  ;;  %s7803_s5 = sld [smem:[#allocation47_spill]] }
 0x1d2   : > { %5494 = dma.hbm_to_vmem [thread:$0]  (!%p7802_p13), %s6998_s9, 16, %s734_s16, %s724_s24  }
 0x1d6   : > { %p7804_p6 = scmp.ne.s32.totalorder %s7803_s5, 0 }
 0x1d7   : > { %s7805_s30 = sld [smem:[#allocation43_spill]] (!%p7804_p6) }
 0x1d8   : > { %742 = sbr.rel (%p7804_p6) target bundleno = 3038 (0xbde), region = 84 }
 0x1dd   : > { %p7806_p2 = scmp.eq.s32.totalorder (!%p7804_p6), %s7805_s30, 0 }
 0x1df   : > { %6318 = dma.done.wait (%p7806_p2), [#allocation4], 256   ;;  %p7807_p9 = pmov %p7806_p2 }
 0x1e0   : > { %s7808_s29 = sld [smem:[#allocation41_spill]]  ;;  %s7809_s17 = sld [smem:[#allocation46_spill]] }
 0x1e1   : > { %6320 = vsyncadd (%p7807_p9), [#allocation4], 4294967040  ;;  %s7026_s19 = sand.u32 1, %s7805_s30  }
 0x1e2   : > { %s749_s21 = scalar_lea.sflag [#allocation7], %s7026_s19 }
 0x1e6   : > { %s7029_s7 = sand.u32 1, %s7808_s29   ;;  %p7810_p7 = scmp.ne.s32.totalorder %s7809_s17, 0 }
 0x1e7   : > { %s5398_s27 = smul.u32 768, %s7029_s7 }
 0x1e9   : > { %s7033_s23 = scalar_lea.vmem [#allocation6], %s5398_s27 }
 0x1ea   : > { %6322 = dma.done.wait (%p7810_p7), %s749_s21, 16384  }
 0x1eb   : > { %6324 = vsyncadd (%p7810_p7), %s749_s21, 4294950912  ;;  %s4939_s9 = sshll.u32 %s7029_s7, 8  ;;  %s767_s16 = scalar_lea.sflag [#allocation10], %s7026_s19 }
 0x1ec   : > { %s7040_s13 = scalar_lea.vmem [#allocation8], %s4939_s9  ;;  %s769_s24 = scalar_lea.vmem [#allocation9], %s7029_s7 }
 0x1ed   : > { %6326 = dma.done.wait (%p7810_p7), %s767_s16, 1040  }
 0x1ee   : > { %6328 = vsyncadd (%p7810_p7), %s767_s16, 4294966256  ;;  %s4940_s26 = sshll.u32 %s7029_s7, 6  ;;  %s784_s18 = scalar_lea.sflag [#allocation13], %s7026_s19 }
 0x1ef   : > { %s7049_s25 = scalar_lea.vmem [#allocation11], %s4940_s26  ;;  %s786_s3 = scalar_lea.vmem [#allocation12], %s7029_s7 }
 0x1f0   : > { %6330 = dma.done.wait (%p7810_p7), %s784_s18, 1040  }
 0x1f1   : > { %6332 = vsyncadd (%p7810_p7), %s784_s18, 4294966256  ;;  %s7057_s0 = scalar_lea.vmem [#allocation14], %s4940_s26  ;;  %s801_s28 = scalar_lea.sflag [#allocation16], %s7026_s19 }
 0x1f2   : > { %s803_s20 = scalar_lea.vmem [#allocation15], %s7029_s7 }
 0x1f3   : > { %6334 = dma.done.wait (%p7810_p7), %s801_s28, 32  }
 0x1f4   : > { %6336 = vsyncadd (%p7810_p7), %s801_s28, 4294967264  ;;  %s811_s22 = scalar_lea.vmem [#allocation17], %s7029_s7  ;;  %s817_s1 = scalar_lea.sflag [#allocation19], %s7026_s19 }
 0x1f5   : > { %s819_s12 = scalar_lea.vmem [#allocation18], %s7029_s7 }
 0x1f6   : > { %6338 = dma.done.wait (%p7810_p7), %s817_s1, 32  }
 0x1f7   : > { %6340 = vsyncadd (%p7810_p7), %s817_s1, 4294967264  ;;  %s827_s5 = scalar_lea.vmem [#allocation20], %s7029_s7  ;;  %s833_s29 = scalar_lea.sflag [#allocation22], %s7026_s19 }
 0x1f8   : > { %s835_s27 = scalar_lea.vmem [#allocation21], %s7029_s7 }
 0x1f9   : > { %6342 = dma.done.wait (%p7810_p7), %s833_s29, 16  }
 0x1fa   : > { %6344 = vsyncadd (%p7810_p7), %s833_s29, 4294967280  ;;  %p7811_p5 = pmov %p7806_p2 }
 0x1fb   : > { %p7812_p4 = pmov %p7806_p2 }
 0x1fc   : > { %6346 = dma.done.wait (%p7811_p5), [#allocation22], 16  }
 0x1fd   : > { %6348 = vsyncadd (%p7812_p4), [#allocation22], 4294967280  ;;  %p7813_p0 = pmov %p7806_p2 }
 0x1ff   : > { %6350 = dma.done.wait (%p7813_p0), [#allocation25], 1040   ;;  %p7814_p8 = pmov %p7813_p0 }
 0x200   : > { %p7815_p10 = pmov %p7813_p0 }
 0x201   : > { %6352 = vsyncadd (%p7814_p8), [#allocation25], 4294966256 }
 0x202   : > { %6354 = dma.done.wait (%p7815_p10), [#allocation28], 16   ;;  %p7816_p1 = pmov %p7813_p0 }
 0x203   : > { %p7817_p3 = scmp.ne.s32.totalorder %s7805_s30, 0 }
 0x204   : > { %6356 = vsyncadd (%p7816_p1), [#allocation28], 4294967280  ;;  %v943_v0 = vld [vmem:[#allocation3] sm:$0xff] (!%p7817_p3)  ;;  %v944_v1 = vld [vmem:[#allocation3 + $0x8] sm:$0xff] (!%p7817_p3) }
 0x205   : > { %942 = sbr.rel (%p7817_p3) target bundleno = 524 (0x20c), region = 152  ;;  %945 = vst [vmem:[#allocation2] sm:$0xff] (!%p7817_p3), %v943_v0  ;;  %946 = vst [vmem:[#allocation2 + $0x8] sm:$0xff] (!%p7817_p3), %v944_v1 }
 0x20c PF: > { %v7093_v2 = vld [vmem:[#allocation2] sm:$0xff]  ;;  %v7095_v3 = vld [vmem:[#allocation2 + $0x8] sm:$0xff]  ;;  %v6399_v39 = vmov 0   ;;  %vm6401_vm0 = vmmov 0   ;;  %vm3106_vm1 = vcmask 1043456   ;;  %vm3006_vm2 = vcmask 64512  }
 0x20d   : > { %951 = vadd.xlane.f32.xlu0 %v7093_v2  ;;  %v957_v4 = vmul.f32 %v7093_v2, %v7093_v2  ;;  %v5559_v5 = vld [vmem:[%s7033_s23 + $0x4] ss:$48 sps:$4 sm:$0xff]   ;;  %v5561_v6 = vld [vmem:[%s7033_s23 + $0xc] ss:$48 sps:$4 sm:$0xff]   ;;  %v5563_v7 = vld [vmem:[%s7033_s23] ss:$48 sps:$4 sm:$0xff]   ;;  %v958_v8 = vmul.f32 %v7095_v3, %v7095_v3  ;;  %1602 = vmatprep.mubr.bf16.mxu0 %v6399_v39 }
 0x20e   : > { %1570 = vmatprep.subr.bf16.mxu0 %v5559_v5  ;;  %v5564_v9 = vld [vmem:[%s7033_s23 + $0x8] ss:$48 sps:$4 sm:$0xff]   ;;  %1613 = vmatprep.subr.bf16.mxu1 %v5561_v6  ;;  %v5565_v10 = vld [vmem:[%s7033_s23 + $0x64] ss:$48 sps:$4 sm:$0xff]   ;;  %v5567_v11 = vld [vmem:[%s7033_s23 + $0x6c] ss:$48 sps:$4 sm:$0xff]  }
 0x20f   : > { %959 = vadd.xlane.f32.xlu1 %v957_v4  ;;  %1571 = vmatpush1.bf16.msra.mxu0 %v5563_v7  ;;  %v5569_v12 = vld [vmem:[%s7033_s23 + $0x60] ss:$48 sps:$4 sm:$0xff]   ;;  %v5570_v13 = vld [vmem:[%s7033_s23 + $0x68] ss:$48 sps:$4 sm:$0xff]   ;;  %v5571_v14 = vld [vmem:[%s7033_s23 + $0xc4] ss:$48 sps:$4 sm:$0xff]  }
 0x210   : > { %1614 = vmatpush1.bf16.msra.mxu1 %v5564_v9  ;;  %1572 = vmatprep.subr.bf16.mxu0 %v5565_v10  ;;  %v5573_v15 = vld [vmem:[%s7033_s23 + $0xcc] ss:$48 sps:$4 sm:$0xff]   ;;  %v5575_v16 = vld [vmem:[%s7033_s23 + $0xc0] ss:$48 sps:$4 sm:$0xff]   ;;  %v5576_v17 = vld [vmem:[%s7033_s23 + $0xc8] ss:$48 sps:$4 sm:$0xff]  }
 0x211   : > { %953 = vadd.xlane.f32.xlu0 %v7095_v3  ;;  %1615 = vmatprep.subr.bf16.mxu1 %v5567_v11  ;;  %v5577_v18 = vld [vmem:[%s7033_s23 + $0x124] ss:$48 sps:$4 sm:$0xff]   ;;  %v5579_v19 = vld [vmem:[%s7033_s23 + $0x12c] ss:$48 sps:$4 sm:$0xff]   ;;  %v5581_v20 = vld [vmem:[%s7033_s23 + $0x120] ss:$48 sps:$4 sm:$0xff]  }
 0x212   : > { %v5582_v21 = vld [vmem:[%s7033_s23 + $0x128] ss:$48 sps:$4 sm:$0xff]   ;;  %v5583_v22 = vld [vmem:[%s7033_s23 + $0x184] ss:$48 sps:$4 sm:$0xff]   ;;  %v5585_v23 = vld [vmem:[%s7033_s23 + $0x18c] ss:$48 sps:$4 sm:$0xff]   ;;  %1645 = vmatprep.mubr.bf16.mxu1 %v6399_v39 }
 0x213   : > { %961 = vadd.xlane.f32.xlu1 %v958_v8  ;;  %1573 = vmatpush1.bf16.msra.mxu0 %v5569_v12  ;;  %v5587_v24 = vld [vmem:[%s7033_s23 + $0x180] ss:$48 sps:$4 sm:$0xff]   ;;  %v5588_v25 = vld [vmem:[%s7033_s23 + $0x188] ss:$48 sps:$4 sm:$0xff]   ;;  %v5589_v26 = vld [vmem:[%s7033_s23 + $0x1e4] ss:$48 sps:$4 sm:$0xff]  }
 0x214   : > { %1616 = vmatpush1.bf16.msra.mxu1 %v5570_v13  ;;  %1574 = vmatprep.subr.bf16.mxu0 %v5571_v14  ;;  %v5591_v27 = vld [vmem:[%s7033_s23 + $0x1ec] ss:$48 sps:$4 sm:$0xff]   ;;  %v5593_v28 = vld [vmem:[%s7033_s23 + $0x1e0] ss:$48 sps:$4 sm:$0xff]   ;;  %v5594_v29 = vld [vmem:[%s7033_s23 + $0x1e8] ss:$48 sps:$4 sm:$0xff]  }
 0x215   : > { %1617 = vmatprep.subr.bf16.mxu1 %v5573_v15  ;;  %v5595_v30 = vld [vmem:[%s7033_s23 + $0x244] ss:$48 sps:$4 sm:$0xff]   ;;  %v5597_v31 = vld [vmem:[%s7033_s23 + $0x24c] ss:$48 sps:$4 sm:$0xff]   ;;  %v5599_v32 = vld [vmem:[%s7033_s23 + $0x240] ss:$48 sps:$4 sm:$0xff]  }
 0x216   : > { %v5600_v33 = vld [vmem:[%s7033_s23 + $0x248] ss:$48 sps:$4 sm:$0xff]   ;;  %v5601_v34 = vld [vmem:[%s7033_s23 + $0x2a4] ss:$48 sps:$4 sm:$0xff]   ;;  %v5603_v35 = vld [vmem:[%s7033_s23 + $0x2ac] ss:$48 sps:$4 sm:$0xff]  }
 0x217   : > { %1575 = vmatpush1.bf16.msra.mxu0 %v5575_v16  ;;  %v5605_v36 = vld [vmem:[%s7033_s23 + $0x2a0] ss:$48 sps:$4 sm:$0xff]   ;;  %v5606_v37 = vld [vmem:[%s7033_s23 + $0x2a8] ss:$48 sps:$4 sm:$0xff]   ;;  %v5609_v38 = vld [vmem:[%s7033_s23 + $0x14] ss:$48 sps:$4 sm:$0xff]  }
 0x218   : > { %1618 = vmatpush1.bf16.msra.mxu1 %v5576_v17  ;;  %1576 = vmatprep.subr.bf16.mxu0 %v5577_v18  ;;  %v5612_v40 = vld [vmem:[%s7033_s23 + $0x1c] ss:$48 sps:$4 sm:$0xff]   ;;  %v4947_v58 = vld [vmem:[%s811_s22] ss:$0 sm:$0xff]  ;;  %v5610_v5 = vld [vmem:[%s7033_s23 + $0x18] ss:$48 sps:$4 sm:$0xff]  }
 0x219   : > { %1619 = vmatprep.subr.bf16.mxu1 %v5579_v19  ;;  %v4948_v63 = vld [vmem:[%s819_s12] ss:$0 sm:$0xff]  ;;  %v5615_v7 = vld [vmem:[%s7033_s23 + $0x74] ss:$48 sps:$4 sm:$0xff]   ;;  %v5618_v8 = vld [vmem:[%s7033_s23 + $0x7c] ss:$48 sps:$4 sm:$0xff]  }
 0x21a   : > { %v5616_v9 = vld [vmem:[%s7033_s23 + $0x78] ss:$48 sps:$4 sm:$0xff]   ;;  %v5621_v10 = vld [vmem:[%s7033_s23 + $0xd4] ss:$48 sps:$4 sm:$0xff]   ;;  %v5624_v11 = vld [vmem:[%s7033_s23 + $0xdc] ss:$48 sps:$4 sm:$0xff]  }
 0x21b   : > { %1577 = vmatpush1.bf16.msra.mxu0 %v5581_v20  ;;  %v5619_v12 = vld [vmem:[%s7033_s23 + $0xd0] ss:$48 sps:$4 sm:$0xff]   ;;  %v5622_v13 = vld [vmem:[%s7033_s23 + $0xd8] ss:$48 sps:$4 sm:$0xff]   ;;  %v5627_v14 = vld [vmem:[%s7033_s23 + $0x134] ss:$48 sps:$4 sm:$0xff]  }
 0x21c   : > { %1620 = vmatpush1.bf16.msra.mxu1 %v5582_v21  ;;  %1578 = vmatprep.subr.bf16.mxu0 %v5583_v22  ;;  %v5630_v15 = vld [vmem:[%s7033_s23 + $0x13c] ss:$48 sps:$4 sm:$0xff]   ;;  %v5625_v16 = vld [vmem:[%s7033_s23 + $0x130] ss:$48 sps:$4 sm:$0xff]   ;;  %v5628_v17 = vld [vmem:[%s7033_s23 + $0x138] ss:$48 sps:$4 sm:$0xff]  }
 0x21d   : > { %1621 = vmatprep.subr.bf16.mxu1 %v5585_v23  ;;  %v5633_v18 = vld [vmem:[%s7033_s23 + $0x194] ss:$48 sps:$4 sm:$0xff]   ;;  %v5636_v19 = vld [vmem:[%s7033_s23 + $0x19c] ss:$48 sps:$4 sm:$0xff]   ;;  %v5631_v20 = vld [vmem:[%s7033_s23 + $0x190] ss:$48 sps:$4 sm:$0xff]  }
 0x21e   : > { %v5634_v21 = vld [vmem:[%s7033_s23 + $0x198] ss:$48 sps:$4 sm:$0xff]   ;;  %v5639_v22 = vld [vmem:[%s7033_s23 + $0x1f4] ss:$48 sps:$4 sm:$0xff]   ;;  %v5642_v23 = vld [vmem:[%s7033_s23 + $0x1fc] ss:$48 sps:$4 sm:$0xff]  }
 0x21f   : > { %1579 = vmatpush1.bf16.msra.mxu0 %v5587_v24  ;;  %v5637_v24 = vld [vmem:[%s7033_s23 + $0x1f0] ss:$48 sps:$4 sm:$0xff]   ;;  %s7818_s30 = sld [smem:[#allocation43_spill]] }
 0x220   : > { %1622 = vmatpush1.bf16.msra.mxu1 %v5588_v25  ;;  %1580 = vmatprep.subr.bf16.mxu0 %v5589_v26  ;;  %v5640_v25 = vld [vmem:[%s7033_s23 + $0x1f8] ss:$48 sps:$4 sm:$0xff]   ;;  %v5645_v26 = vld [vmem:[%s7033_s23 + $0x254] ss:$48 sps:$4 sm:$0xff]  }
 0x221   : > { %1623 = vmatprep.subr.bf16.mxu1 %v5591_v27  ;;  %v5648_v27 = vld [vmem:[%s7033_s23 + $0x25c] ss:$48 sps:$4 sm:$0xff]  }
 0x223   : > { %1581 = vmatpush1.bf16.msra.mxu0 %v5593_v28  ;;  %v5643_v28 = vld [vmem:[%s7033_s23 + $0x250] ss:$48 sps:$4 sm:$0xff]  }
 0x224   : > { %1624 = vmatpush1.bf16.msra.mxu1 %v5594_v29  ;;  %1582 = vmatprep.subr.bf16.mxu0 %v5595_v30  ;;  %v5646_v29 = vld [vmem:[%s7033_s23 + $0x258] ss:$48 sps:$4 sm:$0xff]   ;;  %v5651_v30 = vld [vmem:[%s7033_s23 + $0x2b4] ss:$48 sps:$4 sm:$0xff]  }
 0x225   : > { %1625 = vmatprep.subr.bf16.mxu1 %v5597_v31  ;;  %v5654_v31 = vld [vmem:[%s7033_s23 + $0x2bc] ss:$48 sps:$4 sm:$0xff]   ;;  %p5118_p11 = scmp.ne.s32.totalorder %s7818_s30, 1 }
 0x226   : > { %vm4428_vm3 = vcmask (!%p5118_p11), 1040384   ;;  %vm4424_vm4 = vcmask (!%p5118_p11), 1047559   ;;  %vm6405_vm5 = vmmov (!%p5118_p11), 0   ;;  %vm4518_vm6 = vcmask (!%p5118_p11), 1041409  }
 0x227   : > { %1583 = vmatpush1.bf16.msra.mxu0 %v5599_v32  ;;  %v5649_v32 = vld [vmem:[%s7033_s23 + $0x2b0] ss:$48 sps:$4 sm:$0xff]  }
 0x228   : > { %1626 = vmatpush1.bf16.msra.mxu1 %v5600_v33  ;;  %1584 = vmatprep.subr.bf16.mxu0 %v5601_v34  ;;  %v5652_v33 = vld [vmem:[%s7033_s23 + $0x2b8] ss:$48 sps:$4 sm:$0xff]   ;;  %v5657_v34 = vld [vmem:[%s7033_s23 + $0x24] ss:$48 sps:$4 sm:$0xff]  }
 0x229   : > { %1627 = vmatprep.subr.bf16.mxu1 %v5603_v35  ;;  %v5660_v35 = vld [vmem:[%s7033_s23 + $0x2c] ss:$48 sps:$4 sm:$0xff]  }
 0x22b   : > { %1585 = vmatpush1.bf16.msra.mxu0 %v5605_v36  ;;  %v5655_v36 = vld [vmem:[%s7033_s23 + $0x20] ss:$48 sps:$4 sm:$0xff]  }
 0x22c   : > { %1628 = vmatpush1.bf16.msra.mxu1 %v5606_v37  ;;  %1656 = vmatprep.subr.bf16.mxu0 %v5609_v38  ;;  %v5658_v37 = vld [vmem:[%s7033_s23 + $0x28] ss:$48 sps:$4 sm:$0xff]   ;;  %v5663_v38 = vld [vmem:[%s7033_s23 + $0x84] ss:$48 sps:$4 sm:$0xff]  }
 0x22d   : > { %1699 = vmatprep.subr.bf16.mxu1 %v5612_v40  ;;  %v5666_v40 = vld [vmem:[%s7033_s23 + $0x8c] ss:$48 sps:$4 sm:$0xff]  }
 0x29a   : > { %v952_v41 = vpop.xlane.xlu0 %951 }
 0x29b   : > { %v955_v42 = vmul.f32 0.03125, %v952_v41  ;;  %v5661_v41 = vld [vmem:[%s7033_s23 + $0x80] ss:$48 sps:$4 sm:$0xff]  }
 0x29c   : > { %v960_v43 = vpop.xlane.xlu1 %959 }
 0x29d   : > { %v965_v44 = vmul.f32 %v955_v42, %v955_v42  ;;  %v963_v45 = vmul.f32 0.03125, %v960_v43  ;;  %v969_v55 = vsub.f32 %v7093_v2, %v955_v42  ;;  %v5607_v2 = vld [vmem:[%s7033_s23 + $0x10] ss:$48 sps:$4 sm:$0xff]   ;;  %v5664_v42 = vld [vmem:[%s7033_s23 + $0x88] ss:$48 sps:$4 sm:$0xff]  }
 0x29e   : > { %v954_v46 = vpop.xlane.xlu0 %953  ;;  %v5669_v43 = vld [vmem:[%s7033_s23 + $0xe4] ss:$48 sps:$4 sm:$0xff]  }
 0x29f   : > { %v967_v47 = vsub.f32 %v963_v45, %v965_v44  ;;  %v956_v48 = vmul.f32 0.03125, %v954_v46  ;;  %v5672_v44 = vld [vmem:[%s7033_s23 + $0xec] ss:$48 sps:$4 sm:$0xff]   ;;  %v5667_v45 = vld [vmem:[%s7033_s23 + $0xe0] ss:$48 sps:$4 sm:$0xff]  }
 0x2a0   : > { %v962_v49 = vpop.xlane.xlu1 %961  ;;  %v5670_v46 = vld [vmem:[%s7033_s23 + $0xe8] ss:$48 sps:$4 sm:$0xff]  }
 0x2a1   : > { %v971_v50 = vadd.f32 1e-05, %v967_v47  ;;  %v966_v51 = vmul.f32 %v956_v48, %v956_v48  ;;  %v964_v52 = vmul.f32 0.03125, %v962_v49  ;;  %v970_v59 = vsub.f32 %v7095_v3, %v956_v48  ;;  %v5613_v3 = vld [vmem:[%s7033_s23 + $0x70] ss:$48 sps:$4 sm:$0xff]  }
 0x2a2   : > { %v5675_v47 = vld [vmem:[%s7033_s23 + $0x144] ss:$48 sps:$4 sm:$0xff]   ;;  %v5678_v48 = vld [vmem:[%s7033_s23 + $0x14c] ss:$48 sps:$4 sm:$0xff]   ;;  %v5673_v49 = vld [vmem:[%s7033_s23 + $0x140] ss:$48 sps:$4 sm:$0xff]  }
 0x2a3   : > { %5751 = vrsqrt.f32 %v971_v50  ;;  %v968_v53 = vsub.f32 %v964_v52, %v966_v51  ;;  %v5676_v50 = vld [vmem:[%s7033_s23 + $0x148] ss:$48 sps:$4 sm:$0xff]   ;;  %v5681_v51 = vld [vmem:[%s7033_s23 + $0x1a4] ss:$48 sps:$4 sm:$0xff]   ;;  %v5684_v52 = vld [vmem:[%s7033_s23 + $0x1ac] ss:$48 sps:$4 sm:$0xff]  }
 0x2a5   : > { %v972_v54 = vadd.f32 1e-05, %v968_v53  ;;  %v5679_v53 = vld [vmem:[%s7033_s23 + $0x1a0] ss:$48 sps:$4 sm:$0xff]  }
 0x2a7   : > { %5753 = vrsqrt.f32 %v972_v54  ;;  %v5682_v54 = vld [vmem:[%s7033_s23 + $0x1a8] ss:$48 sps:$4 sm:$0xff]  }
 0x2ad   : > { %v5752_v56 = vpop.eup %5751 }
 0x2ae   : > { %v975_v57 = vmul.f32 %v5752_v56, %v969_v55  ;;  %v5687_v55 = vld [vmem:[%s7033_s23 + $0x204] ss:$48 sps:$4 sm:$0xff]   ;;  %v5690_v56 = vld [vmem:[%s7033_s23 + $0x20c] ss:$48 sps:$4 sm:$0xff]  }
 0x2b0   : > { %v983_v61 = vmul.f32 %v4947_v58, %v975_v57  ;;  %v5685_v57 = vld [vmem:[%s7033_s23 + $0x200] ss:$48 sps:$4 sm:$0xff]  }
 0x2b1   : > { %v5754_v60 = vpop.eup %5753 }
 0x2b2   : > { %v976_v62 = vmul.f32 %v5754_v60, %v970_v59  ;;  %v991_v1 = vadd.f32 %v4948_v63, %v983_v61  ;;  %v5693_v59 = vld [vmem:[%s7033_s23 + $0x264] ss:$48 sps:$4 sm:$0xff]   ;;  %v5696_v60 = vld [vmem:[%s7033_s23 + $0x26c] ss:$48 sps:$4 sm:$0xff]   ;;  %v5691_v61 = vld [vmem:[%s7033_s23 + $0x260] ss:$48 sps:$4 sm:$0xff]  }
 0x2b4   : > { %v984_v0 = vmul.f32 %v4947_v58, %v976_v62  ;;  %v5688_v58 = vld [vmem:[%s7033_s23 + $0x208] ss:$48 sps:$4 sm:$0xff]  }
 0x2b5   : > { %v5694_v62 = vld [vmem:[%s7033_s23 + $0x268] ss:$48 sps:$4 sm:$0xff]  }
 0x2b6   : > { %v992_v4 = vadd.f32 %v4948_v63, %v984_v0  ;;  %v5699_v63 = vld [vmem:[%s7033_s23 + $0x2c4] ss:$48 sps:$4 sm:$0xff]   ;;  %v5702_v0 = vld [vmem:[%s7033_s23 + $0x2cc] ss:$48 sps:$4 sm:$0xff]  }
 0x2b8   : > { %v7147_v6 = vpack.c.bf16 %v992_v4, %v991_v1  ;;  %v5697_v1 = vld [vmem:[%s7033_s23 + $0x2c0] ss:$48 sps:$4 sm:$0xff]   ;;  %v5700_v4 = vld [vmem:[%s7033_s23 + $0x2c8] ss:$48 sps:$4 sm:$0xff]  }
 0x2ba   : > { %1603 = vmatmul.mubr.bf16.vlgmr.msra.gmra.mrb[0].mxu0 %v7147_v6  ;;  %1646 = vmatmul.mubr.bf16.vlgmr.msra.gmra.mrb[0].mxu1 %v7147_v6 }
 0x2bb   : > { %1657 = vmatpush1.bf16.msra.mxu0 %v5607_v2  ;;  %1700 = vmatpush1.bf16.msra.mxu1 %v5610_v5  ;;  %v6400_v2 = vmov 0.0   ;;  %v6402_v5 = vmov 1983009808  }
 0x2bc   : > { %1658 = vmatprep.subr.bf16.mxu0 %v5615_v7  ;;  %1701 = vmatprep.subr.bf16.mxu1 %v5618_v8  ;;  %v1864_v7 = vunpack.c.l.s4 %v6402_v5  ;;  %v1866_v8 = vlaneseq }
 0x2bd   : > { %1688 = vmatprep.mubr.bf16.mxu0 %v6399_v39  ;;  %1731 = vmatprep.mubr.bf16.mxu1 %v6399_v39 }
 0x2bf   : > { %1659 = vmatpush1.bf16.msra.mxu0 %v5613_v3  ;;  %1702 = vmatpush1.bf16.msra.mxu1 %v5616_v9 }
 0x2c0   : > { %1660 = vmatprep.subr.bf16.mxu0 %v5621_v10  ;;  %1703 = vmatprep.subr.bf16.mxu1 %v5624_v11  ;;  %v1865_v10 = vunpack.c.0.s8 %v1864_v7  ;;  %v1867_v11 = vshrl.u32 %v1866_v8, 7 }
 0x2c3   : > { %1661 = vmatpush1.bf16.msra.mxu0 %v5619_v12  ;;  %1704 = vmatpush1.bf16.msra.mxu1 %v5622_v13  ;;  %v6403_v13 = vmov 1934713408  }
 0x2c4   : > { %1662 = vmatprep.subr.bf16.mxu0 %v5627_v14  ;;  %1705 = vmatprep.subr.bf16.mxu1 %v5630_v15  ;;  %v1895_v14 = vunpack.c.l.s4 %v6403_v13 }
 0x2c7   : > { %1663 = vmatpush1.bf16.msra.mxu0 %v5625_v16  ;;  %1706 = vmatpush1.bf16.msra.mxu1 %v5628_v17 }
 0x2c8   : > { %1664 = vmatprep.subr.bf16.mxu0 %v5633_v18  ;;  %1707 = vmatprep.subr.bf16.mxu1 %v5636_v19 }
 0x2cb   : > { %1665 = vmatpush1.bf16.msra.mxu0 %v5631_v20  ;;  %1708 = vmatpush1.bf16.msra.mxu1 %v5634_v21 }
 0x2cc   : > { %1666 = vmatprep.subr.bf16.mxu0 %v5639_v22  ;;  %1709 = vmatprep.subr.bf16.mxu1 %v5642_v23  ;;  %v7227_v22 = vpack.i.b16 %v6399_v39, %v6399_v39  ;;  %v7229_v23 = vsub.s32 %v1865_v10, %v1867_v11 }
 0x2cf   : > { %1667 = vmatpush1.bf16.msra.mxu0 %v5637_v24  ;;  %1710 = vmatpush1.bf16.msra.mxu1 %v5640_v25 }
 0x2d0   : > { %1668 = vmatprep.subr.bf16.mxu0 %v5645_v26  ;;  %1711 = vmatprep.subr.bf16.mxu1 %v5648_v27  ;;  %v1896_v27 = vunpack.c.0.s8 %v1895_v14 }
 0x2d3   : > { %1669 = vmatpush1.bf16.msra.mxu0 %v5643_v28  ;;  %1712 = vmatpush1.bf16.msra.mxu1 %v5646_v29 }
 0x2d4   : > { %1670 = vmatprep.subr.bf16.mxu0 %v5651_v30  ;;  %1713 = vmatprep.subr.bf16.mxu1 %v5654_v31 }
 0x2d7   : > { %1671 = vmatpush1.bf16.msra.mxu0 %v5649_v32  ;;  %1714 = vmatpush1.bf16.msra.mxu1 %v5652_v33 }
 0x2d8   : > { %1742 = vmatprep.subr.bf16.mxu0 %v5657_v34  ;;  %1785 = vmatprep.subr.bf16.mxu1 %v5660_v35 }
 0x2da   : > { %1689 = vmatmul.mubr.bf16.vlgmr.msra.gmra.mrb[4].mxu0 %v7147_v6  ;;  %1732 = vmatmul.mubr.bf16.vlgmr.msra.gmra.mrb[4].mxu1 %v7147_v6 }
 0x2db   : > { %1743 = vmatpush1.bf16.msra.mxu0 %v5655_v36  ;;  %1786 = vmatpush1.bf16.msra.mxu1 %v5658_v37 }
 0x2dc   : > { %1744 = vmatprep.subr.bf16.mxu0 %v5663_v38  ;;  %1787 = vmatprep.subr.bf16.mxu1 %v5666_v40  ;;  %v7235_v38 = vsub.s32 %v1896_v27, %v1867_v11 }
 0x2dd   : > { %1774 = vmatprep.mubr.bf16.mxu0 %v6399_v39  ;;  %1817 = vmatprep.mubr.bf16.mxu1 %v6399_v39 }
 0x2df   : > { %1745 = vmatpush1.bf16.msra.mxu0 %v5661_v41  ;;  %1788 = vmatpush1.bf16.msra.mxu1 %v5664_v42 }
 0x2e0   : > { %1746 = vmatprep.subr.bf16.mxu0 %v5669_v43  ;;  %1789 = vmatprep.subr.bf16.mxu1 %v5672_v44 }
 0x2e3   : > { %1747 = vmatpush1.bf16.msra.mxu0 %v5667_v45  ;;  %1790 = vmatpush1.bf16.msra.mxu1 %v5670_v46 }
 0x2e4   : > { %1748 = vmatprep.subr.bf16.mxu0 %v5675_v47  ;;  %1791 = vmatprep.subr.bf16.mxu1 %v5678_v48 }
 0x2e7   : > { %1749 = vmatpush1.bf16.msra.mxu0 %v5673_v49  ;;  %1792 = vmatpush1.bf16.msra.mxu1 %v5676_v50 }
 0x2e8   : > { %1750 = vmatprep.subr.bf16.mxu0 %v5681_v51  ;;  %1793 = vmatprep.subr.bf16.mxu1 %v5684_v52 }
 0x2eb   : > { %1751 = vmatpush1.bf16.msra.mxu0 %v5679_v53  ;;  %1794 = vmatpush1.bf16.msra.mxu1 %v5682_v54 }
 0x2ec   : > { %1752 = vmatprep.subr.bf16.mxu0 %v5687_v55  ;;  %1795 = vmatprep.subr.bf16.mxu1 %v5690_v56 }
 0x2ef   : > { %1753 = vmatpush1.bf16.msra.mxu0 %v5685_v57  ;;  %1796 = vmatpush1.bf16.msra.mxu1 %v5688_v58 }
 0x2f0   : > { %1754 = vmatprep.subr.bf16.mxu0 %v5693_v59  ;;  %1797 = vmatprep.subr.bf16.mxu1 %v5696_v60 }
 0x2f3   : > { %1755 = vmatpush1.bf16.msra.mxu0 %v5691_v61  ;;  %1798 = vmatpush1.bf16.msra.mxu1 %v5694_v62 }
 0x2f4   : > { %1756 = vmatprep.subr.bf16.mxu0 %v5699_v63  ;;  %1799 = vmatprep.subr.bf16.mxu1 %v5702_v0 }
 0x2f7   : > { %1757 = vmatpush1.bf16.msra.mxu0 %v5697_v1  ;;  %1800 = vmatpush1.bf16.msra.mxu1 %v5700_v4 }
 0x2f8   : > { %5240 = vmatprep.subr.bf16.mxu0 %v6400_v2  ;;  %5246 = vmatprep.subr.bf16.mxu1 %v6400_v2 }
 0x2fa   : > { %1775 = vmatmul.mubr.bf16.vlgmr.msra.gmra.mrb[8].mxu0 %v7147_v6  ;;  %1818 = vmatmul.mubr.bf16.vlgmr.msra.gmra.mrb[8].mxu1 %v7147_v6 }
 0x2fb   : > { %5242 = vmatprep.mubr.msk.bf16.mxu0 %vm6401_vm0, %v6400_v2  ;;  %5248 = vmatprep.mubr.msk.bf16.mxu1 %vm6401_vm0, %v6400_v2 }
 0x38d   : > { %v1604_v3 = vpop.f32.mrb[0].mxu0  ;;  %v1647_v9 = vpop.f32.mrb[0].mxu1 }
 0x38e   : > { %v1606_v6 = vpop.f32.mrb[1].mxu0  ;;  %v1649_v12 = vpop.f32.mrb[1].mxu1 }
 0x38f   : > { %v1608_v15 = vpop.f32.mrb[2].mxu0  ;;  %v1651_v16 = vpop.f32.mrb[2].mxu1 }
 0x390   : > { %v1828_v17 = vpack.c.bf16 %v1608_v15, %v1604_v3  ;;  %v1830_v18 = vpack.c.bf16 %v1651_v16, %v1647_v9  ;;  %v1610_v19 = vpop.f32.mrb[3].mxu0  ;;  %v1653_v20 = vpop.f32.mrb[3].mxu1 }
 0x391   : > { %v1829_v21 = vpack.c.bf16 %v1610_v19, %v1606_v6  ;;  %v1831_v24 = vpack.c.bf16 %v1653_v20, %v1649_v12 }
 0x392   : > { %v1844_v25 = vshrl.u32 %v1828_v17, 16  ;;  %v1852_v26 = vshrl.u32 %v1830_v18, 16 }
 0x393   : > { %v1842_v28 = vpack.i.b16 %v1829_v21, %v1828_v17  ;;  %v1845_v29 = vshrl.u32 %v1829_v21, 16  ;;  %v1850_v30 = vpack.i.b16 %v1831_v24, %v1830_v18  ;;  %v1853_v31 = vshrl.u32 %v1831_v24, 16 }
 0x395   : > { %v1846_v32 = vpack.i.b16 %v1845_v29, %v1844_v25  ;;  %v1862_v33 = vcombine.high %v1842_v28, %v7227_v22  ;;  %v1869_v34 = vrot.slane %v1842_v28, %v7229_v23  ;;  %v1854_v35 = vpack.i.b16 %v1853_v31, %v1852_v26 }
 0x396   : > { %v1877_v36 = vcombine.high %v1850_v30, %v7227_v22  ;;  %v1884_v37 = vrot.slane %v1850_v30, %v7229_v23 }
 0x397   : > { %v1876_v40 = vrot.slane %v1862_v33, %v7229_v23  ;;  %v1928_v41 = vcombine.high %v1846_v32, %v7227_v22  ;;  %v1935_v42 = vrot.slane %v1846_v32, %v7229_v23  ;;  %v1943_v43 = vcombine.high %v1854_v35, %v7227_v22 }
 0x398   : > { %v1891_v44 = vrot.slane %v1877_v36, %v7229_v23  ;;  %v1892_v45 = vcombine.low %v1869_v34, %v1884_v37  ;;  %v1893_v46 = vcombine.high %v1869_v34, %v1884_v37  ;;  %v1950_v47 = vrot.slane %v1854_v35, %v7229_v23 }
 0x399   : > { %v1942_v48 = vrot.slane %v1928_v41, %v7229_v23  ;;  %v1957_v49 = vrot.slane %v1943_v43, %v7229_v23 }
 0x39a   : > { %v1900_v50 = vrot.slane %v1892_v45, %v7235_v38  ;;  %v1907_v51 = vrot.slane %v1893_v46, %v7235_v38  ;;  %v1908_v52 = vcombine.low %v1876_v40, %v1891_v44  ;;  %v1909_v53 = vcombine.high %v1876_v40, %v1891_v44 }
 0x39b   : > { %v1958_v54 = vcombine.low %v1935_v42, %v1950_v47  ;;  %v1959_v55 = vcombine.high %v1935_v42, %v1950_v47  ;;  %v1974_v56 = vcombine.low %v1942_v48, %v1957_v49  ;;  %v1975_v57 = vcombine.high %v1942_v48, %v1957_v49 }
 0x39c   : > { %v1916_v58 = vrot.slane %v1908_v52, %v7235_v38  ;;  %v1923_v59 = vrot.slane %v1909_v53, %v7235_v38  ;;  %v1994_v60 = vcombine.low %v1900_v50, %v1907_v51  ;;  %v5045_v61 = vcombine.high %v1900_v50, %v1907_v51 }
 0x39d   : > { %v1966_v62 = vrot.slane %v1958_v54, %v7235_v38  ;;  %v1973_v63 = vrot.slane %v1959_v55, %v7235_v38  ;;  %v1982_v0 = vrot.slane %v1974_v56, %v7235_v38  ;;  %v1989_v1 = vrot.slane %v1975_v57, %v7235_v38 }
 0x39e   : > { %v2001_v4 = vrot.slane %v1994_v60, %v7229_v23  ;;  %v2009_v5 = vrot.slane %v5045_v61, %v7229_v23  ;;  %v2044_v7 = vcombine.low %v1916_v58, %v1923_v59  ;;  %v5047_v8 = vcombine.high %v1916_v58, %v1923_v59 }
 0x39f   : > { %v2019_v3 = vcombine.low %v1966_v62, %v1973_v63  ;;  %v5046_v9 = vcombine.high %v1966_v62, %v1973_v63  ;;  %v2069_v10 = vcombine.low %v1982_v0, %v1989_v1  ;;  %v5048_v11 = vcombine.high %v1982_v0, %v1989_v1 }
 0x3a0   : > { %v2051_v6 = vrot.slane %v2044_v7, %v7229_v23  ;;  %v2059_v12 = vrot.slane %v5047_v8, %v7229_v23  ;;  %v2010_v13 = vcombine.low %v2001_v4, %v2009_v5 }
 0x3a1   : > { %v2026_v14 = vrot.slane %v2019_v3, %v7229_v23  ;;  %v2034_v15 = vrot.slane %v5046_v9, %v7229_v23  ;;  %v2076_v16 = vrot.slane %v2069_v10, %v7229_v23  ;;  %v2084_v17 = vrot.slane %v5048_v11, %v7229_v23 }
 0x3a2   : > { %v7262_v18 = vrot.slane %v2010_v13, %v7235_v38  ;;  %v2060_v19 = vcombine.low %v2051_v6, %v2059_v12 }
 0x3a3   : > { %v2035_v20 = vcombine.low %v2026_v14, %v2034_v15  ;;  %v2085_v21 = vcombine.low %v2076_v16, %v2084_v17 }
 0x3a4   : > { %v7265_v24 = vrot.slane %v2060_v19, %v7235_v38  ;;  %v7272_v26 = vcombine.high %v7262_v18, %v6399_v39  ;;  %v2098_v28 = vshrl.u32 %v7262_v18, 16 }
 0x3a5   : > { %v7268_v25 = vrot.slane %v2035_v20, %v7235_v38  ;;  %v7275_v27 = vrot.slane %v2085_v21, %v7235_v38 }
 0x3a6   : > { %v7280_v29 = vcombine.high %v7265_v24, %v6399_v39  ;;  %v2114_v34 = vshrl.u32 %v7265_v24, 16  ;;  %v2106_v41 = vshrl.u32 %v7272_v26, 16 }
 0x3a7   : > { %v2096_v30 = vpack.i.b16 %v7268_v25, %v7262_v18  ;;  %v2099_v31 = vshrl.u32 %v7268_v25, 16  ;;  %v7287_v32 = vcombine.high %v7268_v25, %v6399_v39  ;;  %v2112_v33 = vpack.i.b16 %v7275_v27, %v7265_v24 }
 0x3a8   : > { %v2115_v35 = vshrl.u32 %v7275_v27, 16  ;;  %v7295_v36 = vcombine.high %v7275_v27, %v6399_v39  ;;  %v2122_v45 = vshrl.u32 %v7280_v29, 16 }
 0x3a9   : > { %v7297_v37 = vpack.i.b16 %v2099_v31, %v2098_v28  ;;  %v2104_v40 = vpack.i.b16 %v7287_v32, %v7272_v26  ;;  %v2107_v42 = vshrl.u32 %v7287_v32, 16 }
 0x3aa   : > { %v7303_v43 = vpack.i.b16 %v2115_v35, %v2114_v34  ;;  %v2120_v44 = vpack.i.b16 %v7295_v36, %v7280_v29  ;;  %v2123_v46 = vshrl.u32 %v7295_v36, 16 }
 0x3ab   : > { %v7309_v47 = vpack.i.b16 %v2107_v42, %v2106_v41 }
 0x3ac   : > { %v7311_v48 = vpack.i.b16 %v2123_v46, %v2122_v45 }
 0x3ad   : > { %v1690_v49 = vpop.f32.mrb[4].mxu0  ;;  %v1733_v50 = vpop.f32.mrb[4].mxu1 }
 0x3ae   : > { %v1692_v51 = vpop.f32.mrb[5].mxu0  ;;  %v1735_v52 = vpop.f32.mrb[5].mxu1 }
 0x3af   : > { %v1694_v53 = vpop.f32.mrb[6].mxu0  ;;  %v1737_v54 = vpop.f32.mrb[6].mxu1 }
 0x3b0   : > { %v1832_v55 = vpack.c.bf16 %v1694_v53, %v1690_v49  ;;  %v1834_v56 = vpack.c.bf16 %v1737_v54, %v1733_v50  ;;  %v1696_v57 = vpop.f32.mrb[7].mxu0  ;;  %v1739_v58 = vpop.f32.mrb[7].mxu1 }
 0x3b1   : > { %v1833_v59 = vpack.c.bf16 %v1696_v57, %v1692_v51  ;;  %v1835_v60 = vpack.c.bf16 %v1739_v58, %v1735_v52 }
 0x3b2   : > { %v2130_v61 = vshrl.u32 %v1832_v55, 16  ;;  %v2138_v62 = vshrl.u32 %v1834_v56, 16 }
 0x3b3   : > { %v2128_v63 = vpack.i.b16 %v1833_v59, %v1832_v55  ;;  %v2131_v0 = vshrl.u32 %v1833_v59, 16  ;;  %v2136_v1 = vpack.i.b16 %v1835_v60, %v1834_v56  ;;  %v2139_v4 = vshrl.u32 %v1835_v60, 16 }
 0x3b5   : > { %v2132_v5 = vpack.i.b16 %v2131_v0, %v2130_v61  ;;  %v2142_v7 = vcombine.high %v2128_v63, %v7227_v22  ;;  %v2149_v8 = vrot.slane %v2128_v63, %v7229_v23  ;;  %v2140_v3 = vpack.i.b16 %v2139_v4, %v2138_v62 }
 0x3b6   : > { %v2157_v9 = vcombine.high %v2136_v1, %v7227_v22  ;;  %v2164_v10 = vrot.slane %v2136_v1, %v7229_v23 }
 0x3b7   : > { %v2156_v11 = vrot.slane %v2142_v7, %v7229_v23  ;;  %v2208_v6 = vcombine.high %v2132_v5, %v7227_v22  ;;  %v2215_v12 = vrot.slane %v2132_v5, %v7229_v23  ;;  %v2223_v13 = vcombine.high %v2140_v3, %v7227_v22 }
 0x3b8   : > { %v2171_v14 = vrot.slane %v2157_v9, %v7229_v23  ;;  %v2172_v15 = vcombine.low %v2149_v8, %v2164_v10  ;;  %v2173_v16 = vcombine.high %v2149_v8, %v2164_v10  ;;  %v2230_v17 = vrot.slane %v2140_v3, %v7229_v23 }
 0x3b9   : > { %v2222_v19 = vrot.slane %v2208_v6, %v7229_v23  ;;  %v2237_v20 = vrot.slane %v2223_v13, %v7229_v23 }
 0x3ba   : > { %v2180_v21 = vrot.slane %v2172_v15, %v7235_v38  ;;  %v2187_v28 = vrot.slane %v2173_v16, %v7235_v38  ;;  %v2188_v31 = vcombine.low %v2156_v11, %v2171_v14  ;;  %v2189_v34 = vcombine.high %v2156_v11, %v2171_v14 }
 0x3bb   : > { %v2238_v35 = vcombine.low %v2215_v12, %v2230_v17  ;;  %v2239_v41 = vcombine.high %v2215_v12, %v2230_v17  ;;  %v2254_v42 = vcombine.low %v2222_v19, %v2237_v20  ;;  %v2255_v45 = vcombine.high %v2222_v19, %v2237_v20 }
 0x3bc   : > { %v2196_v46 = vrot.slane %v2188_v31, %v7235_v38  ;;  %v2203_v49 = vrot.slane %v2189_v34, %v7235_v38  ;;  %v2274_v50 = vcombine.low %v2180_v21, %v2187_v28  ;;  %v5049_v51 = vcombine.high %v2180_v21, %v2187_v28 }
 0x3bd   : > { %v2246_v52 = vrot.slane %v2238_v35, %v7235_v38  ;;  %v2253_v53 = vrot.slane %v2239_v41, %v7235_v38  ;;  %v2262_v54 = vrot.slane %v2254_v42, %v7235_v38  ;;  %v2269_v55 = vrot.slane %v2255_v45, %v7235_v38 }
 0x3be   : > { %v2281_v56 = vrot.slane %v2274_v50, %v7229_v23  ;;  %v2289_v57 = vrot.slane %v5049_v51, %v7229_v23  ;;  %v2324_v58 = vcombine.low %v2196_v46, %v2203_v49  ;;  %v5051_v59 = vcombine.high %v2196_v46, %v2203_v49 }
 0x3bf   : > { %v2299_v60 = vcombine.low %v2246_v52, %v2253_v53  ;;  %v5050_v61 = vcombine.high %v2246_v52, %v2253_v53  ;;  %v2349_v62 = vcombine.low %v2262_v54, %v2269_v55  ;;  %v5052_v63 = vcombine.high %v2262_v54, %v2269_v55 }
 0x3c0   : > { %v2331_v0 = vrot.slane %v2324_v58, %v7229_v23  ;;  %v2339_v1 = vrot.slane %v5051_v59, %v7229_v23  ;;  %v2290_v4 = vcombine.low %v2281_v56, %v2289_v57 }
 0x3c1   : > { %v2306_v5 = vrot.slane %v2299_v60, %v7229_v23  ;;  %v2314_v7 = vrot.slane %v5050_v61, %v7229_v23  ;;  %v2356_v8 = vrot.slane %v2349_v62, %v7229_v23  ;;  %v2364_v3 = vrot.slane %v5052_v63, %v7229_v23 }
 0x3c2   : > { %v2297_v9 = vrot.slane %v2290_v4, %v7235_v38  ;;  %v2340_v10 = vcombine.low %v2331_v0, %v2339_v1 }
 0x3c3   : > { %v2315_v11 = vcombine.low %v2306_v5, %v2314_v7  ;;  %v2365_v6 = vcombine.low %v2356_v8, %v2364_v3 }
 0x3c4   : > { %v7343_v12 = vrot.slane %v2340_v10, %v7235_v38  ;;  %v2298_v14 = vcombine.high %v2297_v9, %v6399_v39  ;;  %v2378_v16 = vshrl.u32 %v2297_v9, 16 }
 0x3c5   : > { %v2322_v13 = vrot.slane %v2315_v11, %v7235_v38  ;;  %v7348_v15 = vrot.slane %v2365_v6, %v7235_v38 }
 0x3c6   : > { %v7352_v17 = vcombine.high %v7343_v12, %v6399_v39  ;;  %v2394_v31 = vshrl.u32 %v7343_v12, 16  ;;  %v2386_v45 = vshrl.u32 %v2298_v14, 16 }
 0x3c7   : > { %v2376_v19 = vpack.i.b16 %v2322_v13, %v2297_v9  ;;  %v2379_v20 = vshrl.u32 %v2322_v13, 16  ;;  %v2323_v21 = vcombine.high %v2322_v13, %v6399_v39  ;;  %v2392_v28 = vpack.i.b16 %v7348_v15, %v7343_v12 }
 0x3c8   : > { %v2395_v34 = vshrl.u32 %v7348_v15, 16  ;;  %v7361_v35 = vcombine.high %v7348_v15, %v6399_v39  ;;  %v2402_v51 = vshrl.u32 %v7352_v17, 16 }
 0x3c9   : > { %5241 = vmatpush3.bf16.xpose.msra.mxu0 %v2376_v19  ;;  %v2380_v41 = vpack.i.b16 %v2379_v20, %v2378_v16  ;;  %v2384_v42 = vpack.i.b16 %v2323_v21, %v2298_v14  ;;  %v2387_v46 = vshrl.u32 %v2323_v21, 16 }
 0x3ca   : > { %5252 = vmatprep.subr.bf16.mxu0 %v6400_v2  ;;  %v2396_v49 = vpack.i.b16 %v2395_v34, %v2394_v31  ;;  %v2400_v50 = vpack.i.b16 %v7361_v35, %v7352_v17  ;;  %v2403_v52 = vshrl.u32 %v7361_v35, 16 }
 0x3cb   : > { %5247 = vmatpush3.bf16.xpose.msra.mxu1 %v2380_v41  ;;  %v2388_v53 = vpack.i.b16 %v2387_v46, %v2386_v45 }
 0x3cc   : > { %5258 = vmatprep.subr.bf16.mxu1 %v6400_v2  ;;  %v7369_v54 = vpack.i.b16 %v2403_v52, %v2402_v51 }
 0x3cd   : > { %v1776_v55 = vpop.f32.mrb[8].mxu0  ;;  %v1819_v56 = vpop.f32.mrb[8].mxu1 }
 0x3ce   : > { %v1778_v57 = vpop.f32.mrb[9].mxu0  ;;  %v1821_v58 = vpop.f32.mrb[9].mxu1 }
 0x3cf   : > { %v1780_v59 = vpop.f32.mrb[10].mxu0  ;;  %v1823_v60 = vpop.f32.mrb[10].mxu1 }
 0x3d0   : > { %5243 = vmatmul.mubr.bf16.vlgmr.msra.gmra.mrb[12].mxu0 %v2096_v30  ;;  %v1836_v61 = vpack.c.bf16 %v1780_v59, %v1776_v55  ;;  %v1838_v62 = vpack.c.bf16 %v1823_v60, %v1819_v56  ;;  %v1782_v63 = vpop.f32.mrb[11].mxu0  ;;  %v1825_v0 = vpop.f32.mrb[11].mxu1 }
 0x3d1   : > { %5253 = vmatpush3.bf16.xpose.msra.mxu0 %v2384_v42  ;;  %v1837_v1 = vpack.c.bf16 %v1782_v63, %v1778_v57  ;;  %v1839_v4 = vpack.c.bf16 %v1825_v0, %v1821_v58  ;;  %5254 = vmatprep.mubr.msk.bf16.mxu0 %vm6401_vm0, %v6400_v2 }
 0x3d2   : > { %v2410_v5 = vshrl.u32 %v1836_v61, 16  ;;  %v2418_v7 = vshrl.u32 %v1838_v62, 16  ;;  %5249 = vmatmul.mubr.bf16.vlgmr.msra.gmra.mrb[12].mxu1 %v7297_v37  ;;  %5264 = vmatprep.subr.bf16.mxu0 %v6400_v2 }
 0x3d3   : > { %v2408_v8 = vpack.i.b16 %v1837_v1, %v1836_v61  ;;  %v2411_v3 = vshrl.u32 %v1837_v1, 16  ;;  %v2416_v18 = vpack.i.b16 %v1839_v4, %v1838_v62  ;;  %v2419_v25 = vshrl.u32 %v1839_v4, 16  ;;  %5259 = vmatpush3.bf16.xpose.msra.mxu1 %v2388_v53  ;;  %5260 = vmatprep.mubr.msk.bf16.mxu1 %vm6401_vm0, %v6400_v2 }
 0x3d4   : > { %5270 = vmatprep.subr.bf16.mxu1 %v6400_v2 }
 0x3d5   : > { %v2412_v30 = vpack.i.b16 %v2411_v3, %v2410_v5  ;;  %v2422_v9 = vcombine.high %v2408_v8, %v7227_v22  ;;  %v2429_v10 = vrot.slane %v2408_v8, %v7229_v23  ;;  %v2420_v11 = vpack.i.b16 %v2419_v25, %v2418_v7 }
 0x3d6   : > { %v2437_v37 = vcombine.high %v2416_v18, %v7227_v22  ;;  %v2444_v6 = vrot.slane %v2416_v18, %v7229_v23 }
 0x3d7   : > { %v2436_v12 = vrot.slane %v2422_v9, %v7229_v23  ;;  %v2488_v13 = vcombine.high %v2412_v30, %v7227_v22  ;;  %v2495_v14 = vrot.slane %v2412_v30, %v7229_v23  ;;  %v2503_v15 = vcombine.high %v2420_v11, %v7227_v22 }
 0x3d8   : > { %v2451_v16 = vrot.slane %v2437_v37, %v7229_v23  ;;  %v2452_v19 = vcombine.low %v2429_v10, %v2444_v6  ;;  %v2453_v20 = vcombine.high %v2429_v10, %v2444_v6  ;;  %v2510_v21 = vrot.slane %v2420_v11, %v7229_v23  ;;  %5255 = vmatmul.mubr.bf16.vlgmr.msra.gmra.mrb[16].mxu0 %v2104_v40 }
 0x3d9   : > { %v2502_v31 = vrot.slane %v2488_v13, %v7229_v23  ;;  %v2517_v34 = vrot.slane %v2503_v15, %v7229_v23  ;;  %5265 = vmatpush3.bf16.xpose.msra.mxu0 %v2392_v28  ;;  %5266 = vmatprep.mubr.msk.bf16.mxu0 %vm6401_vm0, %v6400_v2 }
 0x3da   : > { %v2460_v22 = vrot.slane %v2452_v19, %v7235_v38  ;;  %v2467_v41 = vrot.slane %v2453_v20, %v7235_v38  ;;  %v2468_v42 = vcombine.low %v2436_v12, %v2451_v16  ;;  %v2469_v45 = vcombine.high %v2436_v12, %v2451_v16  ;;  %5261 = vmatmul.mubr.bf16.vlgmr.msra.gmra.mrb[16].mxu1 %v7309_v47 }
 0x3db   : > { %v2518_v46 = vcombine.low %v2495_v14, %v2510_v21  ;;  %v2519_v51 = vcombine.high %v2495_v14, %v2510_v21  ;;  %v2534_v26 = vcombine.low %v2502_v31, %v2517_v34  ;;  %v2535_v32 = vcombine.high %v2502_v31, %v2517_v34  ;;  %5271 = vmatpush3.bf16.xpose.msra.mxu1 %v2396_v49 }
 0x3dc   : > { %v2476_v40 = vrot.slane %v2468_v42, %v7235_v38  ;;  %v2483_v28 = vrot.slane %v2469_v45, %v7235_v38  ;;  %v2554_v52 = vcombine.low %v2460_v22, %v2467_v41  ;;  %v5053_v53 = vcombine.high %v2460_v22, %v2467_v41  ;;  %5276 = vmatprep.subr.bf16.mxu0 %v6400_v2 }
 0x3dd   : > { %v2526_v55 = vrot.slane %v2518_v46, %v7235_v38  ;;  %v2533_v56 = vrot.slane %v2519_v51, %v7235_v38  ;;  %v2542_v57 = vrot.slane %v2534_v26, %v7235_v38  ;;  %v2549_v47 = vrot.slane %v2535_v32, %v7235_v38  ;;  %5272 = vmatprep.mubr.msk.bf16.mxu1 %vm6401_vm0, %v6400_v2 }
 0x3de   : > { %v2561_v49 = vrot.slane %v2554_v52, %v7229_v23  ;;  %v2569_v58 = vrot.slane %v5053_v53, %v7229_v23  ;;  %v2604_v59 = vcombine.low %v2476_v40, %v2483_v28  ;;  %v5055_v60 = vcombine.high %v2476_v40, %v2483_v28  ;;  %5282 = vmatprep.subr.bf16.mxu1 %v6400_v2 }
 0x3df   : > { %v2579_v61 = vcombine.low %v2526_v55, %v2533_v56  ;;  %v5054_v62 = vcombine.high %v2526_v55, %v2533_v56  ;;  %v2629_v63 = vcombine.low %v2542_v57, %v2549_v47  ;;  %v5056_v0 = vcombine.high %v2542_v57, %v2549_v47 }
 0x3e0   : > { %5267 = vmatmul.mubr.bf16.vlgmr.msra.gmra.mrb[20].mxu0 %v2112_v33  ;;  %v2570_v1 = vcombine.low %v2561_v49, %v2569_v58  ;;  %v2611_v4 = vrot.slane %v2604_v59, %v7229_v23  ;;  %v2619_v5 = vrot.slane %v5055_v60, %v7229_v23 }
 0x3e1   : > { %5277 = vmatpush3.bf16.xpose.msra.mxu0 %v2400_v50  ;;  %5278 = vmatprep.mubr.msk.bf16.mxu0 %vm6401_vm0, %v6400_v2  ;;  %v2586_v7 = vrot.slane %v2579_v61, %v7229_v23  ;;  %v2594_v8 = vrot.slane %v5054_v62, %v7229_v23  ;;  %v2636_v3 = vrot.slane %v2629_v63, %v7229_v23 }
 0x3e2   : > { %5273 = vmatmul.mubr.bf16.vlgmr.msra.gmra.mrb[20].mxu1 %v7303_v43  ;;  %5288 = vmatprep.subr.bf16.mxu0 %v6400_v2  ;;  %v2577_v24 = vrot.slane %v2570_v1, %v7235_v38  ;;  %v2620_v27 = vcombine.low %v2611_v4, %v2619_v5  ;;  %v2644_v33 = vrot.slane %v5056_v0, %v7229_v23 }
 0x3e3   : > { %5283 = vmatpush3.bf16.xpose.msra.mxu1 %v7369_v54  ;;  %5284 = vmatprep.mubr.msk.bf16.mxu1 %vm6401_vm0, %v6400_v2  ;;  %v2595_v17 = vcombine.low %v2586_v7, %v2594_v8 }
 0x3e4   : > { %5294 = vmatprep.subr.bf16.mxu1 %v6400_v2  ;;  %v2578_v35 = vcombine.high %v2577_v24, %v6399_v39  ;;  %v2627_v50 = vrot.slane %v2620_v27, %v7235_v38  ;;  %v2645_v43 = vcombine.low %v2636_v3, %v2644_v33  ;;  %v2657_v25 = vshrl.u32 %v2577_v24, 16 }
 0x3e5   : > { %v2602_v18 = vrot.slane %v2595_v17, %v7235_v38 }
 0x3e6   : > { %v2663_v30 = vshrl.u32 %v2578_v35, 16  ;;  %v2652_v9 = vrot.slane %v2645_v43, %v7235_v38  ;;  %v2628_v54 = vcombine.high %v2627_v50, %v6399_v39  ;;  %v2669_v6 = vshrl.u32 %v2627_v50, 16 }
 0x3e7   : > { %v2656_v10 = vpack.i.b16 %v2602_v18, %v2577_v24  ;;  %v2658_v11 = vshrl.u32 %v2602_v18, 16  ;;  %v2603_v37 = vcombine.high %v2602_v18, %v6399_v39 }
 0x3e8   : > { %5279 = vmatmul.mubr.bf16.vlgmr.msra.gmra.mrb[24].mxu0 %v2120_v44  ;;  %v2668_v12 = vpack.i.b16 %v2652_v9, %v2627_v50  ;;  %v2670_v13 = vshrl.u32 %v2652_v9, 16  ;;  %v2653_v14 = vcombine.high %v2652_v9, %v6399_v39  ;;  %v2675_v15 = vshrl.u32 %v2628_v54, 16 }
 0x3e9   : > { %v3108_v16 = vsel %vm3106_vm1, %v2656_v10, 0  ;;  %v2659_v19 = vpack.i.b16 %v2658_v11, %v2657_v25  ;;  %5290 = vmatprep.mubr.msk.bf16.mxu0 %vm6401_vm0, %v6400_v2  ;;  %v2662_v20 = vpack.i.b16 %v2603_v37, %v2578_v35  ;;  %v2664_v21 = vshrl.u32 %v2603_v37, 16 }
 0x3ea   : > { %5285 = vmatmul.mubr.bf16.vlgmr.msra.gmra.mrb[24].mxu1 %v7311_v48  ;;  %5289 = vmatpush3.bf16.msra.mxu0 %v3108_v16  ;;  %v7449_v31 = vsel %vm3106_vm1, %v2668_v12, 0  ;;  %v2671_v29 = vpack.i.b16 %v2670_v13, %v2669_v6  ;;  %v2674_v36 = vpack.i.b16 %v2653_v14, %v2628_v54  ;;  %v2676_v44 = vshrl.u32 %v2653_v14, 16 }
 0x3eb   : > { %v3154_v34 = vsel %vm3106_vm1, %v2659_v19, 0  ;;  %5300 = vmatprep.subr.bf16.mxu0 %v6400_v2  ;;  %v7454_v22 = vsel %vm3106_vm1, %v2662_v20, 0  ;;  %5296 = vmatprep.mubr.msk.bf16.mxu1 %vm6401_vm0, %v6400_v2  ;;  %v2665_v41 = vpack.i.b16 %v2664_v21, %v2663_v30 }
 0x3ec   : > { %5295 = vmatpush3.bf16.msra.mxu1 %v3154_v34  ;;  %v7459_v48 = vsel %vm3106_vm1, %v2671_v29, 0  ;;  %v7462_v42 = vsel %vm3106_vm1, %v2674_v36, 0  ;;  %v2677_v45 = vpack.i.b16 %v2676_v44, %v2675_v15 }
 0x3ed   : > { %5306 = vmatprep.subr.bf16.mxu1 %v6400_v2  ;;  %v7466_v46 = vsel %vm3106_vm1, %v2665_v41, 0 }
 0x3ee   : > { %v7469_v51 = vsel %vm3106_vm1, %v2677_v45, 0 }
 0x4a3   : > { %v2712_v26 = vpop.f32.mrb[12].mxu0 }
 0x4a4   : > { %v2998_v32 = vmul.f32 0.35355338, %v2712_v26  ;;  %v5244_v40 = vpop.f32.mrb[13].mxu0 }
 0x4a5   : > { %v2715_v28 = vpop.f32.mrb[14].mxu0  ;;  %v2752_v52 = vpop.f32.mrb[12].mxu1 }
 0x4a6   : > { %v2999_v53 = vmul.f32 0.35355338, %v2752_v52  ;;  %v5245_v55 = vpop.f32.mrb[15].mxu0  ;;  %v5250_v56 = vpop.f32.mrb[13].mxu1  ;;  %v3007_v57 = vsel %vm3006_vm2, %v2998_v32, -inf }
 0x4a7   : > { %v2755_v47 = vpop.f32.mrb[14].mxu1  ;;  %3008 = vmax.xlane.f32.xlu0 %v3007_v57 }
 0x4a8   : > { %v5251_v49 = vpop.f32.mrb[15].mxu1  ;;  %v3010_v58 = vsel %vm3006_vm2, %v2999_v53, -inf }
 0x4a9   : > { %3011 = vmax.xlane.f32.xlu1 %v3010_v58 }
 0x4ab   : > { %v2792_v59 = vpop.f32.mrb[16].mxu0 }
 0x4ac   : > { %v3000_v60 = vmul.f32 0.35355338, %v2792_v59  ;;  %v5256_v61 = vpop.f32.mrb[17].mxu0 }
 0x4ad   : > { %v2795_v62 = vpop.f32.mrb[18].mxu0  ;;  %v2832_v63 = vpop.f32.mrb[16].mxu1 }
 0x4ae   : > { %v3001_v0 = vmul.f32 0.35355338, %v2832_v63  ;;  %v5257_v1 = vpop.f32.mrb[19].mxu0  ;;  %v5262_v4 = vpop.f32.mrb[17].mxu1  ;;  %v3013_v5 = vsel %vm3006_vm2, %v3000_v60, -inf }
 0x4af   : > { %v2835_v7 = vpop.f32.mrb[18].mxu1  ;;  %3014 = vmax.xlane.f32.xlu0 %v3013_v5 }
 0x4b0   : > { %v5263_v8 = vpop.f32.mrb[19].mxu1  ;;  %v3016_v3 = vsel %vm3006_vm2, %v3001_v0, -inf }
 0x4b1   : > { %3017 = vmax.xlane.f32.xlu1 %v3016_v3 }
 0x4b3   : > { %v2872_v24 = vpop.f32.mrb[20].mxu0 }
 0x4b4   : > { %v3002_v27 = vmul.f32 0.35355338, %v2872_v24  ;;  %v5268_v33 = vpop.f32.mrb[21].mxu0 }
 0x4b5   : > { %v2875_v17 = vpop.f32.mrb[22].mxu0  ;;  %v2912_v35 = vpop.f32.mrb[20].mxu1 }
 0x4b6   : > { %v3003_v50 = vmul.f32 0.35355338, %v2912_v35  ;;  %v5269_v43 = vpop.f32.mrb[23].mxu0  ;;  %v5274_v18 = vpop.f32.mrb[21].mxu1  ;;  %v3019_v25 = vsel %vm3006_vm2, %v3002_v27, -inf }
 0x4b7   : > { %v2915_v30 = vpop.f32.mrb[22].mxu1  ;;  %3020 = vmax.xlane.f32.xlu0 %v3019_v25 }
 0x4b8   : > { %v5275_v9 = vpop.f32.mrb[23].mxu1  ;;  %v3022_v54 = vsel %vm3006_vm2, %v3003_v50, -inf }
 0x4b9   : > { %3023 = vmax.xlane.f32.xlu1 %v3022_v54 }
 0x4bb   : > { %v2952_v10 = vpop.f32.mrb[24].mxu0 }
 0x4bc   : > { %v3004_v11 = vmul.f32 0.35355338, %v2952_v10  ;;  %v5280_v37 = vpop.f32.mrb[25].mxu0 }
 0x4bd   : > { %v2955_v6 = vpop.f32.mrb[26].mxu0  ;;  %v2992_v12 = vpop.f32.mrb[24].mxu1 }
 0x4be   : > { %v3005_v13 = vmul.f32 0.35355338, %v2992_v12  ;;  %v5281_v14 = vpop.f32.mrb[27].mxu0  ;;  %v5286_v15 = vpop.f32.mrb[25].mxu1  ;;  %v3025_v16 = vsel %vm3006_vm2, %v3004_v11, -inf }
 0x4bf   : > { %v2995_v19 = vpop.f32.mrb[26].mxu1  ;;  %3026 = vmax.xlane.f32.xlu0 %v3025_v16 }
 0x4c0   : > { %v5287_v20 = vpop.f32.mrb[27].mxu1  ;;  %v3028_v21 = vsel %vm3006_vm2, %v3005_v13, -inf }
 0x4c1   : > { %3029 = vmax.xlane.f32.xlu1 %v3028_v21 }
 0x534   : > { %v3009_v29 = vpop.xlane.xlu0 %3008 }
 0x535   : > { %v3031_v36 = vsub.f32 %v2998_v32, %v3009_v29 }
 0x536   : > { %v3012_v44 = vpop.xlane.xlu1 %3011 }
 0x537   : > { %v3039_v34 = vmul.f32 1.442695, %v3031_v36  ;;  %v3032_v41 = vsub.f32 %v2999_v53, %v3012_v44 }
 0x539   : > { %5755 = vpow2.f32 %v3039_v34  ;;  %v3041_v45 = vmul.f32 1.442695, %v3032_v41 }
 0x53b   : > { %5757 = vpow2.f32 %v3041_v45 }
 0x53c   : > { %v3015_v26 = vpop.xlane.xlu0 %3014 }
 0x53d   : > { %v3033_v40 = vsub.f32 %v3000_v60, %v3015_v26 }
 0x53e   : > { %v3018_v28 = vpop.xlane.xlu1 %3017 }
 0x53f   : > { %v3043_v52 = vmul.f32 1.442695, %v3033_v40  ;;  %v3034_v55 = vsub.f32 %v3001_v0, %v3018_v28 }
 0x541   : > { %5759 = vpow2.f32 %v3043_v52  ;;  %v3045_v56 = vmul.f32 1.442695, %v3034_v55 }
 0x543   : > { %v5756_v57 = vpop.eup %5755  ;;  %5761 = vpow2.f32 %v3045_v56 }
 0x544   : > { %v3021_v47 = vpop.xlane.xlu0 %3020  ;;  %v3055_v49 = vsel %vm3006_vm2, %v5756_v57, 0.0 }
 0x545   : > { %v5758_v58 = vpop.eup %5757  ;;  %v3035_v32 = vsub.f32 %v3002_v27, %v3021_v47  ;;  %3056 = vadd.xlane.f32.xlu0 %v3055_v49  ;;  %v5703_v47 = vld [vmem:[%s7040_s13 + $0x40] sm:$0xff]  }
 0x546   : > { %v3024_v59 = vpop.xlane.xlu1 %3023  ;;  %v3058_v53 = vsel %vm3006_vm2, %v5758_v58, 0.0  ;;  %v5705_v49 = vld [vmem:[%s7040_s13] sm:$0xff]  }
 0x547   : > { %v3047_v61 = vmul.f32 1.442695, %v3035_v32  ;;  %v3036_v62 = vsub.f32 %v3003_v50, %v3024_v59  ;;  %3059 = vadd.xlane.f32.xlu1 %v3058_v53  ;;  %v5707_v32 = vld [vmem:[%s7040_s13 + $0x48] sm:$0xff]  }
 0x548   : > { %v5708_v59 = vld [vmem:[%s7040_s13 + $0xc8] sm:$0xff]  }
 0x549   : > { %5763 = vpow2.f32 %v3047_v61  ;;  %v3049_v60 = vmul.f32 1.442695, %v3036_v62  ;;  %v5709_v53 = vld [vmem:[%s7040_s13 + $0x8] sm:$0xff]   ;;  %v5711_v62 = vld [vmem:[%s7040_s13 + $0x50] sm:$0xff]  }
 0x54a   : > { %v5710_v61 = vld [vmem:[%s7040_s13 + $0x88] sm:$0xff]  }
 0x54b   : > { %v5760_v63 = vpop.eup %5759  ;;  %5765 = vpow2.f32 %v3049_v60  ;;  %v5712_v60 = vld [vmem:[%s7040_s13 + $0xd0] sm:$0xff]  }
 0x54c   : > { %v3027_v0 = vpop.xlane.xlu0 %3026  ;;  %v3061_v1 = vsel %vm3006_vm2, %v5760_v63, 0.0 }
 0x54d   : > { %v5762_v4 = vpop.eup %5761  ;;  %v3037_v5 = vsub.f32 %v3004_v11, %v3027_v0  ;;  %3062 = vadd.xlane.f32.xlu0 %v3061_v1  ;;  %v5714_v0 = vld [vmem:[%s7040_s13 + $0x90] sm:$0xff]   ;;  %v5715_v1 = vld [vmem:[%s7040_s13 + $0x58] sm:$0xff]  }
 0x54e   : > { %v3030_v7 = vpop.xlane.xlu1 %3029  ;;  %v3064_v8 = vsel %vm3006_vm2, %v5762_v4, 0.0 }
 0x54f   : > { %v3051_v3 = vmul.f32 1.442695, %v3037_v5  ;;  %v3038_v24 = vsub.f32 %v3005_v13, %v3030_v7  ;;  %3065 = vadd.xlane.f32.xlu1 %v3064_v8  ;;  %v5717_v5 = vld [vmem:[%s7040_s13 + $0x18] sm:$0xff]   ;;  %v5719_v8 = vld [vmem:[%s7040_s13 + $0x60] sm:$0xff]  }
 0x550   : > { %v5718_v7 = vld [vmem:[%s7040_s13 + $0x98] sm:$0xff]  }
 0x551   : > { %5767 = vpow2.f32 %v3051_v3  ;;  %v3053_v27 = vmul.f32 1.442695, %v3038_v24  ;;  %v5720_v3 = vld [vmem:[%s7040_s13 + $0xe0] sm:$0xff]  }
 0x552   : > { %v5721_v24 = vld [vmem:[%s7040_s13 + $0x20] sm:$0xff]  }
 0x553   : > { %v5764_v33 = vpop.eup %5763  ;;  %5769 = vpow2.f32 %v3053_v27  ;;  %v5722_v27 = vld [vmem:[%s7040_s13 + $0xa0] sm:$0xff]  }
 0x554   : > { %v3067_v17 = vsel %vm3006_vm2, %v5764_v33, 0.0 }
 0x555   : > { %v5766_v35 = vpop.eup %5765  ;;  %3068 = vadd.xlane.f32.xlu0 %v3067_v17  ;;  %v5724_v17 = vld [vmem:[%s7040_s13 + $0xe8] sm:$0xff]  }
 0x556   : > { %v3070_v50 = vsel %vm3006_vm2, %v5766_v35, 0.0 }
 0x557   : > { %3071 = vadd.xlane.f32.xlu1 %v3070_v50  ;;  %v5726_v50 = vld [vmem:[%s7040_s13 + $0xa8] sm:$0xff]  }
 0x55b   : > { %v7485_v43 = vpop.eup %5767 }
 0x55c   : > { %v3073_v18 = vsel %vm3006_vm2, %v7485_v43, 0.0 }
 0x55d   : > { %v7489_v25 = vpop.eup %5769  ;;  %3074 = vadd.xlane.f32.xlu0 %v3073_v18  ;;  %v5728_v18 = vld [vmem:[%s7040_s13 + $0xf0] sm:$0xff]  }
 0x55e   : > { %v3076_v30 = vsel %vm3006_vm2, %v7489_v25, 0.0 }
 0x55f   : > { %3077 = vadd.xlane.f32.xlu1 %v3076_v30  ;;  %v5730_v30 = vld [vmem:[%s7040_s13 + $0xb0] sm:$0xff]  }
 0x5d2   : > { %v3057_v9 = vpop.xlane.xlu0 %3056 }
 0x5d3   : > { %5771 = vrcp.f32 %v3057_v9  ;;  %v5731_v9 = vld [vmem:[%s7040_s13 + $0x78] sm:$0xff]  }
 0x5d4   : > { %v3060_v54 = vpop.xlane.xlu1 %3059 }
 0x5d5   : > { %5773 = vrcp.f32 %v3060_v54  ;;  %v5732_v54 = vld [vmem:[%s7040_s13 + $0xf8] sm:$0xff]  }
 0x5da   : > { %v3063_v10 = vpop.xlane.xlu0 %3062 }
 0x5db   : > { %5775 = vrcp.f32 %v3063_v10  ;;  %v5733_v10 = vld [vmem:[%s7040_s13 + $0x38] sm:$0xff]  }
 0x5dc   : > { %v3066_v11 = vpop.xlane.xlu1 %3065 }
 0x5dd   : > { %v5772_v37 = vpop.eup %5771  ;;  %5777 = vrcp.f32 %v3066_v11  ;;  %v5734_v11 = vld [vmem:[%s7040_s13 + $0xb8] sm:$0xff]  }
 0x5de   : > { %v3087_v6 = vmul.f32 %v5772_v37, %v5756_v57 }
 0x5df   : > { %v5774_v12 = vpop.eup %5773 }
 0x5e0   : > { %v3088_v13 = vmul.f32 %v5774_v12, %v5758_v58  ;;  %v3095_v14 = vpack.c.bf16 %v3087_v6, %v3087_v6  ;;  %v5706_v58 = vld [vmem:[%s7040_s13 + $0x80] sm:$0xff]  }
 0x5e2   : > { %v3069_v15 = vpop.xlane.xlu0 %3068  ;;  %5291 = vmatmul.mubr.msk.bf16.vlgmr.msra.gmra.mrb[28].mxu0 %vm3006_vm2, %v3095_v14  ;;  %v3096_v16 = vpack.c.bf16 %v3088_v13, %v3088_v13 }
 0x5e3   : > { %5779 = vrcp.f32 %v3069_v15  ;;  %5301 = vmatpush3.bf16.msra.mxu0 %v7454_v22  ;;  %5302 = vmatprep.mubr.msk.bf16.mxu0 %vm6401_vm0, %v6400_v2 }
 0x5e4   : > { %v3072_v19 = vpop.xlane.xlu1 %3071  ;;  %5297 = vmatmul.mubr.msk.bf16.vlgmr.msra.gmra.mrb[28].mxu1 %vm3006_vm2, %v3096_v16  ;;  %5312 = vmatprep.subr.bf16.mxu0 %v6400_v2 }
 0x5e5   : > { %v5776_v20 = vpop.eup %5775  ;;  %5781 = vrcp.f32 %v3072_v19  ;;  %5307 = vmatpush3.bf16.msra.mxu1 %v7466_v46  ;;  %5308 = vmatprep.mubr.msk.bf16.mxu1 %vm6401_vm0, %v6400_v2 }
 0x5e6   : > { %v3089_v21 = vmul.f32 %v5776_v20, %v5760_v63  ;;  %5318 = vmatprep.subr.bf16.mxu1 %v6400_v2  ;;  %v5713_v63 = vld [vmem:[%s7040_s13 + $0x10] sm:$0xff]  }
 0x5e7   : > { %v5778_v29 = vpop.eup %5777 }
 0x5e8   : > { %v3090_v22 = vmul.f32 %v5778_v29, %v5762_v4  ;;  %v3097_v36 = vpack.c.bf16 %v3089_v21, %v3089_v21  ;;  %v5716_v4 = vld [vmem:[%s7040_s13 + $0xd8] sm:$0xff]  }
 0x5ea   : > { %v3075_v44 = vpop.xlane.xlu0 %3074  ;;  %5303 = vmatmul.mubr.msk.bf16.vlgmr.msra.gmra.mrb[32].mxu0 %vm3006_vm2, %v3097_v36  ;;  %v3098_v34 = vpack.c.bf16 %v3090_v22, %v3090_v22 }
 0x5eb   : > { %5783 = vrcp.f32 %v3075_v44  ;;  %5313 = vmatpush3.bf16.msra.mxu0 %v7449_v31  ;;  %5314 = vmatprep.mubr.msk.bf16.mxu0 %vm6401_vm0, %v6400_v2 }
 0x5ec   : > { %v3078_v46 = vpop.xlane.xlu1 %3077  ;;  %5309 = vmatmul.mubr.msk.bf16.vlgmr.msra.gmra.mrb[32].mxu1 %vm3006_vm2, %v3098_v34  ;;  %5324 = vmatprep.subr.bf16.mxu0 %v6400_v2 }
 0x5ed   : > { %v5780_v41 = vpop.eup %5779  ;;  %5785 = vrcp.f32 %v3078_v46  ;;  %5319 = vmatpush3.bf16.msra.mxu1 %v7459_v48  ;;  %5320 = vmatprep.mubr.msk.bf16.mxu1 %vm6401_vm0, %v6400_v2 }
 0x5ee   : > { %v3091_v45 = vmul.f32 %v5780_v41, %v5764_v33  ;;  %5330 = vmatprep.subr.bf16.mxu1 %v6400_v2  ;;  %v5723_v33 = vld [vmem:[%s7040_s13 + $0x68] sm:$0xff]  }
 0x5ef   : > { %v5782_v26 = vpop.eup %5781 }
 0x5f0   : > { %v3092_v31 = vmul.f32 %v5782_v26, %v5766_v35  ;;  %v3099_v40 = vpack.c.bf16 %v3091_v45, %v3091_v45  ;;  %v5725_v35 = vld [vmem:[%s7040_s13 + $0x28] sm:$0xff]  }
 0x5f2   : > { %5315 = vmatmul.mubr.msk.bf16.vlgmr.msra.gmra.mrb[36].mxu0 %vm3006_vm2, %v3099_v40  ;;  %v3100_v28 = vpack.c.bf16 %v3092_v31, %v3092_v31 }
 0x5f3   : > { %5325 = vmatpush3.bf16.msra.mxu0 %v7462_v42  ;;  %5326 = vmatprep.mubr.msk.bf16.mxu0 %vm6401_vm0, %v6400_v2 }
 0x5f4   : > { %5321 = vmatmul.mubr.msk.bf16.vlgmr.msra.gmra.mrb[36].mxu1 %vm3006_vm2, %v3100_v28  ;;  %5169 = vmatprep.subr.bf16.mxu0 %v5703_v47 }
 0x5f5   : > { %v5784_v48 = vpop.eup %5783  ;;  %5331 = vmatpush3.bf16.msra.mxu1 %v7469_v51  ;;  %5332 = vmatprep.mubr.msk.bf16.mxu1 %vm6401_vm0, %v6400_v2  ;;  %v5704_v51 = vld [vmem:[%s7040_s13 + $0xc0] sm:$0xff]  }
 0x5f6   : > { %v3093_v52 = vmul.f32 %v5784_v48, %v7485_v43  ;;  %5191 = vmatprep.subr.bf16.mxu1 %v5704_v51  ;;  %v5727_v43 = vld [vmem:[%s7040_s13 + $0x70] sm:$0xff]  }
 0x5f7   : > { %v5786_v55 = vpop.eup %5785 }
 0x5f8   : > { %v3094_v42 = vmul.f32 %v5786_v55, %v7489_v25  ;;  %v3101_v56 = vpack.c.bf16 %v3093_v52, %v3093_v52  ;;  %v5729_v25 = vld [vmem:[%s7040_s13 + $0x30] sm:$0xff]  }
 0x5fa   : > { %5327 = vmatmul.mubr.msk.bf16.vlgmr.msra.gmra.mrb[40].mxu0 %vm3006_vm2, %v3101_v56  ;;  %v3102_v57 = vpack.c.bf16 %v3094_v42, %v3094_v42 }
 0x5fb   : > { %5170 = vmatpush3.bf16.msra.mxu0 %v5705_v49 }
 0x5fc   : > { %5333 = vmatmul.mubr.msk.bf16.vlgmr.msra.gmra.mrb[40].mxu1 %vm3006_vm2, %v3102_v57  ;;  %5171 = vmatprep.subr.bf16.mxu0 %v5707_v32 }
 0x5fd   : > { %5192 = vmatpush3.bf16.msra.mxu1 %v5706_v58 }
 0x5fe   : > { %5193 = vmatprep.subr.bf16.mxu1 %v5708_v59 }
 0x5ff   : > { %5172 = vmatpush3.bf16.msra.mxu0 %v5709_v53 }
 0x600   : > { %5173 = vmatprep.subr.bf16.mxu0 %v5711_v62 }
 0x601   : > { %5194 = vmatpush3.bf16.msra.mxu1 %v5710_v61 }
 0x602   : > { %5195 = vmatprep.subr.bf16.mxu1 %v5712_v60 }
 0x603   : > { %5174 = vmatpush3.bf16.msra.mxu0 %v5713_v63 }
 0x604   : > { %5175 = vmatprep.subr.bf16.mxu0 %v5715_v1 }
 0x605   : > { %5196 = vmatpush3.bf16.msra.mxu1 %v5714_v0 }
 0x606   : > { %5197 = vmatprep.subr.bf16.mxu1 %v5716_v4 }
 0x607   : > { %5176 = vmatpush3.bf16.msra.mxu0 %v5717_v5 }
 0x608   : > { %5177 = vmatprep.subr.bf16.mxu0 %v5719_v8 }
 0x609   : > { %5198 = vmatpush3.bf16.msra.mxu1 %v5718_v7 }
 0x60a   : > { %5199 = vmatprep.subr.bf16.mxu1 %v5720_v3 }
 0x60b   : > { %5178 = vmatpush3.bf16.msra.mxu0 %v5721_v24 }
 0x60c   : > { %5179 = vmatprep.subr.bf16.mxu0 %v5723_v33 }
 0x60d   : > { %5200 = vmatpush3.bf16.msra.mxu1 %v5722_v27 }
 0x60e   : > { %5201 = vmatprep.subr.bf16.mxu1 %v5724_v17 }
 0x60f   : > { %5180 = vmatpush3.bf16.msra.mxu0 %v5725_v35 }
 0x610   : > { %5181 = vmatprep.subr.bf16.mxu0 %v5727_v43 }
 0x611   : > { %5202 = vmatpush3.bf16.msra.mxu1 %v5726_v50 }
 0x612   : > { %5203 = vmatprep.subr.bf16.mxu1 %v5728_v18 }
 0x613   : > { %5182 = vmatpush3.bf16.msra.mxu0 %v5729_v25 }
 0x614   : > { %5183 = vmatprep.subr.bf16.mxu0 %v5731_v9 }
 0x615   : > { %5204 = vmatpush3.bf16.msra.mxu1 %v5730_v30 }
 0x616   : > { %5205 = vmatprep.subr.bf16.mxu1 %v5732_v54 }
 0x617   : > { %5184 = vmatpush3.bf16.msra.mxu0 %v5733_v10 }
 0x618   : > { %5336 = vmatprep.subr.bf16.mxu0 %v6400_v2 }
 0x619   : > { %5206 = vmatpush3.bf16.msra.mxu1 %v5734_v11 }
 0x61a   : > { %5356 = vmatprep.subr.bf16.mxu1 %v6400_v2 }
 0x6b5   : > { %v3144_v37 = vpop.f32.mrb[28].mxu0 }
 0x6b6   : > { %v5292_v6 = vpop.f32.mrb[29].mxu0  ;;  %v3472_v20 = vpack.c.bf16 %v3144_v37, %v3144_v37 }
 0x6b7   : > { %v3147_v12 = vpop.f32.mrb[30].mxu0  ;;  %v3190_v13 = vpop.f32.mrb[28].mxu1 }
 0x6b8   : > { %v5293_v14 = vpop.f32.mrb[31].mxu0  ;;  %v5298_v15 = vpop.f32.mrb[29].mxu1  ;;  %v3506_v29 = vpack.c.bf16 %v3190_v13, %v3190_v13  ;;  %v3479_v46 = vrot.slane %v3472_v20, %v7229_v23 }
 0x6b9   : > { %v3193_v16 = vpop.f32.mrb[30].mxu1 }
 0x6ba   : > { %v5299_v19 = vpop.f32.mrb[31].mxu1  ;;  %v3513_v28 = vrot.slane %v3506_v29, %v7229_v23 }
 0x6bd   : > { %v3236_v21 = vpop.f32.mrb[32].mxu0 }
 0x6be   : > { %v3480_v22 = vpack.c.bf16 %v3236_v21, %v3236_v21  ;;  %v5304_v36 = vpop.f32.mrb[33].mxu0 }
 0x6bf   : > { %v3239_v44 = vpop.f32.mrb[34].mxu0  ;;  %v3282_v34 = vpop.f32.mrb[32].mxu1 }
 0x6c0   : > { %v3487_v41 = vrot.slane %v3480_v22, %v7229_v23  ;;  %v3514_v45 = vpack.c.bf16 %v3282_v34, %v3282_v34  ;;  %v5305_v26 = vpop.f32.mrb[35].mxu0  ;;  %v5310_v31 = vpop.f32.mrb[33].mxu1 }
 0x6c1   : > { %v3285_v40 = vpop.f32.mrb[34].mxu1 }
 0x6c2   : > { %v3488_v48 = vcombine.low %v3479_v46, %v3487_v41  ;;  %v3489_v52 = vcombine.high %v3479_v46, %v3487_v41  ;;  %v3521_v55 = vrot.slane %v3514_v45, %v7229_v23  ;;  %v5311_v42 = vpop.f32.mrb[35].mxu1 }
 0x6c4   : > { %v3496_v56 = vrot.slane %v3488_v48, %v7235_v38  ;;  %v3503_v57 = vrot.slane %v3489_v52, %v7235_v38  ;;  %v3522_v47 = vcombine.low %v3513_v28, %v3521_v55  ;;  %v3523_v51 = vcombine.high %v3513_v28, %v3521_v55 }
 0x6c5   : > { %v3328_v49 = vpop.f32.mrb[36].mxu0 }
 0x6c6   : > { %v3504_v58 = vcombine.high %v3496_v56, %v6399_v39  ;;  %v5316_v32 = vpop.f32.mrb[37].mxu0  ;;  %v3530_v59 = vrot.slane %v3522_v47, %v7235_v38  ;;  %v3537_v53 = vrot.slane %v3523_v51, %v7235_v38  ;;  %v3505_v60 = vcombine.high %v3503_v57, %v6399_v39 }
 0x6c7   : > { %v3331_v61 = vpop.f32.mrb[38].mxu0  ;;  %v3374_v62 = vpop.f32.mrb[36].mxu1  ;;  %v3612_v63 = vshrl.u32 %v3496_v56, 16  ;;  %v3628_v0 = vshrl.u32 %v3503_v57, 16  ;;  %v3540_v35 = vpack.c.bf16 %v3328_v49, %v3328_v49 }
 0x6c8   : > { %v5317_v1 = vpop.f32.mrb[39].mxu0  ;;  %v5322_v4 = vpop.f32.mrb[37].mxu1  ;;  %v3538_v5 = vcombine.high %v3530_v59, %v6399_v39  ;;  %v3539_v7 = vcombine.high %v3537_v53, %v6399_v39  ;;  %v3610_v8 = vpack.i.b16 %v3530_v59, %v3496_v56  ;;  %v3613_v3 = vshrl.u32 %v3530_v59, 16 }
 0x6c9   : > { %v3377_v24 = vpop.f32.mrb[38].mxu1  ;;  %v3620_v27 = vshrl.u32 %v3504_v58, 16  ;;  %v3626_v33 = vpack.i.b16 %v3537_v53, %v3503_v57  ;;  %v3629_v17 = vshrl.u32 %v3537_v53, 16  ;;  %v3636_v9 = vshrl.u32 %v3505_v60, 16 }
 0x6ca   : > { %v5323_v50 = vpop.f32.mrb[39].mxu1  ;;  %v3614_v43 = vpack.i.b16 %v3613_v3, %v3612_v63  ;;  %v3618_v18 = vpack.i.b16 %v3538_v5, %v3504_v58  ;;  %v3621_v25 = vshrl.u32 %v3538_v5, 16  ;;  %v3634_v30 = vpack.i.b16 %v3539_v7, %v3505_v60 }
 0x6cb   : > { %v3630_v54 = vpack.i.b16 %v3629_v17, %v3628_v0  ;;  %v3637_v10 = vshrl.u32 %v3539_v7, 16  ;;  %v3672_v11 = vcombine.low %v3610_v8, %v3626_v33  ;;  %v3574_v12 = vpack.c.bf16 %v3374_v62, %v3374_v62 }
 0x6cc   : > { %v3622_v37 = vpack.i.b16 %v3621_v25, %v3620_v27  ;;  %v3680_v6 = vcombine.low %v3618_v18, %v3634_v30  ;;  %v3547_v36 = vrot.slane %v3540_v35, %v7229_v23 }
 0x6cd   : > { %v3420_v13 = vpop.f32.mrb[40].mxu0  ;;  %v3638_v14 = vpack.i.b16 %v3637_v10, %v3636_v9  ;;  %v3722_v15 = vcombine.low %v3614_v43, %v3630_v54  ;;  %v3679_v29 = vrot.slane %v3672_v11, %v7229_v23  ;;  %v3581_v26 = vrot.slane %v3574_v12, %v7229_v23 }
 0x6ce   : > { %v3548_v16 = vpack.c.bf16 %v3420_v13, %v3420_v13  ;;  %v5328_v19 = vpop.f32.mrb[41].mxu0  ;;  %v3687_v22 = vrot.slane %v3680_v6, %v7229_v23 }
 0x6cf   : > { %v3423_v20 = vpop.f32.mrb[42].mxu0  ;;  %v3466_v21 = vpop.f32.mrb[40].mxu1  ;;  %v3730_v45 = vcombine.low %v3622_v37, %v3638_v14  ;;  %v3729_v56 = vrot.slane %v3722_v15, %v7229_v23 }
 0x6d0   : > { %v3555_v44 = vrot.slane %v3548_v16, %v7229_v23  ;;  %v3582_v34 = vpack.c.bf16 %v3466_v21, %v3466_v21  ;;  %v5329_v46 = vpop.f32.mrb[43].mxu0  ;;  %v5334_v41 = vpop.f32.mrb[41].mxu1  ;;  %v3704_v40 = vcombine.low %v3679_v29, %v3687_v22 }
 0x6d1   : > { %v3469_v31 = vpop.f32.mrb[42].mxu1  ;;  %v3737_v42 = vrot.slane %v3730_v45, %v7229_v23 }
 0x6d2   : > { %v3556_v28 = vcombine.low %v3547_v36, %v3555_v44  ;;  %v3557_v48 = vcombine.high %v3547_v36, %v3555_v44  ;;  %v3589_v52 = vrot.slane %v3582_v34, %v7229_v23  ;;  %v5335_v55 = vpop.f32.mrb[43].mxu1  ;;  %v3711_v12 = vrot.slane %v3704_v40, %v7235_v38 }
 0x6d3   : > { %v3754_v58 = vcombine.low %v3729_v56, %v3737_v42 }
 0x6d4   : > { %v3564_v57 = vrot.slane %v3556_v28, %v7235_v38  ;;  %v3571_v47 = vrot.slane %v3557_v48, %v7235_v38  ;;  %v3590_v51 = vcombine.low %v3581_v26, %v3589_v52  ;;  %v3591_v49 = vcombine.high %v3581_v26, %v3589_v52 }
 0x6d5   : > { %v3761_v19 = vrot.slane %v3754_v58, %v7235_v38  ;;  %v5791_v58 = vld [vmem:[#allocation2] sm:$0xff] }
 0x6d6   : > { %v3572_v32 = vcombine.high %v3564_v57, %v6399_v39  ;;  %v3598_v59 = vrot.slane %v3590_v51, %v7235_v38  ;;  %v3605_v53 = vrot.slane %v3591_v49, %v7235_v38  ;;  %v3573_v61 = vcombine.high %v3571_v47, %v6399_v39  ;;  %v5097_v49 = vld [vmem:[%s769_s24] ss:$0 sm:$0xff] }
 0x6d7   : > { %v3644_v62 = vshrl.u32 %v3564_v57, 16  ;;  %v3660_v5 = vshrl.u32 %v3571_v47, 16 }
 0x6d8   : > { %v3606_v60 = vcombine.high %v3598_v59, %v6399_v39  ;;  %v3607_v63 = vcombine.high %v3605_v53, %v6399_v39  ;;  %v3642_v0 = vpack.i.b16 %v3598_v59, %v3564_v57  ;;  %v3645_v1 = vshrl.u32 %v3598_v59, 16 }
 0x6d9   : > { %v3652_v4 = vshrl.u32 %v3572_v32, 16  ;;  %v3658_v7 = vpack.i.b16 %v3605_v53, %v3571_v47  ;;  %v3661_v8 = vshrl.u32 %v3605_v53, 16  ;;  %v3668_v17 = vshrl.u32 %v3573_v61, 16 }
 0x6da   : > { %v3646_v3 = vpack.i.b16 %v3645_v1, %v3644_v62  ;;  %v3650_v24 = vpack.i.b16 %v3606_v60, %v3572_v32  ;;  %v3653_v27 = vshrl.u32 %v3606_v60, 16  ;;  %v3666_v33 = vpack.i.b16 %v3607_v63, %v3573_v61  ;;  %v5792_v61 = vld [vmem:[#allocation2 + $0x8] sm:$0xff] }
 0x6db   : > { %v3662_v35 = vpack.i.b16 %v3661_v8, %v3660_v5  ;;  %v3669_v50 = vshrl.u32 %v3607_v63, 16  ;;  %v3688_v43 = vcombine.low %v3642_v0, %v3658_v7  ;;  %v5735_v1 = vld [vmem:[%s7049_s25] sm:$0xff]   ;;  %v5737_v5 = vld [vmem:[%s7049_s25 + $0x10] sm:$0xff]   ;;  %v5738_v7 = vld [vmem:[%s7049_s25 + $0x18] sm:$0xff]  }
 0x6dc   : > { %v3654_v18 = vpack.i.b16 %v3653_v27, %v3652_v4  ;;  %v3696_v25 = vcombine.low %v3650_v24, %v3666_v33  ;;  %v5736_v4 = vld [vmem:[%s7049_s25 + $0x8] sm:$0xff]   ;;  %v5739_v8 = vld [vmem:[%s7049_s25 + $0x20] sm:$0xff]   ;;  %v5741_v24 = vld [vmem:[%s7049_s25 + $0x30] sm:$0xff]  }
 0x6dd   : > { %v3670_v30 = vpack.i.b16 %v3669_v50, %v3668_v17  ;;  %v3738_v9 = vcombine.low %v3646_v3, %v3662_v35  ;;  %v3695_v39 = vrot.slane %v3688_v43, %v7229_v23  ;;  %v5740_v3 = vld [vmem:[%s7049_s25 + $0x28] sm:$0xff]   ;;  %v5742_v27 = vld [vmem:[%s7049_s25 + $0x38] sm:$0xff]  }
 0x6de   : > { %v3703_v54 = vrot.slane %v3696_v25, %v7229_v23  ;;  %v5743_v33 = vld [vmem:[%s7057_s0] sm:$0xff]   ;;  %v5744_v17 = vld [vmem:[%s7057_s0 + $0x8] sm:$0xff]   ;;  %v5745_v35 = vld [vmem:[%s7057_s0 + $0x10] sm:$0xff]  }
 0x6df   : > { %v3746_v10 = vcombine.low %v3654_v18, %v3670_v30  ;;  %v3745_v37 = vrot.slane %v3738_v9, %v7229_v23  ;;  %v5746_v50 = vld [vmem:[%s7057_s0 + $0x18] sm:$0xff]   ;;  %v5747_v43 = vld [vmem:[%s7057_s0 + $0x20] sm:$0xff]   ;;  %v5748_v18 = vld [vmem:[%s7057_s0 + $0x28] sm:$0xff]  }
 0x6e0   : > { %v3712_v11 = vcombine.low %v3695_v39, %v3703_v54 }
 0x6e1   : > { %v3753_v6 = vrot.slane %v3746_v10, %v7229_v23 }
 0x6e2   : > { %v3719_v13 = vrot.slane %v3712_v11, %v7235_v38 }
 0x6e3   : > { %v3762_v14 = vcombine.low %v3745_v37, %v3753_v6 }
 0x6e4   : > { %v3720_v15 = vcombine.low %v3711_v12, %v3719_v13  ;;  %v3721_v16 = vcombine.high %v3711_v12, %v3719_v13 }
 0x6e5   : > { %v3769_v20 = vrot.slane %v3762_v14, %v7235_v38 }
 0x6e6   : > { %v3776_v22 = vshrl.u32 %v3720_v15, 16  ;;  %v3784_v36 = vshrl.u32 %v3721_v16, 16 }
 0x6e7   : > { %v3770_v21 = vcombine.low %v3761_v19, %v3769_v20  ;;  %v3771_v29 = vcombine.high %v3761_v19, %v3769_v20 }
 0x6e9   : > { %v3777_v44 = vshrl.u32 %v3770_v21, 16  ;;  %v3785_v34 = vshrl.u32 %v3771_v29, 16  ;;  %v3774_v46 = vpack.i.b16 %v3770_v21, %v3720_v15  ;;  %v3782_v41 = vpack.i.b16 %v3771_v29, %v3721_v16  ;;  %v5098_v21 = vld [vmem:[%s827_s5] ss:$0 sm:$0xff] }
 0x6eb   : > { %v3778_v23 = vpack.i.b16 %v3777_v44, %v3776_v22  ;;  %v3786_v45 = vpack.i.b16 %v3785_v34, %v3784_v36 }
 0x6ed   : > { %4076 = vmatprep.mubr.bf16.mxu0 %v3778_v23  ;;  %4117 = vmatprep.mubr.bf16.mxu1 %v3786_v45 }
 0x6ee   : > { %4077 = vmatmul.mubr.bf16.vlgmr.msra.gmra.mrb[44].mxu0 %v3774_v46  ;;  %4118 = vmatmul.mubr.bf16.vlgmr.msra.gmra.mrb[44].mxu1 %v3782_v41  ;;  %v5099_v46 = vld [vmem:[%s835_s27] ss:$0 sm:$0xff] }
 0x6ef   : > { %5352 = vmatprep.mubr.msk.bf16.mxu0 %vm6401_vm0, %v6400_v2  ;;  %5372 = vmatprep.mubr.msk.bf16.mxu1 %vm6401_vm0, %v6400_v2 }
 0x6f0   : > { %5337 = vmatpush3.bf16.msra.mxu0 %v5735_v1  ;;  %5357 = vmatpush3.bf16.msra.mxu1 %v5743_v33  ;;  %v5794_v33 = vld [vmem:[#allocation26 + $0x8] sm:$0xff] (!%p5118_p11)  }
 0x6f1   : > { %5338 = vmatprep.subr.bf16.mxu0 %v6400_v2  ;;  %5358 = vmatprep.subr.bf16.mxu1 %v6400_v2 }
 0x6f4   : > { %5339 = vmatpush3.bf16.msra.mxu0 %v5736_v4  ;;  %5359 = vmatpush3.bf16.msra.mxu1 %v5744_v17  ;;  %v5795_v17 = vld [vmem:[#allocation26 + $0x10] sm:$0xff] (!%p5118_p11)  }
 0x6f5   : > { %5340 = vmatprep.subr.bf16.mxu0 %v6400_v2  ;;  %5360 = vmatprep.subr.bf16.mxu1 %v6400_v2 }
 0x6f8   : > { %5341 = vmatpush3.bf16.msra.mxu0 %v5737_v5  ;;  %5361 = vmatpush3.bf16.msra.mxu1 %v5745_v35  ;;  %v5796_v35 = vld [vmem:[#allocation26 + $0x18] sm:$0xff] (!%p5118_p11)  }
 0x6f9   : > { %5342 = vmatprep.subr.bf16.mxu0 %v6400_v2  ;;  %5362 = vmatprep.subr.bf16.mxu1 %v6400_v2 }
 0x6fc   : > { %5343 = vmatpush3.bf16.msra.mxu0 %v5738_v7  ;;  %5363 = vmatpush3.bf16.msra.mxu1 %v5746_v50  ;;  %v5797_v50 = vld [vmem:[#allocation26 + $0x20] sm:$0xff] (!%p5118_p11)  }
 0x6fd   : > { %5344 = vmatprep.subr.bf16.mxu0 %v6400_v2  ;;  %5364 = vmatprep.subr.bf16.mxu1 %v6400_v2 }
 0x700   : > { %5345 = vmatpush3.bf16.msra.mxu0 %v5739_v8  ;;  %5365 = vmatpush3.bf16.msra.mxu1 %v5747_v43  ;;  %v5798_v43 = vld [vmem:[#allocation26 + $0x28] sm:$0xff] (!%p5118_p11)  }
 0x701   : > { %5346 = vmatprep.subr.bf16.mxu0 %v6400_v2  ;;  %5366 = vmatprep.subr.bf16.mxu1 %v6400_v2 }
 0x704   : > { %5347 = vmatpush3.bf16.msra.mxu0 %v5740_v3  ;;  %5367 = vmatpush3.bf16.msra.mxu1 %v5748_v18  ;;  %v5799_v18 = vld [vmem:[#allocation26 + $0x30] sm:$0xff] (!%p5118_p11)  }
 0x705   : > { %5348 = vmatprep.subr.bf16.mxu0 %v6400_v2  ;;  %5368 = vmatprep.subr.bf16.mxu1 %v6400_v2 }
 0x708   : > { %5349 = vmatpush3.bf16.msra.mxu0 %v5741_v24  ;;  %v5793_v24 = vld [vmem:[#allocation26] sm:$0xff] (!%p5118_p11)  }
 0x709   : > { %5350 = vmatprep.subr.bf16.mxu0 %v6400_v2 }
 0x70c   : > { %5351 = vmatpush3.bf16.msra.mxu0 %v5742_v27  ;;  %v6404_v27 = vmov (!%p5118_p11), 0.0  }
 0x70d   : > { %5376 = vmatprep.subr.bf16.mxu0 (!%p5118_p11), %v6404_v27 }
 0x7c1   : > { %v5185_v38 = vpop.f32.mrb[44].mxu0  ;;  %v5207_v26 = vpop.f32.mrb[44].mxu1 }
 0x7c2   : > { %v5186_v31 = vpop.f32.mrb[45].mxu0  ;;  %v5208_v40 = vpop.f32.mrb[45].mxu1 }
 0x7c3   : > { %v5187_v28 = vadd.f32 %v5186_v31, %v5185_v38  ;;  %v5209_v48 = vadd.f32 %v5208_v40, %v5207_v26  ;;  %v5188_v52 = vpop.f32.mrb[46].mxu0  ;;  %v5210_v55 = vpop.f32.mrb[46].mxu1  ;;  %v5749_v26 = vld [vmem:[%s7057_s0 + $0x30] sm:$0xff]   ;;  %v5750_v31 = vld [vmem:[%s7057_s0 + $0x38] sm:$0xff]  }
 0x7c4   : > { %v5189_v42 = vpop.f32.mrb[47].mxu0  ;;  %v5211_v56 = vpop.f32.mrb[47].mxu1  ;;  %5369 = vmatpush3.bf16.msra.mxu1 %v5749_v26  ;;  %v5100_v40 = vld [vmem:[%s786_s3] ss:$0 sm:$0xff] }
 0x7c5   : > { %v4120_v57 = vadd.f32 %v5209_v48, %v5187_v28  ;;  %v5190_v47 = vadd.f32 %v5189_v42, %v5188_v52  ;;  %v5212_v51 = vadd.f32 %v5211_v56, %v5210_v55  ;;  %5370 = vmatprep.subr.bf16.mxu1 %v6400_v2 }
 0x7c7   : > { %v4126_v32 = vadd.f32 %v5791_v58, %v4120_v57  ;;  %v4123_v59 = vadd.f32 %v5212_v51, %v5190_v47 }
 0x7c8   : > { %5371 = vmatpush3.bf16.msra.mxu1 %v5750_v31 }
 0x7c9   : > { %v7601_v53 = vadd.f32 %v5097_v49, %v4126_v32  ;;  %v4127_v62 = vadd.f32 %v5792_v61, %v4123_v59 }
 0x7cb   : > { %v7603_v60 = vadd.f32 %v5097_v49, %v4127_v62  ;;  %4139 = vadd.xlane.f32.xlu0 %v7601_v53  ;;  %v4145_v63 = vmul.f32 %v7601_v53, %v7601_v53  ;;  %v5109_v49 = vld [vmem:[%s803_s20] ss:$0 sm:$0xff] }
 0x7cd   : > { %4141 = vadd.xlane.f32.xlu1 %v7603_v60  ;;  %v4146_v0 = vmul.f32 %v7603_v60, %v7603_v60 }
 0x7cf   : > { %4147 = vadd.xlane.f32.xlu0 %v4145_v63 }
 0x7d1   : > { %4149 = vadd.xlane.f32.xlu1 %v4146_v0 }
 0x858   : > { %v4140_v25 = vpop.xlane.xlu0 %4139 }
 0x859   : > { %v4143_v30 = vmul.f32 0.03125, %v4140_v25  ;;  %v5800_v25 = vld [vmem:[#allocation26 + $0x38] sm:$0xff] (!%p5118_p11)  }
 0x85a   : > { %v4142_v9 = vpop.xlane.xlu1 %4141 }
 0x85b   : > { %v4144_v39 = vmul.f32 0.03125, %v4142_v9  ;;  %v4153_v10 = vmul.f32 %v4143_v30, %v4143_v30  ;;  %v4157_v19 = vsub.f32 %v7601_v53, %v4143_v30 }
 0x85c   : > { %v4148_v54 = vpop.xlane.xlu0 %4147 }
 0x85d   : > { %v4151_v11 = vmul.f32 0.03125, %v4148_v54  ;;  %v4154_v6 = vmul.f32 %v4144_v39, %v4144_v39  ;;  %v4158_v29 = vsub.f32 %v7603_v60, %v4144_v39 }
 0x85e   : > { %v4150_v37 = vpop.xlane.xlu1 %4149 }
 0x85f   : > { %v4155_v12 = vsub.f32 %v4151_v11, %v4153_v10  ;;  %v4152_v13 = vmul.f32 0.03125, %v4150_v37 }
 0x861   : > { %v4159_v14 = vadd.f32 1e-05, %v4155_v12  ;;  %v4156_v15 = vsub.f32 %v4152_v13, %v4154_v6 }
 0x863   : > { %5787 = vrsqrt.f32 %v4159_v14  ;;  %v4160_v16 = vadd.f32 1e-05, %v4156_v15 }
 0x865   : > { %5789 = vrsqrt.f32 %v4160_v16 }
 0x86d   : > { %v5788_v20 = vpop.eup %5787 }
 0x86e   : > { %v4163_v22 = vmul.f32 %v5788_v20, %v4157_v19 }
 0x86f   : > { %v5790_v36 = vpop.eup %5789 }
 0x870   : > { %v4164_v44 = vmul.f32 %v5790_v36, %v4158_v29  ;;  %v4171_v34 = vmul.f32 %v5098_v21, %v4163_v22  ;;  %v5119_v36 = vld [vmem:[#allocation23] ss:$0 sm:$0xff] (!%p5118_p11) }
 0x872   : > { %v4172_v41 = vmul.f32 %v5098_v21, %v4164_v44  ;;  %v4179_v23 = vadd.f32 %v5099_v46, %v4171_v34 }
 0x874   : > { %v4180_v45 = vadd.f32 %v5099_v46, %v4172_v41  ;;  %v5120_v41 = vld [vmem:[#allocation24] ss:$0 sm:$0xff] (!%p5118_p11) }
 0x876   : > { %v4181_v38 = vpack.c.bf16 %v4180_v45, %v4179_v23 }
 0x878   : > { %5353 = vmatmul.mubr.bf16.vlgmr.msra.gmra.mrb[48].mxu0 %v4181_v38 }
 0x879   : > { %5377 = vmatpush3.bf16.msra.mxu0 (!%p5118_p11), %v5793_v24  ;;  %5392 = vmatprep.mubr.msk.bf16.mxu0 (!%p5118_p11), %vm6405_vm5, %v6404_v27 }
 0x87a   : > { %5378 = vmatprep.subr.bf16.mxu0 (!%p5118_p11), %v6404_v27 }
 0x87d   : > { %5379 = vmatpush3.bf16.msra.mxu0 (!%p5118_p11), %v5794_v33 }
 0x87e   : > { %5380 = vmatprep.subr.bf16.mxu0 (!%p5118_p11), %v6404_v27 }
 0x881   : > { %5381 = vmatpush3.bf16.msra.mxu0 (!%p5118_p11), %v5795_v17 }
 0x882   : > { %5382 = vmatprep.subr.bf16.mxu0 (!%p5118_p11), %v6404_v27 }
 0x885   : > { %5383 = vmatpush3.bf16.msra.mxu0 (!%p5118_p11), %v5796_v35 }
 0x886   : > { %5384 = vmatprep.subr.bf16.mxu0 (!%p5118_p11), %v6404_v27 }
 0x889   : > { %5385 = vmatpush3.bf16.msra.mxu0 (!%p5118_p11), %v5797_v50 }
 0x88a   : > { %5386 = vmatprep.subr.bf16.mxu0 (!%p5118_p11), %v6404_v27 }
 0x88d   : > { %5387 = vmatpush3.bf16.msra.mxu0 (!%p5118_p11), %v5798_v43 }
 0x88e   : > { %5388 = vmatprep.subr.bf16.mxu0 (!%p5118_p11), %v6404_v27 }
 0x891   : > { %5389 = vmatpush3.bf16.msra.mxu0 (!%p5118_p11), %v5799_v18 }
 0x892   : > { %5390 = vmatprep.subr.bf16.mxu0 (!%p5118_p11), %v6404_v27 }
 0x895   : > { %5391 = vmatpush3.bf16.msra.mxu0 (!%p5118_p11), %v5800_v25 }
 0x94b   : > { %v4287_v28 = vpop.f32.mrb[48].mxu0 }
 0x94c   : > { %v4288_v48 = vadd.f32 %v5100_v40, %v4287_v28  ;;  %v5354_v52 = vpop.f32.mrb[49].mxu0 }
 0x94d   : > { %v4290_v55 = vpop.f32.mrb[50].mxu0 }
 0x94e   : > { %v4291_v42 = vadd.f32 %v5100_v40, %v4290_v55  ;;  %v5355_v56 = vpop.f32.mrb[51].mxu0  ;;  %v4294_v57 = vmax.f32 %v4288_v48, 0.0 }
 0x950   : > { %v4295_v47 = vmax.f32 %v4291_v42, 0.0 }
 0x952   : > { %v4296_v51 = vpack.c.bf16 %v4295_v47, %v4294_v57  ;;  %v5121_v47 = vld [vmem:[#allocation27] ss:$0 sm:$0xff] (!%p5118_p11) }
 0x954   : > { %5373 = vmatmul.mubr.bf16.vlgmr.msra.gmra.mrb[48].mxu1 %v4296_v51 }
 0xa27   : > { %v4402_v58 = vpop.f32.mrb[48].mxu1 }
 0xa28   : > { %v4403_v32 = vadd.f32 %v5109_v49, %v4402_v58  ;;  %v5374_v59 = vpop.f32.mrb[49].mxu1  ;;  %4416 = sbr.rel (%p5118_p11) target bundleno = 3004 (0xbbc), region = 156 }
 0xa29   : > { %v4405_v2 = vpop.f32.mrb[50].mxu1 }
 0xa2a   : > { %v7652_v61 = vadd.f32 %v4403_v32, %v7601_v53  ;;  %v4406_v62 = vadd.f32 %v5109_v49, %v4405_v2  ;;  %v5375_v63 = vpop.f32.mrb[51].mxu1 }
 0xa2c   : > { %4411 = vst [vmem:[#allocation2] sm:$0xff] %v7652_v61  ;;  %v7656_v0 = vadd.f32 %v4406_v62, %v7603_v60  ;;  %v4434_v53 = vmul.f32 (!%p5118_p11), %v7652_v61, %v7652_v61  ;;  %v4425_v60 = vsel (!%p5118_p11), %vm4424_vm4, %v7652_v61, 0.0 }
 0xa2e   : > { %4412 = vst [vmem:[#allocation2 + $0x8] sm:$0xff] %v7656_v0  ;;  %v4421_v1 = vrot.slane (!%p5118_p11), %v7656_v0, 7  ;;  %v4435_v4 = vmul.f32 (!%p5118_p11), %v7656_v0, %v7656_v0  ;;  %v4441_v3 = vsel (!%p5118_p11), %vm4424_vm4, %v4434_v53, 0.0 }
 0xa30   : > { %v4429_v5 = vsel %vm4428_vm3, %v4421_v1, 0.0  ;;  %v4438_v7 = vrot.slane %v4435_v4, 7 }
 0xa31   : > { %4430 = vadd.xlane.f32.xlu0 %v4429_v5 }
 0xa32   : > { %v4444_v8 = vsel %vm4428_vm3, %v4438_v7, 0.0 }
 0xa33   : > { %4445 = vadd.xlane.f32.xlu1 %v4444_v8 }
 0xa35   : > { %4426 = vadd.xlane.f32.xlu0 %v4425_v60 }
 0xa37   : > { %4442 = vadd.xlane.f32.xlu1 %v4441_v3 }
 0xabe   : > { %v4431_v30 = vpop.xlane.xlu0 %4430 }
 0xabf   : > { %v4433_v9 = vmul.f32 0.03125, %v4431_v30 }
 0xac0   : > { %v4446_v39 = vpop.xlane.xlu1 %4445 }
 0xac1   : > { %v4450_v54 = vmul.f32 %v4433_v9, %v4433_v9  ;;  %v4448_v10 = vmul.f32 0.03125, %v4446_v39  ;;  %v4455_v20 = vrot.slane %v4433_v9, 1 }
 0xac2   : > { %v4427_v11 = vpop.xlane.xlu0 %4426 }
 0xac3   : > { %v4452_v37 = vsub.f32 %v4448_v10, %v4450_v54  ;;  %v4432_v6 = vmul.f32 0.03125, %v4427_v11  ;;  %v4459_v29 = vsub.f32 %v7656_v0, %v4455_v20 }
 0xac4   : > { %v4443_v12 = vpop.xlane.xlu1 %4442 }
 0xac5   : > { %v4461_v13 = vadd.f32 1e-05, %v4452_v37  ;;  %v4449_v14 = vmul.f32 %v4432_v6, %v4432_v6  ;;  %v4447_v15 = vmul.f32 0.03125, %v4443_v12  ;;  %v4458_v34 = vsub.f32 %v7652_v61, %v4432_v6 }
 0xac7   : > { %5801 = vrsqrt.f32 %v4461_v13  ;;  %v4451_v16 = vsub.f32 %v4447_v15, %v4449_v14 }
 0xac9   : > { %v4460_v19 = vadd.f32 1e-05, %v4451_v16 }
 0xacb   : > { %5803 = vrsqrt.f32 %v4460_v19 }
 0xad1   : > { %v5802_v21 = vpop.eup %5801 }
 0xad2   : > { %v4466_v22 = vrot.slane %v5802_v21, 1 }
 0xad4   : > { %v4470_v44 = vmul.f32 %v4466_v22, %v4459_v29 }
 0xad5   : > { %v5804_v46 = vpop.eup %5803 }
 0xad6   : > { %v4478_v23 = vmul.f32 %v5119_v36, %v4470_v44  ;;  %v4469_v45 = vmul.f32 %v5804_v46, %v4458_v34 }
 0xad8   : > { %v4477_v38 = vmul.f32 %v5119_v36, %v4469_v45  ;;  %v4486_v26 = vadd.f32 %v5120_v41, %v4478_v23 }
 0xada   : > { %v4485_v31 = vadd.f32 %v5120_v41, %v4477_v38  ;;  %v4488_v40 = vpack.c.bf16 %v4486_v26, %v4486_v26 }
 0xadc   : > { %v4487_v28 = vpack.c.bf16 %v4485_v31, %v4485_v31  ;;  %v4515_v48 = vunpack.c.l.b16 %v4488_v40 }
 0xade   : > { %v4514_v52 = vunpack.c.l.b16 %v4487_v28  ;;  %v4517_v42 = vrot.slane %v4515_v48, 6 }
 0xae0   : > { %v4516_v55 = vrot.slane %v4514_v52, 7 }
 0xae2   : > { %v4519_v56 = vsel %vm4518_vm6, %v4517_v42, %v4516_v55 }
 0xae3   : > { %v4520_v57 = vpack.c.b16 %v4519_v56, %v4519_v56 }
 0xae5   : > { %5393 = vmatmul.mubr.bf16.vlgmr.msra.gmra.mrb[0].mxu0 %v4520_v57 }
 0xbb8   : > { %v4604_v51 = vpop.f32.mrb[0].mxu0 }
 0xbb9   : > { %v4605_v49 = vadd.f32 %v5121_v47, %v4604_v51  ;;  %v5394_v58 = vpop.f32.mrb[1].mxu0 }
 0xbba   : > { %v4607_v32 = vpop.f32.mrb[2].mxu0 }
 0xbbb   : > { %4610 = vst [vmem:[#allocation29] sm:$0x3] %v4605_v49  ;;  %v5395_v59 = vpop.f32.mrb[3].mxu0 }
 0xbbc PF: > { %s7819_s17 = sld [smem:[#allocation43_spill]]  ;;  %s6406_s19 = smov [#allocation29]  }
 0xbbd   : > { %s4618_s7 = sshll.u32 %s6406_s19, 4  ;;  %s4619_s7 = int_to_ptr.vmem [resolvable:$true] %s4618_s7 }
 0xbbe   : > { %s6275_s21 = scalar_lea.vmem %s4619_s7, 32  ;;  %p6282_p9 = scmp.lt.s32.totalorder %s4619_s7, %s4619_s7 }
 0xbbf   : > { %p6276_p13 = scmp.ne.s32.totalorder %s4619_s7, %s6275_s21  ;;  %p6283_p7 = scmp.lt.s32.totalorder %s6275_s21, %s6275_s21 }
 0xbc1   : > { %p6284_p5 = por %p6283_p7, %p6282_p9 }
 0xbc2   : > { %p5506_p12 = scmp.eq.s32.totalorder %s7819_s17, 1 }
 0xbc4   : > { %p6277_p6 = pnand %p6276_p13, %p5506_p12 }
 0xbc6   : > { %p6278_p2 = pneg %p6277_p6 }
 0xbc8   : > { %p6285_p4 = pnand %p6284_p5, %p6278_p2 }
 0xbca   : > { %6288 = shalt.err (!%p6285_p4)
}
 0xbcb   : > { %s7820_s13 = sld [smem:[#allocation57_spill]] }
 0xbd1   : > { %s6289_s16 = scalar_lea.hbm %s7820_s13, 32 }
 0xbd2   : > { %p6290_p0 = scmp.ne.s32.totalorder %s7820_s13, %s6289_s16  ;;  %p6295_p1 = scmp.lt.u32.totalorder %s6289_s16, %s7820_s13 }
 0xbd4   : > { %p6291_p8 = pnand %p6290_p0, %p5506_p12 }
 0xbd6   : > { %p6292_p10 = pneg %p6291_p8 }
 0xbd8   : > { %p6297_p3 = pnand %p6295_p1, %p6292_p10 }
 0xbda   : > { %6300 = shalt.err (!%p6297_p3)
}
 0xbdb   : > { %5442 = dma.vmem_to_hbm [thread:$0]  (%p5506_p12), %s4619_s7, 32, %s7820_s13, [#allocation5]  }
 0xbdc   : > { %6358 = dma.done.wait (%p5506_p12), [#allocation5], 32  }
 0xbdd   : > { %6360 = vsyncadd (%p5506_p12), [#allocation5], 4294967264 }
 0xbde PF: > { %s7821_s24 = sld [smem:[#allocation44_spill]]  ;;  %s7822_s21 = sld [smem:[#allocation41_spill]] }
 0xbdf   : > { %s7823_s22 = sld [smem:[#allocation42_spill]]  ;;  %s7824_s23 = sld [smem:[#allocation45_spill]] }
 0xbe4   : > { %p45_p11 = scmp.ge.s32.totalorder %s7821_s24, 4  }
 0xbe6   :  { %47 = sbr.rel (!%p45_p11) target bundleno = 28 (0x1c), region = 270 }
 0xbed   :  { %4631 = vsyncpa [#allocation4], 1 }
 0xbee   :  { %4633 = vsyncpa [#allocation4 + $0x1], 1 }
 0xbef   :  { %4634 = vsyncpa [#allocation7], 1 }
 0xbf0   :  { %4636 = vsyncpa [#allocation7 + $0x1], 1 }
 0xbf1   :  { %4637 = vsyncpa [#allocation10], 1 }
 0xbf2   :  { %4639 = vsyncpa [#allocation10 + $0x1], 1 }
 0xbf3   :  { %4640 = vsyncpa [#allocation13], 1 }
 0xbf4   :  { %4642 = vsyncpa [#allocation13 + $0x1], 1 }
 0xbf5   :  { %4643 = vsyncpa [#allocation16], 1 }
 0xbf6   :  { %4645 = vsyncpa [#allocation16 + $0x1], 1 }
 0xbf7   :  { %4646 = vsyncpa [#allocation19], 1 }
 0xbf8   :  { %4648 = vsyncpa [#allocation19 + $0x1], 1 }
 0xbf9   :  { %4649 = vsyncpa [#allocation22], 1 }
 0xbfa   :  { %4651 = vsyncpa [#allocation22 + $0x1], 1 }
 0xbfb   :  { %4652 = vsyncpa [#allocation25], 1 }
 0xbfc   :  { %4653 = vsyncpa [#allocation28], 1 }
 0xbfd   :  { %4654 = vsyncpa [#allocation5], 1 }
 0xbfe   :  { %4656 = vsyncpa [#allocation5 + $0x1], 1 }

</bundles_post_ra>
